<compile_context>
chip_gen: v7x
topology: tpu7x:2x2x1
jax: 0.10.0
libtpu: 0.0.40
codegen_flags: <defaults>
</compile_context>

<pallas_src>
import functools

import jax
import jax.numpy as jnp
from jax.experimental import pallas as pl
from jax.experimental.pallas import tpu as pltpu

BN_EPS = 1e-5


# ----------------------------- in-kernel helpers ----------------------------

def _conv3x3_lanes(x, w9, masks, *, width, cin):
    """3x3 same-padding conv with channels on sublanes, flat (n,y,x) on lanes.

    x     : (Cin, L)      f32 activation block (whole images; L = k_img*H*W).
    w9    : (Cout, 9*Cin) bf16 weights, column order (ky, kx, cin).
    masks : (9, L)        f32 0/1 validity masks per tap, row order (dy, dx).
    Returns (Cout, L) f32, accumulated over 9 small MXU dots (no patch stack).
    """
    lanes = x.shape[1]
    acc = None
    k = 0
    for dy in (-1, 0, 1):
        for dx in (-1, 0, 1):
            d = dy * width + dx                   # neighbour offset in flat index
            amt = (-d) % lanes                    # shifted[l] == x[l + d]
            xs = x if amt == 0 else pltpu.roll(x, amt, 1)
            if not (dy == 0 and dx == 0):         # centre-tap mask is all ones
                xs = xs * masks[k:k + 1, :]       # zero out-of-image taps
            wk = w9[:, k * cin:(k + 1) * cin]     # (Cout, Cin) bf16, static slice
            part = jnp.dot(wk, xs.astype(jnp.bfloat16),
                           preferred_element_type=jnp.float32)
            acc = part if acc is None else acc + part
            k += 1
    return acc


# ----------------------------- fused Pallas kernel --------------------------

def _fused_lbcnn_kernel(x_ref, mask_ref, w1_ref, b1_ref, s1_ref, t1_ref,
                        bns_ref, bnt_ref, wl_ref, wp_ref, bp_ref, o_ref,
                        *, width, depth):
    """conv1+BN+ReLU followed by `depth` LBC blocks, all in VMEM."""
    masks = mask_ref[...]                                      # (9, L) f32
    cin = x_ref.shape[0]

    # --- conv1 -> BN -> ReLU -------------------------------------------------
    y = _conv3x3_lanes(x_ref[...], w1_ref[...], masks, width=width, cin=cin)
    y = (y + b1_ref[...]) * s1_ref[...] + t1_ref[...]
    x = jnp.maximum(y, 0.0)                                    # (C, L) f32
    c = x.shape[0]

    # --- depth x LBC blocks; activation stays resident -----------------------
    for d in range(depth):
        xb = x * bns_ref[d] + bnt_ref[d]                       # inference BatchNorm
        hid = _conv3x3_lanes(xb, wl_ref[d], masks, width=width, cin=c)
        hid = jnp.maximum(hid, 0.0)                            # (Cw, L) f32
        y = jnp.dot(wp_ref[d], hid.astype(jnp.bfloat16),       # 1x1 conv
                    preferred_element_type=jnp.float32)
        x = y + bp_ref[d] + x                                  # bias + residual

    o_ref[...] = x.astype(o_ref.dtype)


def lbcnn_fused(x, masks, conv1_w, conv1_b, bn1_s, bn1_t,
                lbc_s, lbc_t, lbc_w, lbc_wp, lbc_bp,
                *, width, hw, imgs_per_block):
    cin, m = x.shape
    c = conv1_w.shape[0]
    depth, cw = lbc_w.shape[0], lbc_w.shape[1]
    lane_blk = imgs_per_block * hw
    n_blocks = m // lane_blk
    kernel = functools.partial(_fused_lbcnn_kernel, width=width, depth=depth)
    return pl.pallas_call(
        kernel,
        out_shape=jax.ShapeDtypeStruct((c, m), jnp.float32),
        grid=(n_blocks,),
        in_specs=[
            pl.BlockSpec((cin, lane_blk), lambda i: (0, i)),       # input images
            pl.BlockSpec((9, lane_blk), lambda i: (0, 0)),         # edge masks
            pl.BlockSpec((c, 9 * cin), lambda i: (0, 0)),          # conv1 weight
            pl.BlockSpec((c, 1), lambda i: (0, 0)),                # conv1 bias
            pl.BlockSpec((c, 1), lambda i: (0, 0)),                # bn1 scale
            pl.BlockSpec((c, 1), lambda i: (0, 0)),                # bn1 shift
            pl.BlockSpec((depth, c, 1), lambda i: (0, 0, 0)),      # lbc bn scales
            pl.BlockSpec((depth, c, 1), lambda i: (0, 0, 0)),      # lbc bn shifts
            pl.BlockSpec((depth, cw, 9 * c), lambda i: (0, 0, 0)), # lbc conv weights
            pl.BlockSpec((depth, c, cw), lambda i: (0, 0, 0)),     # 1x1 weights
            pl.BlockSpec((depth, c, 1), lambda i: (0, 0, 0)),      # 1x1 biases
        ],
        out_specs=pl.BlockSpec((c, lane_blk), lambda i: (0, i)),
        compiler_params=pltpu.CompilerParams(dimension_semantics=("parallel",)),
    )(x, masks, conv1_w, conv1_b, bn1_s, bn1_t, lbc_s, lbc_t, lbc_w, lbc_wp, lbc_bp)


# ----------------------------- JAX glue ------------------------------------

def make_shift_masks(h, w):
    """(9, h*w) 0/1 masks marking, for each 3x3 tap (dy, dx), the output
    positions whose neighbour (y+dy, x+dx) lies inside the image."""
    ys = jnp.arange(h)
    xs = jnp.arange(w)
    rows = []
    for dy in (-1, 0, 1):
        for dx in (-1, 0, 1):
            my = (ys + dy >= 0) & (ys + dy < h)
            mx = (xs + dx >= 0) & (xs + dx < w)
            rows.append((my[:, None] & mx[None, :]).astype(jnp.float32).reshape(-1))
    return jnp.stack(rows, axis=0)


def _conv3x3_to_mat(w_oihw, cin_pad):
    """(Cout, Cin, 3, 3) -> (Cout, 9*cin_pad), column order (ky, kx, cin)."""
    cout, cin = w_oihw.shape[0], w_oihw.shape[1]
    w = jnp.transpose(w_oihw, (0, 2, 3, 1))          # (cout, ky, kx, cin)
    if cin_pad > cin:
        w = jnp.pad(w, ((0, 0), (0, 0), (0, 0), (0, cin_pad - cin)))
    return w.reshape(cout, 9 * cin_pad)


def _bn_scale_shift(bn):
    s = bn["gamma"] / jnp.sqrt(bn["var"] + BN_EPS)
    t = bn["beta"] - bn["mean"] * s
    return s, t


def _default_bn(c):
    # nn.BatchNorm2d init: gamma=1, beta=0, running_mean=0, running_var=1
    return {
        "gamma": jnp.ones((c,), jnp.float32),
        "beta": jnp.zeros((c,), jnp.float32),
        "mean": jnp.zeros((c,), jnp.float32),
        "var": jnp.ones((c,), jnp.float32),
    }


def _uniform(key, shape, bound):
    return jax.random.uniform(key, shape, jnp.float32, -bound, bound)


def init_params(key, nInputPlane=3, numChannels=8, numWeights=16, full=32,
                depth=2, sparsity=0.5, num_classes=10, pooled=6):
    keys = jax.random.split(key, depth + 3)
    cin_pad = ((nInputPlane + 7) // 8) * 8           # pad conv1 Cin to sublane multiple
    params = {}

    # conv1: Conv2d(nInputPlane, numChannels, 3, padding=1) + BN
    k1, k2 = jax.random.split(keys[0])
    bound = 1.0 / ((nInputPlane * 9) ** 0.5)
    w1 = _uniform(k1, (numChannels, nInputPlane, 3, 3), bound)
    b1 = _uniform(k2, (numChannels,), bound)
    params["conv1"] = {"w": _conv3x3_to_mat(w1, cin_pad).astype(jnp.bfloat16),
                       "b": b1, "bn": _default_bn(numChannels)}

    # LBC layers (weights stacked so the fused kernel gets fixed-arity inputs)
    lbc_bn, lbc_w, lbc_wp, lbc_bp = [], [], [], []
    for d in range(depth):
        ka, kb, kc, kd = jax.random.split(keys[1 + d], 4)
        shape = (numWeights, numChannels, 3, 3)
        bern = jax.random.bernoulli(ka, 0.5, shape).astype(jnp.float32) * 2.0 - 1.0
        keep = jax.random.uniform(kb, shape) <= sparsity
        w_lbc = jnp.where(keep, bern, 0.0)                    # frozen binary sparse weights
        b1x = 1.0 / (numWeights ** 0.5)
        lbc_bn.append(_default_bn(numChannels))
        lbc_w.append(_conv3x3_to_mat(w_lbc, numChannels).astype(jnp.bfloat16))
        lbc_wp.append(_uniform(kc, (numChannels, numWeights), b1x).astype(jnp.bfloat16))
        lbc_bp.append(_uniform(kd, (numChannels,), b1x))
    params["lbc"] = {
        "bn": lbc_bn,
        "w_lbc": jnp.stack(lbc_w),        # (depth, numWeights, 9*numChannels) bf16
        "w_1x1": jnp.stack(lbc_wp),       # (depth, numChannels, numWeights)   bf16
        "b_1x1": jnp.stack(lbc_bp),       # (depth, numChannels)               f32
    }

    # fc1 / fc2 (head is left to XLA; keep f32)
    in_f = numChannels * pooled * pooled             # hard-coded 6*6 like PyTorch
    kf1a, kf1b = jax.random.split(keys[depth + 1])
    kf2a, kf2b = jax.random.split(keys[depth + 2])
    params["fc1"] = {"w": _uniform(kf1a, (full, in_f), 1.0 / (in_f ** 0.5)),
                     "b": _uniform(kf1b, (full,), 1.0 / (in_f ** 0.5))}
    params["fc2"] = {"w": _uniform(kf2a, (num_classes, full), 1.0 / (full ** 0.5)),
                     "b": _uniform(kf2b, (num_classes,), 1.0 / (full ** 0.5))}
    return params


def lbcnn_forward(params, x_nchw):
    n, cin, h, w = x_nchw.shape
    hw = h * w
    assert hw % 128 == 0, "per-image flat spatial size must be a multiple of 128"
    cin_pad = params["conv1"]["w"].shape[1] // 9
    c = params["conv1"]["w"].shape[0]
    depth = params["lbc"]["w_lbc"].shape[0]

    # Block sizing: keep >=2 "parallel" grid steps when possible (v7x has 2
    # TensorCores); cap the per-step block at 8 images (small step count on
    # single-TC v5e/v6e, block well under the scoped-VMEM default).
    k_img = 1 if n <= 1 else max(1, min(8, n // 2))
    n_pad = -(-n // k_img) * k_img

    # NCHW -> channel-major (Cin_pad, N_pad*H*W); flat index = n*H*W + y*W + x.
    x = jnp.transpose(x_nchw, (1, 0, 2, 3)).astype(jnp.float32).reshape(cin, n, hw)
    x = jnp.pad(x, ((0, cin_pad - cin), (0, n_pad - n), (0, 0)))
    x = x.reshape(cin_pad, n_pad * hw)

    # Per-image masks tiled to the lane block (mask pattern is per-image periodic;
    # circular-roll wrap positions coincide with masked edge taps).
    masks = jnp.tile(make_shift_masks(h, w), (1, k_img))      # (9, k_img*HW)

    # Fold inference BatchNorm into scale/shift (tiny XLA glue).
    s1, t1 = _bn_scale_shift(params["conv1"]["bn"])
    ss, tt = [], []
    for bn in params["lbc"]["bn"]:
        s, t = _bn_scale_shift(bn)
        ss.append(s)
        tt.append(t)
    lbc_s = jnp.stack(ss).reshape(depth, c, 1)
    lbc_t = jnp.stack(tt).reshape(depth, c, 1)

    # conv1 -> BN -> ReLU -> depth x LBC blocks, ONE fused pallas_call.
    act = lbcnn_fused(
        x, masks,
        params["conv1"]["w"], params["conv1"]["b"].reshape(c, 1),
        s1.reshape(c, 1), t1.reshape(c, 1),
        lbc_s, lbc_t,
        params["lbc"]["w_lbc"], params["lbc"]["w_1x1"],
        params["lbc"]["b_1x1"].reshape(depth, c, 1),
        width=w, hw=hw, imgs_per_block=k_img)                  # (C, N_pad*HW) f32

    # AvgPool2d(5,5) + flatten + dropout(id) + fc1 + ReLU + dropout(id) + fc2
    # -- left to XLA per the perf review (a kernel here is pure launch overhead).
    hp, wp = h // 5, w // 5
    x4 = act.reshape(c, n_pad, h, w)[:, :n, :hp * 5, :wp * 5]
    pooled = x4.reshape(c, n, hp, 5, wp, 5).mean(axis=(3, 5))          # (C, N, hp, wp)
    feat = jnp.transpose(pooled, (1, 0, 2, 3)).reshape(n, c * hp * wp) # PyTorch flatten order
    hid = jnp.maximum(feat @ params["fc1"]["w"].T + params["fc1"]["b"], 0.0)
    return hid @ params["fc2"]["w"].T + params["fc2"]["b"]             # (N, num_classes)


if __name__ == "__main__":
    key = jax.random.PRNGKey(0)
    kx, kp = jax.random.split(key)

    # CIFAR-like shapes: spatial 32 so the hard-coded 6*6 pool/fc dims match.
    x = jax.random.normal(kx, (2, 3, 32, 32), jnp.float32)
    params = init_params(kp, nInputPlane=3, numChannels=8, numWeights=16,
                         full=32, depth=2, sparsity=0.5, num_classes=10)

    fwd = jax.jit(lbcnn_forward)
    out = jax.block_until_ready(fwd(params, x))
    assert out.shape == (2, 10)
    assert bool(jnp.all(jnp.isfinite(out)))
    print("KERNEL_OK")
</pallas_src>

<mosaic_0001>
module attributes {stable_mosaic.version = 11 : i64} {
  func.func @_fused_lbcnn_kernel(%arg0: i32, %arg1: memref<8x1024xf32, #tpu.memory_space<vmem>>, %arg2: memref<9x1024xf32, #tpu.memory_space<vmem>>, %arg3: memref<8x72xbf16, #tpu.memory_space<vmem>>, %arg4: memref<8x1xf32, #tpu.memory_space<vmem>>, %arg5: memref<8x1xf32, #tpu.memory_space<vmem>>, %arg6: memref<8x1xf32, #tpu.memory_space<vmem>>, %arg7: memref<2x8x1xf32, #tpu.memory_space<vmem>>, %arg8: memref<2x8x1xf32, #tpu.memory_space<vmem>>, %arg9: memref<2x16x72xbf16, #tpu.memory_space<vmem>>, %arg10: memref<2x8x16xbf16, #tpu.memory_space<vmem>>, %arg11: memref<2x8x1xf32, #tpu.memory_space<vmem>>, %arg12: memref<8x1024xf32, #tpu.memory_space<vmem>>) attributes {dimension_semantics = [#tpu.dimension_semantics<parallel>], iteration_bounds = array<i64: 2>, scalar_prefetch = 0 : i64, scratch_operands = 0 : i64, tpu.core_type = #tpu.core_type<tc>, window_params = [{transform_indices = @transform_0, window_bounds = array<i64: 8, 1024>}, {pipeline_mode = #tpu.pipeline_mode<synchronous>, transform_indices = @transform_1, window_bounds = array<i64: 9, 1024>}, {pipeline_mode = #tpu.pipeline_mode<synchronous>, transform_indices = @transform_2, window_bounds = array<i64: 8, 72>}, {pipeline_mode = #tpu.pipeline_mode<synchronous>, transform_indices = @transform_3, window_bounds = array<i64: 8, 1>}, {pipeline_mode = #tpu.pipeline_mode<synchronous>, transform_indices = @transform_4, window_bounds = array<i64: 8, 1>}, {pipeline_mode = #tpu.pipeline_mode<synchronous>, transform_indices = @transform_5, window_bounds = array<i64: 8, 1>}, {pipeline_mode = #tpu.pipeline_mode<synchronous>, transform_indices = @transform_6, window_bounds = array<i64: 2, 8, 1>}, {pipeline_mode = #tpu.pipeline_mode<synchronous>, transform_indices = @transform_7, window_bounds = array<i64: 2, 8, 1>}, {pipeline_mode = #tpu.pipeline_mode<synchronous>, transform_indices = @transform_8, window_bounds = array<i64: 2, 16, 72>}, {pipeline_mode = #tpu.pipeline_mode<synchronous>, transform_indices = @transform_9, window_bounds = array<i64: 2, 8, 16>}, {pipeline_mode = #tpu.pipeline_mode<synchronous>, transform_indices = @transform_10, window_bounds = array<i64: 2, 8, 1>}, {transform_indices = @transform_11, window_bounds = array<i64: 8, 1024>}]} {
    %c0 = arith.constant 0 : index
    %c0_0 = arith.constant 0 : index
    %0 = vector.load %arg2[%c0, %c0_0] : memref<9x1024xf32, #tpu.memory_space<vmem>>, vector<9x1024xf32>
    %c0_1 = arith.constant 0 : index
    %c0_2 = arith.constant 0 : index
    %1 = vector.load %arg1[%c0_1, %c0_2] : memref<8x1024xf32, #tpu.memory_space<vmem>>, vector<8x1024xf32>
    %c0_3 = arith.constant 0 : index
    %c0_4 = arith.constant 0 : index
    %2 = vector.load %arg3[%c0_3, %c0_4] : memref<8x72xbf16, #tpu.memory_space<vmem>>, vector<8x72xbf16>
    %c33_i32 = arith.constant 33 : i32
    %3 = tpu.dynamic_rotate %1 by %c33_i32 dim 1 : vector<8x1024xf32>, i32 -> vector<8x1024xf32>
    %4 = vector.extract_strided_slice %0 {offsets = [0, 0], sizes = [1, 1024], strides = [1, 1]} : vector<9x1024xf32> to vector<1x1024xf32>
    %5 = vector.broadcast %4 : vector<1x1024xf32> to vector<8x1024xf32>
    %6 = arith.mulf %3, %5 : vector<8x1024xf32>
    %7 = vector.extract_strided_slice %2 {offsets = [0, 0], sizes = [8, 8], strides = [1, 1]} : vector<8x72xbf16> to vector<8x8xbf16>
    %8 = arith.truncf %6 : vector<8x1024xf32> to vector<8x1024xbf16>
    %cst = arith.constant dense<0.000000e+00> : vector<8x1024xf32>
    %9 = tpu.matmul %7, %8, %cst {dimension_numbers = #tpu.dot_dimension_numbers<[1], [0], [0], [1], [0, 0, 1, 1], [], []>} : vector<8x8xbf16>, vector<8x1024xbf16>, vector<8x1024xf32> -> vector<8x1024xf32>
    %c32_i32 = arith.constant 32 : i32
    %10 = tpu.dynamic_rotate %1 by %c32_i32 dim 1 : vector<8x1024xf32>, i32 -> vector<8x1024xf32>
    %11 = vector.extract_strided_slice %0 {offsets = [1, 0], sizes = [1, 1024], strides = [1, 1]} : vector<9x1024xf32> to vector<1x1024xf32>
    %12 = vector.broadcast %11 : vector<1x1024xf32> to vector<8x1024xf32>
    %13 = arith.mulf %10, %12 : vector<8x1024xf32>
    %14 = vector.extract_strided_slice %2 {offsets = [0, 8], sizes = [8, 8], strides = [1, 1]} : vector<8x72xbf16> to vector<8x8xbf16>
    %15 = arith.truncf %13 : vector<8x1024xf32> to vector<8x1024xbf16>
    %cst_5 = arith.constant dense<0.000000e+00> : vector<8x1024xf32>
    %16 = tpu.matmul %14, %15, %cst_5 {dimension_numbers = #tpu.dot_dimension_numbers<[1], [0], [0], [1], [0, 0, 1, 1], [], []>} : vector<8x8xbf16>, vector<8x1024xbf16>, vector<8x1024xf32> -> vector<8x1024xf32>
    %17 = arith.addf %9, %16 : vector<8x1024xf32>
    %c31_i32 = arith.constant 31 : i32
    %18 = tpu.dynamic_rotate %1 by %c31_i32 dim 1 : vector<8x1024xf32>, i32 -> vector<8x1024xf32>
    %19 = vector.extract_strided_slice %0 {offsets = [2, 0], sizes = [1, 1024], strides = [1, 1]} : vector<9x1024xf32> to vector<1x1024xf32>
    %20 = vector.broadcast %19 : vector<1x1024xf32> to vector<8x1024xf32>
    %21 = arith.mulf %18, %20 : vector<8x1024xf32>
    %22 = vector.extract_strided_slice %2 {offsets = [0, 16], sizes = [8, 8], strides = [1, 1]} : vector<8x72xbf16> to vector<8x8xbf16>
    %23 = arith.truncf %21 : vector<8x1024xf32> to vector<8x1024xbf16>
    %cst_6 = arith.constant dense<0.000000e+00> : vector<8x1024xf32>
    %24 = tpu.matmul %22, %23, %cst_6 {dimension_numbers = #tpu.dot_dimension_numbers<[1], [0], [0], [1], [0, 0, 1, 1], [], []>} : vector<8x8xbf16>, vector<8x1024xbf16>, vector<8x1024xf32> -> vector<8x1024xf32>
    %25 = arith.addf %17, %24 : vector<8x1024xf32>
    %c1_i32 = arith.constant 1 : i32
    %26 = tpu.dynamic_rotate %1 by %c1_i32 dim 1 : vector<8x1024xf32>, i32 -> vector<8x1024xf32>
    %27 = vector.extract_strided_slice %0 {offsets = [3, 0], sizes = [1, 1024], strides = [1, 1]} : vector<9x1024xf32> to vector<1x1024xf32>
    %28 = vector.broadcast %27 : vector<1x1024xf32> to vector<8x1024xf32>
    %29 = arith.mulf %26, %28 : vector<8x1024xf32>
    %30 = vector.extract_strided_slice %2 {offsets = [0, 24], sizes = [8, 8], strides = [1, 1]} : vector<8x72xbf16> to vector<8x8xbf16>
    %31 = arith.truncf %29 : vector<8x1024xf32> to vector<8x1024xbf16>
    %cst_7 = arith.constant dense<0.000000e+00> : vector<8x1024xf32>
    %32 = tpu.matmul %30, %31, %cst_7 {dimension_numbers = #tpu.dot_dimension_numbers<[1], [0], [0], [1], [0, 0, 1, 1], [], []>} : vector<8x8xbf16>, vector<8x1024xbf16>, vector<8x1024xf32> -> vector<8x1024xf32>
    %33 = arith.addf %25, %32 : vector<8x1024xf32>
    %34 = vector.extract_strided_slice %2 {offsets = [0, 32], sizes = [8, 8], strides = [1, 1]} : vector<8x72xbf16> to vector<8x8xbf16>
    %35 = arith.truncf %1 : vector<8x1024xf32> to vector<8x1024xbf16>
    %cst_8 = arith.constant dense<0.000000e+00> : vector<8x1024xf32>
    %36 = tpu.matmul %34, %35, %cst_8 {dimension_numbers = #tpu.dot_dimension_numbers<[1], [0], [0], [1], [0, 0, 1, 1], [], []>} : vector<8x8xbf16>, vector<8x1024xbf16>, vector<8x1024xf32> -> vector<8x1024xf32>
    %37 = arith.addf %33, %36 : vector<8x1024xf32>
    %c1023_i32 = arith.constant 1023 : i32
    %38 = tpu.dynamic_rotate %1 by %c1023_i32 dim 1 : vector<8x1024xf32>, i32 -> vector<8x1024xf32>
    %39 = vector.extract_strided_slice %0 {offsets = [5, 0], sizes = [1, 1024], strides = [1, 1]} : vector<9x1024xf32> to vector<1x1024xf32>
    %40 = vector.broadcast %39 : vector<1x1024xf32> to vector<8x1024xf32>
    %41 = arith.mulf %38, %40 : vector<8x1024xf32>
    %42 = vector.extract_strided_slice %2 {offsets = [0, 40], sizes = [8, 8], strides = [1, 1]} : vector<8x72xbf16> to vector<8x8xbf16>
    %43 = arith.truncf %41 : vector<8x1024xf32> to vector<8x1024xbf16>
    %cst_9 = arith.constant dense<0.000000e+00> : vector<8x1024xf32>
    %44 = tpu.matmul %42, %43, %cst_9 {dimension_numbers = #tpu.dot_dimension_numbers<[1], [0], [0], [1], [0, 0, 1, 1], [], []>} : vector<8x8xbf16>, vector<8x1024xbf16>, vector<8x1024xf32> -> vector<8x1024xf32>
    %45 = arith.addf %37, %44 : vector<8x1024xf32>
    %c993_i32 = arith.constant 993 : i32
    %46 = tpu.dynamic_rotate %1 by %c993_i32 dim 1 : vector<8x1024xf32>, i32 -> vector<8x1024xf32>
    %47 = vector.extract_strided_slice %0 {offsets = [6, 0], sizes = [1, 1024], strides = [1, 1]} : vector<9x1024xf32> to vector<1x1024xf32>
    %48 = vector.broadcast %47 : vector<1x1024xf32> to vector<8x1024xf32>
    %49 = arith.mulf %46, %48 : vector<8x1024xf32>
    %50 = vector.extract_strided_slice %2 {offsets = [0, 48], sizes = [8, 8], strides = [1, 1]} : vector<8x72xbf16> to vector<8x8xbf16>
    %51 = arith.truncf %49 : vector<8x1024xf32> to vector<8x1024xbf16>
    %cst_10 = arith.constant dense<0.000000e+00> : vector<8x1024xf32>
    %52 = tpu.matmul %50, %51, %cst_10 {dimension_numbers = #tpu.dot_dimension_numbers<[1], [0], [0], [1], [0, 0, 1, 1], [], []>} : vector<8x8xbf16>, vector<8x1024xbf16>, vector<8x1024xf32> -> vector<8x1024xf32>
    %53 = arith.addf %45, %52 : vector<8x1024xf32>
    %c992_i32 = arith.constant 992 : i32
    %54 = tpu.dynamic_rotate %1 by %c992_i32 dim 1 : vector<8x1024xf32>, i32 -> vector<8x1024xf32>
    %55 = vector.extract_strided_slice %0 {offsets = [7, 0], sizes = [1, 1024], strides = [1, 1]} : vector<9x1024xf32> to vector<1x1024xf32>
    %56 = vector.broadcast %55 : vector<1x1024xf32> to vector<8x1024xf32>
    %57 = arith.mulf %54, %56 : vector<8x1024xf32>
    %58 = vector.extract_strided_slice %2 {offsets = [0, 56], sizes = [8, 8], strides = [1, 1]} : vector<8x72xbf16> to vector<8x8xbf16>
    %59 = arith.truncf %57 : vector<8x1024xf32> to vector<8x1024xbf16>
    %cst_11 = arith.constant dense<0.000000e+00> : vector<8x1024xf32>
    %60 = tpu.matmul %58, %59, %cst_11 {dimension_numbers = #tpu.dot_dimension_numbers<[1], [0], [0], [1], [0, 0, 1, 1], [], []>} : vector<8x8xbf16>, vector<8x1024xbf16>, vector<8x1024xf32> -> vector<8x1024xf32>
    %61 = arith.addf %53, %60 : vector<8x1024xf32>
    %c991_i32 = arith.constant 991 : i32
    %62 = tpu.dynamic_rotate %1 by %c991_i32 dim 1 : vector<8x1024xf32>, i32 -> vector<8x1024xf32>
    %63 = vector.extract_strided_slice %0 {offsets = [8, 0], sizes = [1, 1024], strides = [1, 1]} : vector<9x1024xf32> to vector<1x1024xf32>
    %64 = vector.broadcast %63 : vector<1x1024xf32> to vector<8x1024xf32>
    %65 = arith.mulf %62, %64 : vector<8x1024xf32>
    %66 = vector.extract_strided_slice %2 {offsets = [0, 64], sizes = [8, 8], strides = [1, 1]} : vector<8x72xbf16> to vector<8x8xbf16>
    %67 = arith.truncf %65 : vector<8x1024xf32> to vector<8x1024xbf16>
    %cst_12 = arith.constant dense<0.000000e+00> : vector<8x1024xf32>
    %68 = tpu.matmul %66, %67, %cst_12 {dimension_numbers = #tpu.dot_dimension_numbers<[1], [0], [0], [1], [0, 0, 1, 1], [], []>} : vector<8x8xbf16>, vector<8x1024xbf16>, vector<8x1024xf32> -> vector<8x1024xf32>
    %69 = arith.addf %61, %68 : vector<8x1024xf32>
    %c0_13 = arith.constant 0 : index
    %c0_14 = arith.constant 0 : index
    %70 = vector.load %arg4[%c0_13, %c0_14] : memref<8x1xf32, #tpu.memory_space<vmem>>, vector<8x1xf32>
    %71 = vector.broadcast %70 : vector<8x1xf32> to vector<8x1024xf32>
    %72 = arith.addf %69, %71 : vector<8x1024xf32>
    %c0_15 = arith.constant 0 : index
    %c0_16 = arith.constant 0 : index
    %73 = vector.load %arg5[%c0_15, %c0_16] : memref<8x1xf32, #tpu.memory_space<vmem>>, vector<8x1xf32>
    %74 = vector.broadcast %73 : vector<8x1xf32> to vector<8x1024xf32>
    %75 = arith.mulf %72, %74 : vector<8x1024xf32>
    %c0_17 = arith.constant 0 : index
    %c0_18 = arith.constant 0 : index
    %76 = vector.load %arg6[%c0_17, %c0_18] : memref<8x1xf32, #tpu.memory_space<vmem>>, vector<8x1xf32>
    %77 = vector.broadcast %76 : vector<8x1xf32> to vector<8x1024xf32>
    %78 = arith.addf %75, %77 : vector<8x1024xf32>
    %cst_19 = arith.constant 0.000000e+00 : f32
    %79 = vector.broadcast %cst_19 : f32 to vector<8x1024xf32>
    %80 = arith.maximumf %78, %79 : vector<8x1024xf32>
    %c0_20 = arith.constant 0 : index
    %c0_21 = arith.constant 0 : index
    %c0_22 = arith.constant 0 : index
    %81 = vector.load %arg7[%c0_20, %c0_21, %c0_22] : memref<2x8x1xf32, #tpu.memory_space<vmem>>, vector<1x8x1xf32>
    %82 = vector.shape_cast %81 : vector<1x8x1xf32> to vector<8x1xf32>
    %83 = vector.broadcast %82 : vector<8x1xf32> to vector<8x1024xf32>
    %84 = arith.mulf %80, %83 : vector<8x1024xf32>
    %c0_23 = arith.constant 0 : index
    %c0_24 = arith.constant 0 : index
    %c0_25 = arith.constant 0 : index
    %85 = vector.load %arg8[%c0_23, %c0_24, %c0_25] : memref<2x8x1xf32, #tpu.memory_space<vmem>>, vector<1x8x1xf32>
    %86 = vector.shape_cast %85 : vector<1x8x1xf32> to vector<8x1xf32>
    %87 = vector.broadcast %86 : vector<8x1xf32> to vector<8x1024xf32>
    %88 = arith.addf %84, %87 : vector<8x1024xf32>
    %c0_26 = arith.constant 0 : index
    %c0_27 = arith.constant 0 : index
    %c0_28 = arith.constant 0 : index
    %89 = vector.load %arg9[%c0_26, %c0_27, %c0_28] : memref<2x16x72xbf16, #tpu.memory_space<vmem>>, vector<1x16x72xbf16>
    %90 = vector.shape_cast %89 : vector<1x16x72xbf16> to vector<16x72xbf16>
    %c33_i32_29 = arith.constant 33 : i32
    %91 = tpu.dynamic_rotate %88 by %c33_i32_29 dim 1 : vector<8x1024xf32>, i32 -> vector<8x1024xf32>
    %92 = vector.extract_strided_slice %0 {offsets = [0, 0], sizes = [1, 1024], strides = [1, 1]} : vector<9x1024xf32> to vector<1x1024xf32>
    %93 = vector.broadcast %92 : vector<1x1024xf32> to vector<8x1024xf32>
    %94 = arith.mulf %91, %93 : vector<8x1024xf32>
    %95 = vector.extract_strided_slice %90 {offsets = [0, 0], sizes = [16, 8], strides = [1, 1]} : vector<16x72xbf16> to vector<16x8xbf16>
    %96 = arith.truncf %94 : vector<8x1024xf32> to vector<8x1024xbf16>
    %cst_30 = arith.constant dense<0.000000e+00> : vector<16x1024xf32>
    %97 = tpu.matmul %95, %96, %cst_30 {dimension_numbers = #tpu.dot_dimension_numbers<[1], [0], [0], [1], [0, 0, 1, 1], [], []>} : vector<16x8xbf16>, vector<8x1024xbf16>, vector<16x1024xf32> -> vector<16x1024xf32>
    %c32_i32_31 = arith.constant 32 : i32
    %98 = tpu.dynamic_rotate %88 by %c32_i32_31 dim 1 : vector<8x1024xf32>, i32 -> vector<8x1024xf32>
    %99 = vector.extract_strided_slice %0 {offsets = [1, 0], sizes = [1, 1024], strides = [1, 1]} : vector<9x1024xf32> to vector<1x1024xf32>
    %100 = vector.broadcast %99 : vector<1x1024xf32> to vector<8x1024xf32>
    %101 = arith.mulf %98, %100 : vector<8x1024xf32>
    %102 = vector.extract_strided_slice %90 {offsets = [0, 8], sizes = [16, 8], strides = [1, 1]} : vector<16x72xbf16> to vector<16x8xbf16>
    %103 = arith.truncf %101 : vector<8x1024xf32> to vector<8x1024xbf16>
    %cst_32 = arith.constant dense<0.000000e+00> : vector<16x1024xf32>
    %104 = tpu.matmul %102, %103, %cst_32 {dimension_numbers = #tpu.dot_dimension_numbers<[1], [0], [0], [1], [0, 0, 1, 1], [], []>} : vector<16x8xbf16>, vector<8x1024xbf16>, vector<16x1024xf32> -> vector<16x1024xf32>
    %105 = arith.addf %97, %104 : vector<16x1024xf32>
    %c31_i32_33 = arith.constant 31 : i32
    %106 = tpu.dynamic_rotate %88 by %c31_i32_33 dim 1 : vector<8x1024xf32>, i32 -> vector<8x1024xf32>
    %107 = vector.extract_strided_slice %0 {offsets = [2, 0], sizes = [1, 1024], strides = [1, 1]} : vector<9x1024xf32> to vector<1x1024xf32>
    %108 = vector.broadcast %107 : vector<1x1024xf32> to vector<8x1024xf32>
    %109 = arith.mulf %106, %108 : vector<8x1024xf32>
    %110 = vector.extract_strided_slice %90 {offsets = [0, 16], sizes = [16, 8], strides = [1, 1]} : vector<16x72xbf16> to vector<16x8xbf16>
    %111 = arith.truncf %109 : vector<8x1024xf32> to vector<8x1024xbf16>
    %cst_34 = arith.constant dense<0.000000e+00> : vector<16x1024xf32>
    %112 = tpu.matmul %110, %111, %cst_34 {dimension_numbers = #tpu.dot_dimension_numbers<[1], [0], [0], [1], [0, 0, 1, 1], [], []>} : vector<16x8xbf16>, vector<8x1024xbf16>, vector<16x1024xf32> -> vector<16x1024xf32>
    %113 = arith.addf %105, %112 : vector<16x1024xf32>
    %c1_i32_35 = arith.constant 1 : i32
    %114 = tpu.dynamic_rotate %88 by %c1_i32_35 dim 1 : vector<8x1024xf32>, i32 -> vector<8x1024xf32>
    %115 = vector.extract_strided_slice %0 {offsets = [3, 0], sizes = [1, 1024], strides = [1, 1]} : vector<9x1024xf32> to vector<1x1024xf32>
    %116 = vector.broadcast %115 : vector<1x1024xf32> to vector<8x1024xf32>
    %117 = arith.mulf %114, %116 : vector<8x1024xf32>
    %118 = vector.extract_strided_slice %90 {offsets = [0, 24], sizes = [16, 8], strides = [1, 1]} : vector<16x72xbf16> to vector<16x8xbf16>
    %119 = arith.truncf %117 : vector<8x1024xf32> to vector<8x1024xbf16>
    %cst_36 = arith.constant dense<0.000000e+00> : vector<16x1024xf32>
    %120 = tpu.matmul %118, %119, %cst_36 {dimension_numbers = #tpu.dot_dimension_numbers<[1], [0], [0], [1], [0, 0, 1, 1], [], []>} : vector<16x8xbf16>, vector<8x1024xbf16>, vector<16x1024xf32> -> vector<16x1024xf32>
    %121 = arith.addf %113, %120 : vector<16x1024xf32>
    %122 = vector.extract_strided_slice %90 {offsets = [0, 32], sizes = [16, 8], strides = [1, 1]} : vector<16x72xbf16> to vector<16x8xbf16>
    %123 = arith.truncf %88 : vector<8x1024xf32> to vector<8x1024xbf16>
    %cst_37 = arith.constant dense<0.000000e+00> : vector<16x1024xf32>
    %124 = tpu.matmul %122, %123, %cst_37 {dimension_numbers = #tpu.dot_dimension_numbers<[1], [0], [0], [1], [0, 0, 1, 1], [], []>} : vector<16x8xbf16>, vector<8x1024xbf16>, vector<16x1024xf32> -> vector<16x1024xf32>
    %125 = arith.addf %121, %124 : vector<16x1024xf32>
    %c1023_i32_38 = arith.constant 1023 : i32
    %126 = tpu.dynamic_rotate %88 by %c1023_i32_38 dim 1 : vector<8x1024xf32>, i32 -> vector<8x1024xf32>
    %127 = vector.extract_strided_slice %0 {offsets = [5, 0], sizes = [1, 1024], strides = [1, 1]} : vector<9x1024xf32> to vector<1x1024xf32>
    %128 = vector.broadcast %127 : vector<1x1024xf32> to vector<8x1024xf32>
    %129 = arith.mulf %126, %128 : vector<8x1024xf32>
    %130 = vector.extract_strided_slice %90 {offsets = [0, 40], sizes = [16, 8], strides = [1, 1]} : vector<16x72xbf16> to vector<16x8xbf16>
    %131 = arith.truncf %129 : vector<8x1024xf32> to vector<8x1024xbf16>
    %cst_39 = arith.constant dense<0.000000e+00> : vector<16x1024xf32>
    %132 = tpu.matmul %130, %131, %cst_39 {dimension_numbers = #tpu.dot_dimension_numbers<[1], [0], [0], [1], [0, 0, 1, 1], [], []>} : vector<16x8xbf16>, vector<8x1024xbf16>, vector<16x1024xf32> -> vector<16x1024xf32>
    %133 = arith.addf %125, %132 : vector<16x1024xf32>
    %c993_i32_40 = arith.constant 993 : i32
    %134 = tpu.dynamic_rotate %88 by %c993_i32_40 dim 1 : vector<8x1024xf32>, i32 -> vector<8x1024xf32>
    %135 = vector.extract_strided_slice %0 {offsets = [6, 0], sizes = [1, 1024], strides = [1, 1]} : vector<9x1024xf32> to vector<1x1024xf32>
    %136 = vector.broadcast %135 : vector<1x1024xf32> to vector<8x1024xf32>
    %137 = arith.mulf %134, %136 : vector<8x1024xf32>
    %138 = vector.extract_strided_slice %90 {offsets = [0, 48], sizes = [16, 8], strides = [1, 1]} : vector<16x72xbf16> to vector<16x8xbf16>
    %139 = arith.truncf %137 : vector<8x1024xf32> to vector<8x1024xbf16>
    %cst_41 = arith.constant dense<0.000000e+00> : vector<16x1024xf32>
    %140 = tpu.matmul %138, %139, %cst_41 {dimension_numbers = #tpu.dot_dimension_numbers<[1], [0], [0], [1], [0, 0, 1, 1], [], []>} : vector<16x8xbf16>, vector<8x1024xbf16>, vector<16x1024xf32> -> vector<16x1024xf32>
    %141 = arith.addf %133, %140 : vector<16x1024xf32>
    %c992_i32_42 = arith.constant 992 : i32
    %142 = tpu.dynamic_rotate %88 by %c992_i32_42 dim 1 : vector<8x1024xf32>, i32 -> vector<8x1024xf32>
    %143 = vector.extract_strided_slice %0 {offsets = [7, 0], sizes = [1, 1024], strides = [1, 1]} : vector<9x1024xf32> to vector<1x1024xf32>
    %144 = vector.broadcast %143 : vector<1x1024xf32> to vector<8x1024xf32>
    %145 = arith.mulf %142, %144 : vector<8x1024xf32>
    %146 = vector.extract_strided_slice %90 {offsets = [0, 56], sizes = [16, 8], strides = [1, 1]} : vector<16x72xbf16> to vector<16x8xbf16>
    %147 = arith.truncf %145 : vector<8x1024xf32> to vector<8x1024xbf16>
    %cst_43 = arith.constant dense<0.000000e+00> : vector<16x1024xf32>
    %148 = tpu.matmul %146, %147, %cst_43 {dimension_numbers = #tpu.dot_dimension_numbers<[1], [0], [0], [1], [0, 0, 1, 1], [], []>} : vector<16x8xbf16>, vector<8x1024xbf16>, vector<16x1024xf32> -> vector<16x1024xf32>
    %149 = arith.addf %141, %148 : vector<16x1024xf32>
    %c991_i32_44 = arith.constant 991 : i32
    %150 = tpu.dynamic_rotate %88 by %c991_i32_44 dim 1 : vector<8x1024xf32>, i32 -> vector<8x1024xf32>
    %151 = vector.extract_strided_slice %0 {offsets = [8, 0], sizes = [1, 1024], strides = [1, 1]} : vector<9x1024xf32> to vector<1x1024xf32>
    %152 = vector.broadcast %151 : vector<1x1024xf32> to vector<8x1024xf32>
    %153 = arith.mulf %150, %152 : vector<8x1024xf32>
    %154 = vector.extract_strided_slice %90 {offsets = [0, 64], sizes = [16, 8], strides = [1, 1]} : vector<16x72xbf16> to vector<16x8xbf16>
    %155 = arith.truncf %153 : vector<8x1024xf32> to vector<8x1024xbf16>
    %cst_45 = arith.constant dense<0.000000e+00> : vector<16x1024xf32>
    %156 = tpu.matmul %154, %155, %cst_45 {dimension_numbers = #tpu.dot_dimension_numbers<[1], [0], [0], [1], [0, 0, 1, 1], [], []>} : vector<16x8xbf16>, vector<8x1024xbf16>, vector<16x1024xf32> -> vector<16x1024xf32>
    %157 = arith.addf %149, %156 : vector<16x1024xf32>
    %cst_46 = arith.constant 0.000000e+00 : f32
    %158 = vector.broadcast %cst_46 : f32 to vector<16x1024xf32>
    %159 = arith.maximumf %157, %158 : vector<16x1024xf32>
    %c0_47 = arith.constant 0 : index
    %c0_48 = arith.constant 0 : index
    %c0_49 = arith.constant 0 : index
    %160 = vector.load %arg10[%c0_47, %c0_48, %c0_49] : memref<2x8x16xbf16, #tpu.memory_space<vmem>>, vector<1x8x16xbf16>
    %161 = vector.shape_cast %160 : vector<1x8x16xbf16> to vector<8x16xbf16>
    %162 = arith.truncf %159 : vector<16x1024xf32> to vector<16x1024xbf16>
    %cst_50 = arith.constant dense<0.000000e+00> : vector<8x1024xf32>
    %163 = tpu.matmul %161, %162, %cst_50 {dimension_numbers = #tpu.dot_dimension_numbers<[1], [0], [0], [1], [0, 0, 1, 1], [], []>} : vector<8x16xbf16>, vector<16x1024xbf16>, vector<8x1024xf32> -> vector<8x1024xf32>
    %c0_51 = arith.constant 0 : index
    %c0_52 = arith.constant 0 : index
    %c0_53 = arith.constant 0 : index
    %164 = vector.load %arg11[%c0_51, %c0_52, %c0_53] : memref<2x8x1xf32, #tpu.memory_space<vmem>>, vector<1x8x1xf32>
    %165 = vector.shape_cast %164 : vector<1x8x1xf32> to vector<8x1xf32>
    %166 = vector.broadcast %165 : vector<8x1xf32> to vector<8x1024xf32>
    %167 = arith.addf %163, %166 : vector<8x1024xf32>
    %168 = arith.addf %167, %80 : vector<8x1024xf32>
    %c1 = arith.constant 1 : index
    %c0_54 = arith.constant 0 : index
    %c0_55 = arith.constant 0 : index
    %169 = vector.load %arg7[%c1, %c0_54, %c0_55] : memref<2x8x1xf32, #tpu.memory_space<vmem>>, vector<1x8x1xf32>
    %170 = vector.shape_cast %169 : vector<1x8x1xf32> to vector<8x1xf32>
    %171 = vector.broadcast %170 : vector<8x1xf32> to vector<8x1024xf32>
    %172 = arith.mulf %168, %171 : vector<8x1024xf32>
    %c1_56 = arith.constant 1 : index
    %c0_57 = arith.constant 0 : index
    %c0_58 = arith.constant 0 : index
    %173 = vector.load %arg8[%c1_56, %c0_57, %c0_58] : memref<2x8x1xf32, #tpu.memory_space<vmem>>, vector<1x8x1xf32>
    %174 = vector.shape_cast %173 : vector<1x8x1xf32> to vector<8x1xf32>
    %175 = vector.broadcast %174 : vector<8x1xf32> to vector<8x1024xf32>
    %176 = arith.addf %172, %175 : vector<8x1024xf32>
    %c1_59 = arith.constant 1 : index
    %c0_60 = arith.constant 0 : index
    %c0_61 = arith.constant 0 : index
    %177 = vector.load %arg9[%c1_59, %c0_60, %c0_61] : memref<2x16x72xbf16, #tpu.memory_space<vmem>>, vector<1x16x72xbf16>
    %178 = vector.shape_cast %177 : vector<1x16x72xbf16> to vector<16x72xbf16>
    %c33_i32_62 = arith.constant 33 : i32
    %179 = tpu.dynamic_rotate %176 by %c33_i32_62 dim 1 : vector<8x1024xf32>, i32 -> vector<8x1024xf32>
    %180 = vector.extract_strided_slice %0 {offsets = [0, 0], sizes = [1, 1024], strides = [1, 1]} : vector<9x1024xf32> to vector<1x1024xf32>
    %181 = vector.broadcast %180 : vector<1x1024xf32> to vector<8x1024xf32>
    %182 = arith.mulf %179, %181 : vector<8x1024xf32>
    %183 = vector.extract_strided_slice %178 {offsets = [0, 0], sizes = [16, 8], strides = [1, 1]} : vector<16x72xbf16> to vector<16x8xbf16>
    %184 = arith.truncf %182 : vector<8x1024xf32> to vector<8x1024xbf16>
    %cst_63 = arith.constant dense<0.000000e+00> : vector<16x1024xf32>
    %185 = tpu.matmul %183, %184, %cst_63 {dimension_numbers = #tpu.dot_dimension_numbers<[1], [0], [0], [1], [0, 0, 1, 1], [], []>} : vector<16x8xbf16>, vector<8x1024xbf16>, vector<16x1024xf32> -> vector<16x1024xf32>
    %c32_i32_64 = arith.constant 32 : i32
    %186 = tpu.dynamic_rotate %176 by %c32_i32_64 dim 1 : vector<8x1024xf32>, i32 -> vector<8x1024xf32>
    %187 = vector.extract_strided_slice %0 {offsets = [1, 0], sizes = [1, 1024], strides = [1, 1]} : vector<9x1024xf32> to vector<1x1024xf32>
    %188 = vector.broadcast %187 : vector<1x1024xf32> to vector<8x1024xf32>
    %189 = arith.mulf %186, %188 : vector<8x1024xf32>
    %190 = vector.extract_strided_slice %178 {offsets = [0, 8], sizes = [16, 8], strides = [1, 1]} : vector<16x72xbf16> to vector<16x8xbf16>
    %191 = arith.truncf %189 : vector<8x1024xf32> to vector<8x1024xbf16>
    %cst_65 = arith.constant dense<0.000000e+00> : vector<16x1024xf32>
    %192 = tpu.matmul %190, %191, %cst_65 {dimension_numbers = #tpu.dot_dimension_numbers<[1], [0], [0], [1], [0, 0, 1, 1], [], []>} : vector<16x8xbf16>, vector<8x1024xbf16>, vector<16x1024xf32> -> vector<16x1024xf32>
    %193 = arith.addf %185, %192 : vector<16x1024xf32>
    %c31_i32_66 = arith.constant 31 : i32
    %194 = tpu.dynamic_rotate %176 by %c31_i32_66 dim 1 : vector<8x1024xf32>, i32 -> vector<8x1024xf32>
    %195 = vector.extract_strided_slice %0 {offsets = [2, 0], sizes = [1, 1024], strides = [1, 1]} : vector<9x1024xf32> to vector<1x1024xf32>
    %196 = vector.broadcast %195 : vector<1x1024xf32> to vector<8x1024xf32>
    %197 = arith.mulf %194, %196 : vector<8x1024xf32>
    %198 = vector.extract_strided_slice %178 {offsets = [0, 16], sizes = [16, 8], strides = [1, 1]} : vector<16x72xbf16> to vector<16x8xbf16>
    %199 = arith.truncf %197 : vector<8x1024xf32> to vector<8x1024xbf16>
    %cst_67 = arith.constant dense<0.000000e+00> : vector<16x1024xf32>
    %200 = tpu.matmul %198, %199, %cst_67 {dimension_numbers = #tpu.dot_dimension_numbers<[1], [0], [0], [1], [0, 0, 1, 1], [], []>} : vector<16x8xbf16>, vector<8x1024xbf16>, vector<16x1024xf32> -> vector<16x1024xf32>
    %201 = arith.addf %193, %200 : vector<16x1024xf32>
    %c1_i32_68 = arith.constant 1 : i32
    %202 = tpu.dynamic_rotate %176 by %c1_i32_68 dim 1 : vector<8x1024xf32>, i32 -> vector<8x1024xf32>
    %203 = vector.extract_strided_slice %0 {offsets = [3, 0], sizes = [1, 1024], strides = [1, 1]} : vector<9x1024xf32> to vector<1x1024xf32>
    %204 = vector.broadcast %203 : vector<1x1024xf32> to vector<8x1024xf32>
    %205 = arith.mulf %202, %204 : vector<8x1024xf32>
    %206 = vector.extract_strided_slice %178 {offsets = [0, 24], sizes = [16, 8], strides = [1, 1]} : vector<16x72xbf16> to vector<16x8xbf16>
    %207 = arith.truncf %205 : vector<8x1024xf32> to vector<8x1024xbf16>
    %cst_69 = arith.constant dense<0.000000e+00> : vector<16x1024xf32>
    %208 = tpu.matmul %206, %207, %cst_69 {dimension_numbers = #tpu.dot_dimension_numbers<[1], [0], [0], [1], [0, 0, 1, 1], [], []>} : vector<16x8xbf16>, vector<8x1024xbf16>, vector<16x1024xf32> -> vector<16x1024xf32>
    %209 = arith.addf %201, %208 : vector<16x1024xf32>
    %210 = vector.extract_strided_slice %178 {offsets = [0, 32], sizes = [16, 8], strides = [1, 1]} : vector<16x72xbf16> to vector<16x8xbf16>
    %211 = arith.truncf %176 : vector<8x1024xf32> to vector<8x1024xbf16>
    %cst_70 = arith.constant dense<0.000000e+00> : vector<16x1024xf32>
    %212 = tpu.matmul %210, %211, %cst_70 {dimension_numbers = #tpu.dot_dimension_numbers<[1], [0], [0], [1], [0, 0, 1, 1], [], []>} : vector<16x8xbf16>, vector<8x1024xbf16>, vector<16x1024xf32> -> vector<16x1024xf32>
    %213 = arith.addf %209, %212 : vector<16x1024xf32>
    %c1023_i32_71 = arith.constant 1023 : i32
    %214 = tpu.dynamic_rotate %176 by %c1023_i32_71 dim 1 : vector<8x1024xf32>, i32 -> vector<8x1024xf32>
    %215 = vector.extract_strided_slice %0 {offsets = [5, 0], sizes = [1, 1024], strides = [1, 1]} : vector<9x1024xf32> to vector<1x1024xf32>
    %216 = vector.broadcast %215 : vector<1x1024xf32> to vector<8x1024xf32>
    %217 = arith.mulf %214, %216 : vector<8x1024xf32>
    %218 = vector.extract_strided_slice %178 {offsets = [0, 40], sizes = [16, 8], strides = [1, 1]} : vector<16x72xbf16> to vector<16x8xbf16>
    %219 = arith.truncf %217 : vector<8x1024xf32> to vector<8x1024xbf16>
    %cst_72 = arith.constant dense<0.000000e+00> : vector<16x1024xf32>
    %220 = tpu.matmul %218, %219, %cst_72 {dimension_numbers = #tpu.dot_dimension_numbers<[1], [0], [0], [1], [0, 0, 1, 1], [], []>} : vector<16x8xbf16>, vector<8x1024xbf16>, vector<16x1024xf32> -> vector<16x1024xf32>
    %221 = arith.addf %213, %220 : vector<16x1024xf32>
    %c993_i32_73 = arith.constant 993 : i32
    %222 = tpu.dynamic_rotate %176 by %c993_i32_73 dim 1 : vector<8x1024xf32>, i32 -> vector<8x1024xf32>
    %223 = vector.extract_strided_slice %0 {offsets = [6, 0], sizes = [1, 1024], strides = [1, 1]} : vector<9x1024xf32> to vector<1x1024xf32>
    %224 = vector.broadcast %223 : vector<1x1024xf32> to vector<8x1024xf32>
    %225 = arith.mulf %222, %224 : vector<8x1024xf32>
    %226 = vector.extract_strided_slice %178 {offsets = [0, 48], sizes = [16, 8], strides = [1, 1]} : vector<16x72xbf16> to vector<16x8xbf16>
    %227 = arith.truncf %225 : vector<8x1024xf32> to vector<8x1024xbf16>
    %cst_74 = arith.constant dense<0.000000e+00> : vector<16x1024xf32>
    %228 = tpu.matmul %226, %227, %cst_74 {dimension_numbers = #tpu.dot_dimension_numbers<[1], [0], [0], [1], [0, 0, 1, 1], [], []>} : vector<16x8xbf16>, vector<8x1024xbf16>, vector<16x1024xf32> -> vector<16x1024xf32>
    %229 = arith.addf %221, %228 : vector<16x1024xf32>
    %c992_i32_75 = arith.constant 992 : i32
    %230 = tpu.dynamic_rotate %176 by %c992_i32_75 dim 1 : vector<8x1024xf32>, i32 -> vector<8x1024xf32>
    %231 = vector.extract_strided_slice %0 {offsets = [7, 0], sizes = [1, 1024], strides = [1, 1]} : vector<9x1024xf32> to vector<1x1024xf32>
    %232 = vector.broadcast %231 : vector<1x1024xf32> to vector<8x1024xf32>
    %233 = arith.mulf %230, %232 : vector<8x1024xf32>
    %234 = vector.extract_strided_slice %178 {offsets = [0, 56], sizes = [16, 8], strides = [1, 1]} : vector<16x72xbf16> to vector<16x8xbf16>
    %235 = arith.truncf %233 : vector<8x1024xf32> to vector<8x1024xbf16>
    %cst_76 = arith.constant dense<0.000000e+00> : vector<16x1024xf32>
    %236 = tpu.matmul %234, %235, %cst_76 {dimension_numbers = #tpu.dot_dimension_numbers<[1], [0], [0], [1], [0, 0, 1, 1], [], []>} : vector<16x8xbf16>, vector<8x1024xbf16>, vector<16x1024xf32> -> vector<16x1024xf32>
    %237 = arith.addf %229, %236 : vector<16x1024xf32>
    %c991_i32_77 = arith.constant 991 : i32
    %238 = tpu.dynamic_rotate %176 by %c991_i32_77 dim 1 : vector<8x1024xf32>, i32 -> vector<8x1024xf32>
    %239 = vector.extract_strided_slice %0 {offsets = [8, 0], sizes = [1, 1024], strides = [1, 1]} : vector<9x1024xf32> to vector<1x1024xf32>
    %240 = vector.broadcast %239 : vector<1x1024xf32> to vector<8x1024xf32>
    %241 = arith.mulf %238, %240 : vector<8x1024xf32>
    %242 = vector.extract_strided_slice %178 {offsets = [0, 64], sizes = [16, 8], strides = [1, 1]} : vector<16x72xbf16> to vector<16x8xbf16>
    %243 = arith.truncf %241 : vector<8x1024xf32> to vector<8x1024xbf16>
    %cst_78 = arith.constant dense<0.000000e+00> : vector<16x1024xf32>
    %244 = tpu.matmul %242, %243, %cst_78 {dimension_numbers = #tpu.dot_dimension_numbers<[1], [0], [0], [1], [0, 0, 1, 1], [], []>} : vector<16x8xbf16>, vector<8x1024xbf16>, vector<16x1024xf32> -> vector<16x1024xf32>
    %245 = arith.addf %237, %244 : vector<16x1024xf32>
    %cst_79 = arith.constant 0.000000e+00 : f32
    %246 = vector.broadcast %cst_79 : f32 to vector<16x1024xf32>
    %247 = arith.maximumf %245, %246 : vector<16x1024xf32>
    %c1_80 = arith.constant 1 : index
    %c0_81 = arith.constant 0 : index
    %c0_82 = arith.constant 0 : index
    %248 = vector.load %arg10[%c1_80, %c0_81, %c0_82] : memref<2x8x16xbf16, #tpu.memory_space<vmem>>, vector<1x8x16xbf16>
    %249 = vector.shape_cast %248 : vector<1x8x16xbf16> to vector<8x16xbf16>
    %250 = arith.truncf %247 : vector<16x1024xf32> to vector<16x1024xbf16>
    %cst_83 = arith.constant dense<0.000000e+00> : vector<8x1024xf32>
    %251 = tpu.matmul %249, %250, %cst_83 {dimension_numbers = #tpu.dot_dimension_numbers<[1], [0], [0], [1], [0, 0, 1, 1], [], []>} : vector<8x16xbf16>, vector<16x1024xbf16>, vector<8x1024xf32> -> vector<8x1024xf32>
    %c1_84 = arith.constant 1 : index
    %c0_85 = arith.constant 0 : index
    %c0_86 = arith.constant 0 : index
    %252 = vector.load %arg11[%c1_84, %c0_85, %c0_86] : memref<2x8x1xf32, #tpu.memory_space<vmem>>, vector<1x8x1xf32>
    %253 = vector.shape_cast %252 : vector<1x8x1xf32> to vector<8x1xf32>
    %254 = vector.broadcast %253 : vector<8x1xf32> to vector<8x1024xf32>
    %255 = arith.addf %251, %254 : vector<8x1024xf32>
    %256 = arith.addf %255, %168 : vector<8x1024xf32>
    %c0_87 = arith.constant 0 : index
    %c0_88 = arith.constant 0 : index
    %257 = vector.load %arg12[%c0_87, %c0_88] : memref<8x1024xf32, #tpu.memory_space<vmem>>, vector<8x1024xf32>
    tpu.vector_store %arg12[%c0_87, %c0_88], %256 {strides = array<i32>} : memref<8x1024xf32, #tpu.memory_space<vmem>>, vector<8x1024xf32>,
    return
  }
  func.func @transform_0(%arg0: i32) -> (i32, i32) {
    %c0_i32 = arith.constant 0 : i32
    %c0_i32_0 = arith.constant 0 : i32
    return %c0_i32, %arg0 : i32, i32
  }
  func.func @transform_1(%arg0: i32) -> (i32, i32) {
    %c0_i32 = arith.constant 0 : i32
    %c0_i32_0 = arith.constant 0 : i32
    %c0_i32_1 = arith.constant 0 : i32
    return %c0_i32, %c0_i32_0 : i32, i32
  }
  func.func @transform_2(%arg0: i32) -> (i32, i32) {
    %c0_i32 = arith.constant 0 : i32
    %c0_i32_0 = arith.constant 0 : i32
    %c0_i32_1 = arith.constant 0 : i32
    return %c0_i32, %c0_i32_0 : i32, i32
  }
  func.func @transform_3(%arg0: i32) -> (i32, i32) {
    %c0_i32 = arith.constant 0 : i32
    %c0_i32_0 = arith.constant 0 : i32
    %c0_i32_1 = arith.constant 0 : i32
    return %c0_i32, %c0_i32_0 : i32, i32
  }
  func.func @transform_4(%arg0: i32) -> (i32, i32) {
    %c0_i32 = arith.constant 0 : i32
    %c0_i32_0 = arith.constant 0 : i32
    %c0_i32_1 = arith.constant 0 : i32
    return %c0_i32, %c0_i32_0 : i32, i32
  }
  func.func @transform_5(%arg0: i32) -> (i32, i32) {
    %c0_i32 = arith.constant 0 : i32
    %c0_i32_0 = arith.constant 0 : i32
    %c0_i32_1 = arith.constant 0 : i32
    return %c0_i32, %c0_i32_0 : i32, i32
  }
  func.func @transform_6(%arg0: i32) -> (i32, i32, i32) {
    %c0_i32 = arith.constant 0 : i32
    %c0_i32_0 = arith.constant 0 : i32
    %c0_i32_1 = arith.constant 0 : i32
    %c0_i32_2 = arith.constant 0 : i32
    return %c0_i32, %c0_i32_0, %c0_i32_1 : i32, i32, i32
  }
  func.func @transform_7(%arg0: i32) -> (i32, i32, i32) {
    %c0_i32 = arith.constant 0 : i32
    %c0_i32_0 = arith.constant 0 : i32
    %c0_i32_1 = arith.constant 0 : i32
    %c0_i32_2 = arith.constant 0 : i32
    return %c0_i32, %c0_i32_0, %c0_i32_1 : i32, i32, i32
  }
  func.func @transform_8(%arg0: i32) -> (i32, i32, i32) {
    %c0_i32 = arith.constant 0 : i32
    %c0_i32_0 = arith.constant 0 : i32
    %c0_i32_1 = arith.constant 0 : i32
    %c0_i32_2 = arith.constant 0 : i32
    return %c0_i32, %c0_i32_0, %c0_i32_1 : i32, i32, i32
  }
  func.func @transform_9(%arg0: i32) -> (i32, i32, i32) {
    %c0_i32 = arith.constant 0 : i32
    %c0_i32_0 = arith.constant 0 : i32
    %c0_i32_1 = arith.constant 0 : i32
    %c0_i32_2 = arith.constant 0 : i32
    return %c0_i32, %c0_i32_0, %c0_i32_1 : i32, i32, i32
  }
  func.func @transform_10(%arg0: i32) -> (i32, i32, i32) {
    %c0_i32 = arith.constant 0 : i32
    %c0_i32_0 = arith.constant 0 : i32
    %c0_i32_1 = arith.constant 0 : i32
    %c0_i32_2 = arith.constant 0 : i32
    return %c0_i32, %c0_i32_0, %c0_i32_1 : i32, i32, i32
  }
  func.func @transform_11(%arg0: i32) -> (i32, i32) {
    %c0_i32 = arith.constant 0 : i32
    %c0_i32_0 = arith.constant 0 : i32
    return %c0_i32, %arg0 : i32, i32
  }
}

</mosaic_0001>

<bundles_post_ra>
// kernel: lbcnn_forward.1
= control target key start
LH: loop header
LB: loop body
LE: loop exit
PB: predicated region body
PF: predicated region fallthrough
CT: control target
= control target key end

     0   :  { %s8539_s17 = smov 0   ;;  %s10682_s0 = inlined_call_operand.vmem [shape: f32[8,2048], index: 0, kind: input, shape index: {}]   ;;  %s10683_s1 = inlined_call_operand.vmem [shape: f32[9,1024], index: 1, kind: input, shape index: {}]   ;;  %s10684_s2 = inlined_call_operand.vmem [shape: bf16[8,72], index: 2, kind: input, shape index: {}]   ;;  %s10685_s3 = inlined_call_operand.vmem [shape: f32[8,1], index: 3, kind: input, shape index: {}]   ;;  %s10686_s4 = inlined_call_operand.vmem [shape: f32[8,1], index: 4, kind: input, shape index: {}]   ;;  %s10687_s5 = inlined_call_operand.vmem [shape: f32[8,1], index: 5, kind: input, shape index: {}]   ;;  %s10688_s6 = inlined_call_operand.vmem [shape: f32[2,8,1], index: 6, kind: input, shape index: {}]   ;;  %s10689_s7 = inlined_call_operand.vmem [shape: f32[2,8,1], index: 7, kind: input, shape index: {}]   ;;  %s10690_s8 = inlined_call_operand.vmem [shape: bf16[2,16,72], index: 8, kind: input, shape index: {}]   ;;  %s10691_s9 = inlined_call_operand.vmem [shape: bf16[2,8,16], index: 9, kind: input, shape index: {}]   ;;  %s10692_s10 = inlined_call_operand.vmem [shape: f32[2,8,1], index: 10, kind: input, shape index: {}]   ;;  %s10693_s11 = inlined_call_operand.vmem [shape: f32[8,2048], index: 11, kind: output, shape index: {}]  }
   0x1 LB: > { %s7902_s18 = sadd.s32 4294967295, %s8461_s17   ;;  %p7906_p0 = scmp.ge.s32.totalorder %s8461_s17, 1  ;;  %s8461_s17 = sphi %s8539_s17, %s21_s17  }
   0x2   : > { %p338_p1 = scmp.lt.s32.totalorder %s8461_s17, 3 }
   0x4   : > { %p339_p2 = pnand %p7906_p0, %p338_p1 }
   0x6   : > { %342 = sbr.rel (%p339_p2) target bundleno = 1928 (0x788), region = 64 }
   0xd   : > { %s7907_s19 = sshll.u32 %s7902_s18, 3  ;;  %s8463_s24 = smov 32   ;;  %v10697_v4 = vmov 0   ;;  %v8590_v9 = vld [vmem:[%s10684_s2] sm:$0xf]  ;;  %v432_v11 = vlaneseq  ;;  %v8708_v15 = vld [vmem:[%s10683_s1 + $0x18] sm:$0xff] }
   0xe   : > { %p379_p3 = scmp.lt.s32.totalorder %s7907_s19, 15  ;;  %671 = vmatprep.mubr.bf16.mxu1 %v10697_v4  ;;  %630 = vmatprep.mubr.bf16.mxu0 %v10697_v4  ;;  %v8598_v10 = vcombine.low %v8590_v9, %v8590_v9  ;;  %s8465_s27 = smov 33   ;;  %v8713_v16 = vld [vmem:[%s10683_s1 + $0x8] sm:$0xff]  ;;  %v8718_v17 = vld [vmem:[%s10683_s1 + $0x10] sm:$0xff]  ;;  %v8737_v23 = vld [vmem:[%s10683_s1] sm:$0xff]  ;;  %vm573_vm1 = vcmask 1043456  }
   0xf   : > { %8435 = vset.pattern.permute.xlu1 %v10697_v4  ;;  %8434 = vset.pattern.permute.xlu0 %v10697_v4  ;;  %s8466_s28 = smov 120   ;;  %s8467_s29 = smov 31   ;;  %v8696_v12 = vshrl.u32 %v432_v11, 7  ;;  %v8702_v13 = vand.u32 127, %v432_v11  ;;  %v8742_v26 = vld [vmem:[%s10683_s1 + $0x20] sm:$0xff]  ;;  %v8763_v34 = vld [vmem:[%s10683_s1 + $0x38] sm:$0xff] }
  0x10   : > { %s10904_s19 = smov (!%p379_p3, %s7907_s19), 15  ;;  %s8468_s30 = smov 112   ;;  %v8771_v36 = vld [vmem:[%s10683_s1 + $0x28] sm:$0xff]  ;;  %v8776_v37 = vld [vmem:[%s10683_s1 + $0x30] sm:$0xff]  ;;  %vm569_vm2 = vcmask 64512   ;;  %vm5169_vm10 = vcmask 130048  }
  0x11   : > { %s10694_s20 = sshll.u32 %s10904_s19, 3  ;;  %s8469_s12 = smov 1   ;;  %v518_v14 = vsub.s32 1, %v8696_v12  ;;  %vm507_vm0 = vcmp.lt.s32.totalorder %v8702_v13, 32  ;;  %v8807_v57 = vsub.s32 0, %v8696_v12  ;;  %vm434_vm3 = vcmp.lt.s32.totalorder %v8702_v13, 33 }
  0x12   : > { %s382_s23 = scalar_lea.vmem %s10682_s0, %s10694_s20  ;;  %s10774_s13 = smov 96   ;;  %vm969_vm4 = vcmp.lt.s32.totalorder %v8702_v13, 31  ;;  %vm1243_vm5 = vcmp.lt.s32.totalorder %v8702_v13, 1  ;;  %vm1726_vm6 = vcmp.lt.s32.totalorder %v8702_v13, 127  ;;  %vm2000_vm7 = vcmp.lt.s32.totalorder %v8702_v13, 97 }
  0x13   : > { %v8555_v0 = vld [vmem:[%s382_s23 + $0x10] sm:$0xff]  ;;  %v8557_v1 = vld [vmem:[%s382_s23] sm:$0xff]  ;;  %v8563_v2 = vld [vmem:[%s382_s23 + $0x18] sm:$0xff]  ;;  %s8471_s14 = smov 104   ;;  %s10776_s15 = smov 127   ;;  %v8726_v20 = vrot.slane %v8708_v15, %v518_v14  ;;  %v8729_v21 = vrot.slane %v8713_v16, %v518_v14  ;;  %v8732_v22 = vrot.slane %v8718_v17, %v518_v14  ;;  %v8751_v30 = vrot.slane %v8737_v23, %v518_v14 }
  0x14   : > { %495 = vrot.lane.b32.xlu1 %v8555_v0, %s8463_s24  ;;  %491 = vrot.lane.b32.xlu0 %v8557_v1, %s8463_s24  ;;  %v8565_v3 = vld [vmem:[%s382_s23 + $0x8] sm:$0xff]  ;;  %v8573_v5 = vld [vmem:[%s382_s23 + $0x20] sm:$0xff]  ;;  %s10735_s16 = smov 97   ;;  %s10737_s18 = smov 88   ;;  %v8766_v35 = vrot.slane %v8742_v26, %v518_v14  ;;  %v8783_v45 = vrot.slane %v8763_v34, %v518_v14  ;;  %v8790_v47 = vrot.slane %v8771_v36, %v518_v14  ;;  %vm2274_vm8 = vcmp.lt.s32.totalorder %v8702_v13, 96 }
  0x15   : > { %v8575_v6 = vld [vmem:[%s382_s23 + $0x38] sm:$0xff]  ;;  %v8583_v7 = vld [vmem:[%s382_s23 + $0x30] sm:$0xff]  ;;  %v8585_v8 = vld [vmem:[%s382_s23 + $0x28] sm:$0xff]  ;;  %s10695_s21 = smov 80   ;;  %10786 = vst [vmem:[#allocation2_spill] sm:$0xff] %v8726_v20  ;;  %s10733_s25 = smov 72   ;;  %v8793_v48 = vrot.slane %v8776_v37, %v518_v14 }
  0x16   : > { %10787 = vst [vmem:[#allocation3_spill] sm:$0xff] %v8729_v21  ;;  %10788 = vst [vmem:[#allocation4_spill] sm:$0xff] %v8732_v22  ;;  %s10731_s26 = smov 95   ;;  %s10721_s20 = smov 64   ;;  %vm2548_vm9 = vcmp.lt.s32.totalorder %v8702_v13, 95 }
  0x17   : > { %10789 = vst [vmem:[#allocation5_spill] sm:$0xff] %v8793_v48  ;;  %s10821_s23 = smov 97   ;;  %s10823_s22 = smov 72  }
  0x18   : > { %497 = vrot.lane.b32.xlu1 %v8563_v2, %s8463_s24  ;;  %493 = vrot.lane.b32.xlu0 %v8565_v3, %s8463_s24 }
  0x1c   : > { %499 = vrot.lane.b32.xlu1 %v8573_v5, %s8463_s24  ;;  %505 = vrot.lane.b32.xlu0 %v8575_v6, %s8463_s24 }
  0x20   : > { %503 = vrot.lane.b32.xlu1 %v8583_v7, %s8463_s24  ;;  %501 = vrot.lane.b32.xlu0 %v8585_v8, %s8463_s24 }
  0x24   : > { %416 = vrot.lane.b32.xlu1 %v8557_v1, %s8465_s27  ;;  %567 = vrot.lane.b32.xlu0 %v8598_v10, %s8466_s28 }
  0x28   : > { %420 = vrot.lane.b32.xlu1 %v8555_v0, %s8465_s27  ;;  %418 = vrot.lane.b32.xlu0 %v8565_v3, %s8465_s27 }
  0x2c   : > { %430 = vrot.lane.b32.xlu1 %v8575_v6, %s8465_s27  ;;  %422 = vrot.lane.b32.xlu0 %v8563_v2, %s8465_s27 }
  0x30   : > { %426 = vrot.lane.b32.xlu1 %v8585_v8, %s8465_s27  ;;  %424 = vrot.lane.b32.xlu0 %v8573_v5, %s8465_s27 }
  0x34   : > { %953 = vrot.lane.b32.xlu1 %v8557_v1, %s8467_s29  ;;  %428 = vrot.lane.b32.xlu0 %v8583_v7, %s8465_s27 }
  0x38   : > { %957 = vrot.lane.b32.xlu1 %v8555_v0, %s8467_s29  ;;  %955 = vrot.lane.b32.xlu0 %v8565_v3, %s8467_s29 }
  0x3c   : > { %967 = vrot.lane.b32.xlu1 %v8575_v6, %s8467_s29  ;;  %959 = vrot.lane.b32.xlu0 %v8563_v2, %s8467_s29 }
  0x40   : > { %963 = vrot.lane.b32.xlu1 %v8585_v8, %s8467_s29  ;;  %961 = vrot.lane.b32.xlu0 %v8573_v5, %s8467_s29 }
  0x44   : > { %1026 = vrot.lane.b32.xlu1 %v8598_v10, %s8468_s30  ;;  %965 = vrot.lane.b32.xlu0 %v8583_v7, %s8467_s29 }
  0x48   : > { %1229 = vrot.lane.b32.xlu1 %v8565_v3, %s8469_s12  ;;  %1227 = vrot.lane.b32.xlu0 %v8557_v1, %s8469_s12 }
  0x4c   : > { %1233 = vrot.lane.b32.xlu1 %v8563_v2, %s8469_s12  ;;  %1231 = vrot.lane.b32.xlu0 %v8555_v0, %s8469_s12 }
  0x50   : > { %1235 = vrot.lane.b32.xlu1 %v8573_v5, %s8469_s12  ;;  %1241 = vrot.lane.b32.xlu0 %v8575_v6, %s8469_s12 }
  0x54   : > { %1239 = vrot.lane.b32.xlu1 %v8583_v7, %s8469_s12  ;;  %1237 = vrot.lane.b32.xlu0 %v8585_v8, %s8469_s12 }
  0x58   : > { %1509 = vrot.lane.b32.xlu1 %v8598_v10, %s10774_s13  ;;  %1300 = vrot.lane.b32.xlu0 %v8598_v10, %s8471_s14 }
  0x5c   : > { %1712 = vrot.lane.b32.xlu1 %v8565_v3, %s10776_s15  ;;  %1710 = vrot.lane.b32.xlu0 %v8557_v1, %s10776_s15 }
  0x60   : > { %1716 = vrot.lane.b32.xlu1 %v8563_v2, %s10776_s15  ;;  %1714 = vrot.lane.b32.xlu0 %v8555_v0, %s10776_s15 }
  0x64   : > { %1720 = vrot.lane.b32.xlu1 %v8585_v8, %s10776_s15  ;;  %1718 = vrot.lane.b32.xlu0 %v8573_v5, %s10776_s15 }
  0x68   : > { %1724 = vrot.lane.b32.xlu1 %v8575_v6, %s10776_s15  ;;  %1722 = vrot.lane.b32.xlu0 %v8583_v7, %s10776_s15 }
  0x6c   : > { %1984 = vrot.lane.b32.xlu1 %v8557_v1, %s10735_s16  ;;  %1783 = vrot.lane.b32.xlu0 %v8598_v10, %s10737_s18  ;;  %s10825_s18 = smov 64  }
  0x70   : > { %1988 = vrot.lane.b32.xlu1 %v8555_v0, %s10735_s16  ;;  %1986 = vrot.lane.b32.xlu0 %v8565_v3, %s10735_s16 }
  0x74   : > { %1992 = vrot.lane.b32.xlu1 %v8573_v5, %s10735_s16  ;;  %1990 = vrot.lane.b32.xlu0 %v8563_v2, %s10735_s16 }
  0x78   : > { %1996 = vrot.lane.b32.xlu1 %v8583_v7, %s10735_s16  ;;  %1994 = vrot.lane.b32.xlu0 %v8585_v8, %s10735_s16 }
  0x7c   : > { %2057 = vrot.lane.b32.xlu1 %v8598_v10, %s10695_s21  ;;  %1998 = vrot.lane.b32.xlu0 %v8575_v6, %s10735_s16  ;;  %s10822_s21 = smov 80  }
  0x80   : > { %2260 = vrot.lane.b32.xlu1 %v8565_v3, %s10774_s13  ;;  %2258 = vrot.lane.b32.xlu0 %v8557_v1, %s10774_s13 }
  0x84   : > { %2264 = vrot.lane.b32.xlu1 %v8563_v2, %s10774_s13  ;;  %2262 = vrot.lane.b32.xlu0 %v8555_v0, %s10774_s13 }
  0x86   : > { %v496_v18 = vpop.permute.xlu1 %495  ;;  %v492_v19 = vpop.permute.xlu0 %491 }
  0x88   : > { %2268 = vrot.lane.b32.xlu1 %v8585_v8, %s10774_s13  ;;  %2266 = vrot.lane.b32.xlu0 %v8573_v5, %s10774_s13 }
  0x8a   : > { %v498_v24 = vpop.permute.xlu1 %497  ;;  %v494_v25 = vpop.permute.xlu0 %493 }
  0x8b   : > { %v513_v27 = vsel %vm507_vm0, %v494_v25, %v496_v18  ;;  %v512_v28 = vsel %vm507_vm0, %v496_v18, %v498_v24  ;;  %v514_v29 = vsel %vm507_vm0, %v492_v19, %v494_v25  ;;  %v8825_v25 = vrot.slane %v8713_v16, %v8807_v57 }
  0x8c   : > { %2272 = vrot.lane.b32.xlu1 %v8575_v6, %s10774_s13  ;;  %2270 = vrot.lane.b32.xlu0 %v8583_v7, %s10774_s13  ;;  %v551_v31 = vmul.f32 %v8726_v20, %v512_v28  ;;  %v549_v32 = vmul.f32 %v8729_v21, %v514_v29  ;;  %v550_v33 = vmul.f32 %v8732_v22, %v513_v27 }
  0x8d   : > { %v8829_v27 = vrot.slane %v8718_v17, %v8807_v57 }
  0x8e   : > { %v500_v38 = vpop.permute.xlu1 %499  ;;  %v506_v39 = vpop.permute.xlu0 %505  ;;  %v559_v40 = vpack.c.bf16 %v551_v31, %v551_v31  ;;  %v557_v41 = vpack.c.bf16 %v549_v32, %v549_v32  ;;  %v558_v42 = vpack.c.bf16 %v550_v33, %v550_v33 }
  0x8f   : > { %v511_v43 = vsel %vm507_vm0, %v498_v24, %v500_v38  ;;  %v515_v44 = vsel %vm507_vm0, %v506_v39, %v492_v19 }
  0x90   : > { %7914 = vmatprep.subr.msk.bf16.mxu1 %vm573_vm1, %v559_v40  ;;  %2331 = vrot.lane.b32.xlu0 %v8598_v10, %s10733_s25  ;;  %v581_v46 = vsel %vm573_vm1, %v558_v42, 0  ;;  %v548_v49 = vmul.f32 %v8751_v30, %v515_v44  ;;  %v552_v50 = vmul.f32 %v8766_v35, %v511_v43  ;;  %s10824_s25 = smov 95  }
  0x91   : > { %7912 = vmatprep.subr.msk.bf16.mxu0 %vm573_vm1, %v557_v41  ;;  %640 = vmatpush1.bf16.msra.mxu1 %v581_v46  ;;  %v8851_v41 = vrot.slane %v8708_v15, %v8807_v57  ;;  %v8856_v46 = vrot.slane %v8742_v26, %v8807_v57 }
  0x92   : > { %v504_v51 = vpop.permute.xlu1 %503  ;;  %v502_v52 = vpop.permute.xlu0 %501  ;;  %2532 = vrot.lane.b32.xlu1 %v8557_v1, %s10731_s26  ;;  %v556_v53 = vpack.c.bf16 %v548_v49, %v548_v49  ;;  %v560_v62 = vpack.c.bf16 %v552_v50, %v552_v50 }
  0x93   : > { %v508_v54 = vsel %vm507_vm0, %v504_v51, %v506_v39  ;;  %v509_v55 = vsel %vm507_vm0, %v502_v52, %v504_v51  ;;  %v510_v56 = vsel %vm507_vm0, %v500_v38, %v502_v52  ;;  %v8842_v38 = vrot.slane %v8737_v23, %v8807_v57  ;;  %10790 = vst [vmem:[#allocation6_spill] sm:$0xff] %v8851_v41 }
  0x94   : > { %v555_v58 = vmul.f32 %v8783_v45, %v508_v54  ;;  %v553_v59 = vmul.f32 %v8790_v47, %v510_v56  ;;  %v554_v60 = vmul.f32 %v8793_v48, %v509_v55  ;;  %2534 = vrot.lane.b32.xlu0 %v8565_v3, %s10731_s26  ;;  %v575_v61 = vsel %vm573_vm1, %v556_v53, 0 }
  0x95   : > { %599 = vmatpush1.bf16.msra.mxu0 %v575_v61  ;;  %v587_v28 = vsel %vm573_vm1, %v560_v62, 0  ;;  %v8865_v51 = vrot.slane %v8771_v36, %v8807_v57 }
  0x96   : > { %v563_v63 = vpack.c.bf16 %v555_v58, %v555_v58  ;;  %v561_v11 = vpack.c.bf16 %v553_v59, %v553_v59  ;;  %v562_v14 = vpack.c.bf16 %v554_v60, %v554_v60  ;;  %v417_v18 = vpop.permute.xlu1 %416  ;;  %v568_v19 = vpop.permute.xlu0 %567  ;;  %2536 = vrot.lane.b32.xlu1 %v8555_v0, %s10731_s26  ;;  %v8878_v60 = vrot.slane %v8776_v37, %v8807_v57 }
  0x97   : > { %7915 = vmatmul.mubr.msk.bf16.vlgmr.msra.gmra.mrb[0].mxu1 %vm569_vm2, %v568_v19 }
  0x98   : > { %2538 = vrot.lane.b32.xlu0 %v8563_v2, %s10731_s26  ;;  %7913 = vmatmul.mubr.msk.bf16.vlgmr.msra.gmra.mrb[0].mxu0 %vm569_vm2, %v568_v19  ;;  %v593_v24 = vsel %vm573_vm1, %v562_v14, 0 }
  0x99   : > { %7916 = vmatprep.subr.msk.bf16.mxu0 %vm573_vm1, %v561_v11  ;;  %7918 = vmatprep.subr.msk.bf16.mxu1 %vm573_vm1, %v563_v63  ;;  %v8887_v63 = vrot.slane %v8763_v34, %v8807_v57  ;;  %v980_v11 = vsub.s32 2, %v8696_v12 }
  0x9a   : > { %681 = vmatpush1.bf16.msra.mxu0 %v587_v28  ;;  %722 = vmatpush1.bf16.msra.mxu1 %v593_v24  ;;  %v421_v29 = vpop.permute.xlu1 %420  ;;  %v419_v31 = vpop.permute.xlu0 %418 }
  0x9b   : > { %v440_v32 = vsel %vm434_vm3, %v419_v31, %v421_v29  ;;  %v441_v33 = vsel %vm434_vm3, %v417_v18, %v419_v31  ;;  %2540 = vrot.lane.b32.xlu1 %v8573_v5, %s10731_s26  ;;  %753 = vmatprep.mubr.bf16.mxu1 %v10697_v4 }
  0x9c   : > { %v476_v39 = vmul.f32 %v8825_v25, %v441_v33  ;;  %v477_v40 = vmul.f32 %v8829_v27, %v440_v32  ;;  %2542 = vrot.lane.b32.xlu0 %v8585_v8, %s10731_s26  ;;  %712 = vmatprep.mubr.bf16.mxu0 %v10697_v4  ;;  %v8903_v33 = vrot.slane %v8713_v16, %v980_v11 }
  0x9e   : > { %v484_v42 = vpack.c.bf16 %v476_v39, %v476_v39  ;;  %v431_v43 = vpop.permute.xlu1 %430  ;;  %v423_v44 = vpop.permute.xlu0 %422  ;;  %v485_v52 = vpack.c.bf16 %v477_v40, %v477_v40 }
  0x9f   : > { %v442_v49 = vsel %vm434_vm3, %v431_v43, %v417_v18  ;;  %v439_v50 = vsel %vm434_vm3, %v421_v29, %v423_v44  ;;  %7919 = vmatmul.mubr.msk.bf16.vlgmr.msra.gmra.mrb[4].mxu1 %vm569_vm2, %v568_v19  ;;  %2544 = vrot.lane.b32.xlu1 %v8583_v7, %s10731_s26 }
  0xa0   : > { %v475_v53 = vmul.f32 %v8842_v38, %v442_v49  ;;  %v478_v54 = vmul.f32 %v8851_v41, %v439_v50  ;;  %2546 = vrot.lane.b32.xlu0 %v8575_v6, %s10731_s26  ;;  %7917 = vmatmul.mubr.msk.bf16.vlgmr.msra.gmra.mrb[4].mxu0 %vm569_vm2, %v568_v19  ;;  %v772_v24 = vsel %vm573_vm1, %v485_v52, 0 }
  0xa1   : > { %7920 = vmatprep.subr.msk.bf16.mxu0 %vm573_vm1, %v484_v42  ;;  %821 = vmatprep.mubr.bf16.mxu0 %v10697_v4 }
  0xa2   : > { %v483_v55 = vpack.c.bf16 %v475_v53, %v475_v53  ;;  %v486_v56 = vpack.c.bf16 %v478_v54, %v478_v54  ;;  %v427_v58 = vpop.permute.xlu1 %426  ;;  %v425_v59 = vpop.permute.xlu0 %424  ;;  %862 = vmatprep.mubr.bf16.mxu1 %v10697_v4 }
  0xa3   : > { %v437_v61 = vsel %vm434_vm3, %v425_v59, %v427_v58  ;;  %v438_v62 = vsel %vm434_vm3, %v423_v44, %v425_v59  ;;  %2605 = vrot.lane.b32.xlu1 %v8598_v10, %s10721_s20  ;;  %s10820_s20 = smov 88  }
  0xa4   : > { %v479_v14 = vmul.f32 %v8856_v46, %v438_v62  ;;  %v480_v18 = vmul.f32 %v8865_v51, %v437_v61  ;;  %7922 = vmatprep.subr.msk.bf16.mxu1 %vm573_vm1, %v486_v56  ;;  %v766_v19 = vsel %vm573_vm1, %v483_v55, 0  ;;  %v8923_v55 = vrot.slane %v8737_v23, %v980_v11 }
  0xa5   : > { %790 = vmatpush1.bf16.msra.mxu0 %v766_v19  ;;  %831 = vmatpush1.bf16.msra.mxu1 %v772_v24  ;;  %v8930_v61 = vrot.slane %v8708_v15, %v980_v11 }
  0xa6   : > { %v487_v57 = vpack.c.bf16 %v479_v14, %v479_v14  ;;  %v488_v28 = vpack.c.bf16 %v480_v18, %v480_v18  ;;  %v954_v29 = vpop.permute.xlu1 %953  ;;  %v429_v31 = vpop.permute.xlu0 %428 }
  0xa7   : > { %v435_v10 = vsel %vm434_vm3, %v429_v31, %v431_v43  ;;  %v436_v32 = vsel %vm434_vm3, %v427_v58, %v429_v31  ;;  %v8913_v43 = vrot.slane %v8718_v17, %v980_v11 }
  0xa8   : > { %v481_v39 = vmul.f32 %v8878_v60, %v436_v32  ;;  %v482_v40 = vmul.f32 %v8887_v63, %v435_v10  ;;  %7921 = vmatmul.mubr.msk.bf16.vlgmr.msra.gmra.mrb[8].mxu0 %vm569_vm2, %v8590_v9  ;;  %7923 = vmatmul.mubr.msk.bf16.vlgmr.msra.gmra.mrb[8].mxu1 %vm569_vm2, %v8590_v9  ;;  %v778_v42 = vsel %vm573_vm1, %v487_v57, 0  ;;  %v8937_v57 = vrot.slane %v8742_v26, %v980_v11 }
  0xa9   : > { %7924 = vmatprep.subr.msk.bf16.mxu0 %vm573_vm1, %v488_v28  ;;  %903 = vmatprep.mubr.bf16.mxu0 %v10697_v4  ;;  %v8940_v28 = vrot.slane %v8771_v36, %v980_v11 }
  0xaa   : > { %v489_v44 = vpack.c.bf16 %v481_v39, %v481_v39  ;;  %v490_v49 = vpack.c.bf16 %v482_v40, %v482_v40  ;;  %872 = vmatpush1.bf16.msra.mxu0 %v778_v42  ;;  %v958_v50 = vpop.permute.xlu1 %957  ;;  %v956_v52 = vpop.permute.xlu0 %955  ;;  %944 = vmatprep.mubr.bf16.mxu1 %v10697_v4 }
  0xab   : > { %v975_v53 = vsel %vm969_vm4, %v956_v52, %v958_v50  ;;  %v976_v54 = vsel %vm969_vm4, %v954_v29, %v956_v52  ;;  %v1254_v52 = vsub.s32 3, %v8696_v12 }
  0xac   : > { %v1011_v56 = vmul.f32 %v8903_v33, %v976_v54  ;;  %v1012_v58 = vmul.f32 %v8913_v43, %v975_v53  ;;  %7926 = vmatprep.subr.msk.bf16.mxu1 %vm573_vm1, %v490_v49  ;;  %v784_v59 = vsel %vm573_vm1, %v489_v44, 0  ;;  %v8951_v44 = vrot.slane %v8776_v37, %v980_v11 }
  0xad   : > { %913 = vmatpush1.bf16.msra.mxu1 %v784_v59 }
  0xae   : > { %v1019_v62 = vpack.c.bf16 %v1011_v56, %v1011_v56  ;;  %v968_v14 = vpop.permute.xlu1 %967  ;;  %v960_v18 = vpop.permute.xlu0 %959  ;;  %v1020_v31 = vpack.c.bf16 %v1012_v58, %v1012_v58 }
  0xaf   : > { %v977_v19 = vsel %vm969_vm4, %v968_v14, %v954_v29  ;;  %v974_v24 = vsel %vm969_vm4, %v958_v50, %v960_v18 }
  0xb0   : > { %v1010_v10 = vmul.f32 %v8923_v55, %v977_v19  ;;  %v1013_v32 = vmul.f32 %v8930_v61, %v974_v24  ;;  %7925 = vmatmul.mubr.msk.bf16.vlgmr.msra.gmra.mrb[12].mxu0 %vm569_vm2, %v8590_v9  ;;  %7927 = vmatmul.mubr.msk.bf16.vlgmr.msra.gmra.mrb[12].mxu1 %vm569_vm2, %v8590_v9  ;;  %v8959_v9 = vrot.slane %v8763_v34, %v980_v11  ;;  %v1038_v58 = vsel %vm573_vm1, %v1020_v31, 0 }
  0xb1   : > { %7928 = vmatprep.subr.msk.bf16.mxu0 %vm573_vm1, %v1019_v62  ;;  %1087 = vmatprep.mubr.bf16.mxu0 %v10697_v4 }
  0xb2   : > { %v1018_v29 = vpack.c.bf16 %v1010_v10, %v1010_v10  ;;  %v1021_v39 = vpack.c.bf16 %v1013_v32, %v1013_v32  ;;  %v964_v40 = vpop.permute.xlu1 %963  ;;  %v962_v42 = vpop.permute.xlu0 %961  ;;  %1128 = vmatprep.mubr.bf16.mxu1 %v10697_v4 }
  0xb3   : > { %v972_v49 = vsel %vm969_vm4, %v962_v42, %v964_v40  ;;  %v973_v50 = vsel %vm969_vm4, %v960_v18, %v962_v42 }
  0xb4   : > { %v1014_v53 = vmul.f32 %v8937_v57, %v973_v50  ;;  %v1015_v54 = vmul.f32 %v8940_v28, %v972_v49  ;;  %7930 = vmatprep.subr.msk.bf16.mxu1 %vm573_vm1, %v1021_v39  ;;  %v1032_v56 = vsel %vm573_vm1, %v1018_v29, 0  ;;  %v8978_v29 = vrot.slane %v8713_v16, %v1254_v52 }
  0xb5   : > { %1056 = vmatpush1.bf16.msra.mxu0 %v1032_v56  ;;  %1097 = vmatpush1.bf16.msra.mxu1 %v1038_v58  ;;  %v8992_v56 = vrot.slane %v8708_v15, %v1254_v52 }
  0xb6   : > { %v1022_v59 = vpack.c.bf16 %v1014_v53, %v1014_v53  ;;  %v1023_v62 = vpack.c.bf16 %v1015_v54, %v1015_v54  ;;  %v1027_v18 = vpop.permute.xlu1 %1026  ;;  %v966_v19 = vpop.permute.xlu0 %965  ;;  %v8989_v54 = vrot.slane %v8718_v17, %v1254_v52 }
  0xb7   : > { %v970_v11 = vsel %vm969_vm4, %v966_v19, %v968_v14  ;;  %v971_v24 = vsel %vm969_vm4, %v964_v40, %v966_v19  ;;  %10791 = vst [vmem:[#allocation7_spill] sm:$0xff] %v8992_v56 }
  0xb8   : > { %v1016_v10 = vmul.f32 %v8951_v44, %v971_v24  ;;  %v1017_v32 = vmul.f32 %v8959_v9, %v970_v11  ;;  %7929 = vmatmul.mubr.msk.bf16.vlgmr.msra.gmra.mrb[16].mxu0 %vm569_vm2, %v1027_v18  ;;  %7931 = vmatmul.mubr.msk.bf16.vlgmr.msra.gmra.mrb[16].mxu1 %vm569_vm2, %v1027_v18  ;;  %v1044_v31 = vsel %vm573_vm1, %v1022_v59, 0  ;;  %v8999_v24 = vrot.slane %v8742_v26, %v1254_v52 }
  0xb9   : > { %7932 = vmatprep.subr.msk.bf16.mxu0 %vm573_vm1, %v1023_v62  ;;  %1169 = vmatprep.mubr.bf16.mxu0 %v10697_v4 }
  0xba   : > { %v1024_v14 = vpack.c.bf16 %v1016_v10, %v1016_v10  ;;  %v1025_v39 = vpack.c.bf16 %v1017_v32, %v1017_v32  ;;  %1138 = vmatpush1.bf16.msra.mxu0 %v1044_v31  ;;  %v1230_v40 = vpop.permute.xlu1 %1229  ;;  %v1228_v42 = vpop.permute.xlu0 %1227  ;;  %1210 = vmatprep.mubr.bf16.mxu1 %v10697_v4  ;;  %10792 = vst [vmem:[#allocation8_spill] sm:$0xff] %v8999_v24 }
  0xbb   : > { %v1250_v49 = vsel %vm1243_vm5, %v1228_v42, %v1230_v40  ;;  %v9006_v31 = vrot.slane %v8737_v23, %v1254_v52 }
  0xbc   : > { %v1285_v50 = vmul.f32 %v8978_v29, %v1250_v49  ;;  %7934 = vmatprep.subr.msk.bf16.mxu1 %vm573_vm1, %v1025_v39  ;;  %v1050_v53 = vsel %vm573_vm1, %v1024_v14, 0 }
  0xbd   : > { %1179 = vmatpush1.bf16.msra.mxu1 %v1050_v53  ;;  %10793 = vst [vmem:[#allocation9_spill] sm:$0xff] %v9006_v31 }
  0xbe   : > { %v1293_v58 = vpack.c.bf16 %v1285_v50, %v1285_v50  ;;  %v1234_v59 = vpop.permute.xlu1 %1233  ;;  %v1232_v62 = vpop.permute.xlu0 %1231 }
  0xbf   : > { %v1248_v19 = vsel %vm1243_vm5, %v1232_v62, %v1234_v59  ;;  %v1249_v11 = vsel %vm1243_vm5, %v1230_v40, %v1232_v62  ;;  %v9019_v62 = vrot.slane %v8771_v36, %v1254_v52 }
  0xc0   : > { %v1286_v10 = vmul.f32 %v8989_v54, %v1249_v11  ;;  %v1287_v32 = vmul.f32 %v8992_v56, %v1248_v19  ;;  %7933 = vmatmul.mubr.msk.bf16.vlgmr.msra.gmra.mrb[20].mxu0 %vm569_vm2, %v1027_v18  ;;  %7935 = vmatmul.mubr.msk.bf16.vlgmr.msra.gmra.mrb[20].mxu1 %vm569_vm2, %v1027_v18  ;;  %v9016_v18 = vrot.slane %v8763_v34, %v1254_v52 }
  0xc1   : > { %7936 = vmatprep.subr.msk.bf16.mxu0 %vm573_vm1, %v1293_v58  ;;  %1402 = vmatprep.mubr.bf16.mxu1 %v10697_v4 }
  0xc2   : > { %v1294_v14 = vpack.c.bf16 %v1286_v10, %v1286_v10  ;;  %v1295_v39 = vpack.c.bf16 %v1287_v32, %v1287_v32  ;;  %v1236_v40 = vpop.permute.xlu1 %1235  ;;  %v1242_v49 = vpop.permute.xlu0 %1241  ;;  %1361 = vmatprep.mubr.bf16.mxu0 %v10697_v4  ;;  %v9026_v10 = vrot.slane %v8776_v37, %v1254_v52 }
  0xc3   : > { %v1247_v50 = vsel %vm1243_vm5, %v1234_v59, %v1236_v40  ;;  %v1251_v53 = vsel %vm1243_vm5, %v1242_v49, %v1228_v42 }
  0xc4   : > { %v1288_v58 = vmul.f32 %v8999_v24, %v1247_v50  ;;  %v1284_v19 = vmul.f32 %v9006_v31, %v1251_v53  ;;  %7938 = vmatprep.subr.msk.bf16.mxu1 %vm573_vm1, %v1295_v39  ;;  %v1312_v11 = vsel %vm573_vm1, %v1294_v14, 0 }
  0xc5   : > { %1371 = vmatpush1.bf16.msra.mxu1 %v1312_v11 }
  0xc6   : > { %v1296_v59 = vpack.c.bf16 %v1288_v58, %v1288_v58  ;;  %v1292_v42 = vpack.c.bf16 %v1284_v19, %v1284_v19  ;;  %v1240_v32 = vpop.permute.xlu1 %1239  ;;  %v1238_v4 = vpop.permute.xlu0 %1237 }
  0xc7   : > { %v1244_v56 = vsel %vm1243_vm5, %v1240_v32, %v1242_v49  ;;  %v1245_v50 = vsel %vm1243_vm5, %v1238_v4, %v1240_v32  ;;  %v1246_v53 = vsel %vm1243_vm5, %v1236_v40, %v1238_v4  ;;  %v1502_v4 = vpack.c.bf16 %v8565_v3, %v8565_v3 }
  0xc8   : > { %v1291_v39 = vmul.f32 %v9016_v18, %v1244_v56  ;;  %v1289_v14 = vmul.f32 %v9019_v62, %v1246_v53  ;;  %v1290_v52 = vmul.f32 %v9026_v10, %v1245_v50  ;;  %v1306_v58 = vsel %vm573_vm1, %v1292_v42, 0 }
  0xc9   : > { %1330 = vmatpush1.bf16.msra.mxu0 %v1306_v58  ;;  %v1318_v32 = vsel %vm573_vm1, %v1296_v59, 0  ;;  %v1504_v40 = vpack.c.bf16 %v8563_v2, %v8563_v2  ;;  %v1503_v59 = vpack.c.bf16 %v8555_v0, %v8555_v0  ;;  %v9053_v50 = vsub.s32 5, %v8696_v12 }
  0xca   : > { %v1299_v19 = vpack.c.bf16 %v1291_v39, %v1291_v39  ;;  %v1297_v11 = vpack.c.bf16 %v1289_v14, %v1289_v14  ;;  %v1298_v24 = vpack.c.bf16 %v1290_v52, %v1290_v52  ;;  %v9038_v31 = vpop.permute.xlu1 %1509  ;;  %v1301_v49 = vpop.permute.xlu0 %1300  ;;  %v10794_v53 = vmov 0  }
  0xcb   : > { %7939 = vmatmul.mubr.msk.bf16.vlgmr.msra.gmra.mrb[24].mxu1 %vm569_vm2, %v1301_v49  ;;  %v1521_v0 = vsel %vm573_vm1, %v1503_v59, 0  ;;  %v9065_v39 = vrot.slane %v8713_v16, %v9053_v50 }
  0xcc   : > { %7937 = vmatmul.mubr.msk.bf16.vlgmr.msra.gmra.mrb[24].mxu0 %vm569_vm2, %v1301_v49  ;;  %7940 = vmatprep.subr.msk.bf16.mxu0 %vm573_vm1, %v1297_v11  ;;  %v1324_v56 = vsel %vm573_vm1, %v1298_v24, 0  ;;  %v1501_v24 = vpack.c.bf16 %v8557_v1, %v8557_v1  ;;  %v1506_v1 = vpack.c.bf16 %v8585_v8, %v8585_v8  ;;  %v9078_v11 = vrot.slane %v8708_v15, %v9053_v50 }
  0xcd   : > { %7942 = vmatprep.subr.msk.bf16.mxu1 %vm573_vm1, %v1299_v19  ;;  %1412 = vmatpush1.bf16.msra.mxu0 %v1318_v32  ;;  %10795 = vst [vmem:[#allocation10_spill] sm:$0xff] %v9065_v39  ;;  %v1508_v19 = vpack.c.bf16 %v8575_v6, %v8575_v6  ;;  %v9082_v32 = vrot.slane %v8718_v17, %v9053_v50 }
  0xce   : > { %v1713_v42 = vpop.permute.xlu1 %1712  ;;  %1453 = vmatpush1.bf16.msra.mxu1 %v1324_v56  ;;  %v1711_v3 = vpop.permute.xlu0 %1710  ;;  %1484 = vmatprep.mubr.bf16.mxu1 %v10794_v53  ;;  %v1515_v52 = vsel %vm573_vm1, %v1501_v24, 0  ;;  %v1507_v8 = vpack.c.bf16 %v8583_v7, %v8583_v7  ;;  %v9099_v7 = vrot.slane %v8737_v23, %v9053_v50 }
  0xcf   : > { %1443 = vmatprep.mubr.bf16.mxu0 %v10794_v53  ;;  %7944 = vmatprep.subr.msk.bf16.mxu0 %vm573_vm1, %v1502_v4  ;;  %10796 = vst [vmem:[#allocation11_spill] sm:$0xff] %v9082_v32 }
  0xd0   : > { %7946 = vmatprep.subr.msk.bf16.mxu1 %vm573_vm1, %v1504_v40  ;;  %v1505_v40 = vpack.c.bf16 %v8573_v5, %v8573_v5  ;;  %10797 = vst [vmem:[#allocation12_spill] sm:$0xff] %v9099_v7 }
  0xd2   : > { %v1717_v2 = vpop.permute.xlu1 %1716  ;;  %v1715_v14 = vpop.permute.xlu0 %1714 }
  0xd3   : > { %v1732_v58 = vsel %vm1726_vm6, %v1713_v42, %v1715_v14  ;;  %7943 = vmatmul.mubr.msk.bf16.vlgmr.msra.gmra.mrb[28].mxu1 %vm569_vm2, %v1301_v49  ;;  %v1731_v6 = vsel %vm1726_vm6, %v1715_v14, %v1717_v2 }
  0xd4   : > { %7941 = vmatmul.mubr.msk.bf16.vlgmr.msra.gmra.mrb[28].mxu0 %vm569_vm2, %v1301_v49  ;;  %1580 = vmatpush1.bf16.msra.mxu1 %v1521_v0  ;;  %v1768_v49 = vmul.f32 %v9065_v39, %v1732_v58  ;;  %v1733_v0 = vsel %vm1726_vm6, %v1711_v3, %v1713_v42  ;;  %v1769_v14 = vmul.f32 %v9082_v32, %v1731_v6  ;;  %v1527_v39 = vsel %vm573_vm1, %v1505_v40, 0 }
  0xd5   : > { %1539 = vmatpush1.bf16.msra.mxu0 %v1515_v52  ;;  %1611 = vmatprep.mubr.bf16.mxu1 %v10794_v53  ;;  %v1533_v52 = vsel %vm573_vm1, %v1507_v8, 0  ;;  %v1767_v8 = vmul.f32 %v9099_v7, %v1733_v0  ;;  %v9126_v40 = vrot.slane %v8776_v37, %v9053_v50 }
  0xd6   : > { %v1721_v4 = vpop.permute.xlu1 %1720  ;;  %v1719_v56 = vpop.permute.xlu0 %1718  ;;  %1570 = vmatprep.mubr.bf16.mxu0 %v10794_v53  ;;  %7948 = vmatprep.subr.msk.bf16.mxu0 %vm573_vm1, %v1506_v1  ;;  %v1776_v1 = vpack.c.bf16 %v1768_v49, %v1768_v49  ;;  %v1777_v49 = vpack.c.bf16 %v1769_v14, %v1769_v14 }
  0xd7   : > { %v1730_v59 = vsel %vm1726_vm6, %v1717_v2, %v1719_v56  ;;  %7950 = vmatprep.subr.msk.bf16.mxu1 %vm573_vm1, %v1508_v19  ;;  %v9108_v2 = vrot.slane %v8771_v36, %v9053_v50  ;;  %10800 = vst [vmem:[#allocation15_spill] sm:$0xff] %v9126_v40 }
  0xd8   : > { %v1770_v24 = vmul.f32 %v9078_v11, %v1730_v59  ;;  %v9113_v59 = vrot.slane %v8763_v34, %v9053_v50 }
  0xd9   : > { %10798 = vst [vmem:[#allocation13_spill] sm:$0xff] %v9108_v2 }
  0xda   : > { %v1778_v5 = vpack.c.bf16 %v1770_v24, %v1770_v24  ;;  %v1725_v58 = vpop.permute.xlu1 %1724  ;;  %v1723_v19 = vpop.permute.xlu0 %1722  ;;  %10799 = vst [vmem:[#allocation14_spill] sm:$0xff] %v9113_v59 }
  0xdb   : > { %v1728_v42 = vsel %vm1726_vm6, %v1721_v4, %v1723_v19  ;;  %7947 = vmatmul.mubr.msk.bf16.vlgmr.msra.gmra.mrb[32].mxu1 %vm569_vm2, %v9038_v31  ;;  %v1734_v6 = vsel %vm1726_vm6, %v1725_v58, %v1711_v3  ;;  %v1727_v24 = vsel %vm1726_vm6, %v1723_v19, %v1725_v58  ;;  %v1795_v19 = vsel %vm573_vm1, %v1777_v49, 0 }
  0xdc   : > { %7945 = vmatmul.mubr.msk.bf16.vlgmr.msra.gmra.mrb[32].mxu0 %vm569_vm2, %v9038_v31  ;;  %1662 = vmatpush1.bf16.msra.mxu1 %v1533_v52  ;;  %v1772_v0 = vmul.f32 %v9108_v2, %v1728_v42  ;;  %v1774_v14 = vmul.f32 %v9113_v59, %v1734_v6  ;;  %v9142_v52 = vrot.slane %v8742_v26, %v9053_v50 }
  0xdd   : > { %1621 = vmatpush1.bf16.msra.mxu0 %v1527_v39  ;;  %7954 = vmatprep.subr.msk.bf16.mxu1 %vm573_vm1, %v1778_v5  ;;  %v1775_v39 = vpack.c.bf16 %v1767_v8, %v1767_v8  ;;  %v9145_v5 = vsub.s32 6, %v8696_v12  ;;  %v1773_v58 = vmul.f32 %v9126_v40, %v1727_v24 }
  0xde   : > { %7952 = vmatprep.subr.msk.bf16.mxu0 %vm573_vm1, %v1776_v1  ;;  %v9133_v3 = vpop.permute.xlu1 %1984  ;;  %v9135_v7 = vpop.permute.xlu0 %1783  ;;  %1693 = vmatprep.mubr.bf16.mxu1 %v10794_v53  ;;  %10801 = vst [vmem:[#allocation16_spill] sm:$0xff] %v9142_v52  ;;  %v1729_v1 = vsel %vm1726_vm6, %v1719_v56, %v1721_v4  ;;  %v1780_v42 = vpack.c.bf16 %v1772_v0, %v1772_v0 }
  0xdf   : > { %1652 = vmatprep.mubr.bf16.mxu0 %v10794_v53  ;;  %v9154_v8 = vrot.slane %v8713_v16, %v9145_v5  ;;  %v1782_v2 = vpack.c.bf16 %v1774_v14, %v1774_v14  ;;  %v1771_v4 = vmul.f32 %v9142_v52, %v1729_v1  ;;  %v1789_v56 = vsel %vm573_vm1, %v1775_v39, 0 }
  0xe0   : > { %v9166_v49 = vrot.slane %v8708_v15, %v9145_v5  ;;  %v1781_v24 = vpack.c.bf16 %v1773_v58, %v1773_v58  ;;  %v9171_v0 = vrot.slane %v8718_v17, %v9145_v5 }
  0xe1   : > { %10802 = vst [vmem:[#allocation17_spill] sm:$0xff] %v9154_v8 }
  0xe2   : > { %v1989_v6 = vpop.permute.xlu1 %1988  ;;  %v1987_v50 = vpop.permute.xlu0 %1986  ;;  %10803 = vst [vmem:[#allocation18_spill] sm:$0xff] %v9166_v49  ;;  %10804 = vst [vmem:[#allocation19_spill] sm:$0xff] %v9171_v0 }
  0xe3   : > { %v2006_v59 = vsel %vm2000_vm7, %v1987_v50, %v1989_v6  ;;  %7951 = vmatmul.mubr.msk.bf16.vlgmr.msra.gmra.mrb[36].mxu1 %vm569_vm2, %v9038_v31 }
  0xe4   : > { %1854 = vmatpush1.bf16.msra.mxu1 %v1795_v19  ;;  %7949 = vmatmul.mubr.msk.bf16.vlgmr.msra.gmra.mrb[36].mxu0 %vm569_vm2, %v9038_v31  ;;  %v2042_v14 = vmul.f32 %v9154_v8, %v2006_v59  ;;  %v9183_v19 = vrot.slane %v8737_v23, %v9145_v5  ;;  %v1807_v8 = vsel %vm573_vm1, %v1781_v24, 0 }
  0xe5   : > { %1813 = vmatpush1.bf16.msra.mxu0 %v1789_v56  ;;  %7958 = vmatprep.subr.msk.bf16.mxu1 %vm573_vm1, %v1782_v2  ;;  %v1779_v2 = vpack.c.bf16 %v1771_v4, %v1771_v4  ;;  %v9193_v4 = vrot.slane %v8771_v36, %v9145_v5 }
  0xe6   : > { %7956 = vmatprep.subr.msk.bf16.mxu0 %vm573_vm1, %v1780_v42  ;;  %v1993_v1 = vpop.permute.xlu1 %1992  ;;  %v1991_v31 = vpop.permute.xlu0 %1990  ;;  %1885 = vmatprep.mubr.bf16.mxu1 %v10794_v53  ;;  %10805 = vst [vmem:[#allocation20_spill] sm:$0xff] %v9183_v19  ;;  %v2007_v42 = vsel %vm2000_vm7, %v9133_v3, %v1987_v50  ;;  %v2050_v52 = vpack.c.bf16 %v2042_v14, %v2042_v14 }
  0xe7   : > { %v2004_v39 = vsel %vm2000_vm7, %v1991_v31, %v1993_v1  ;;  %v2005_v58 = vsel %vm2000_vm7, %v1989_v6, %v1991_v31  ;;  %1844 = vmatprep.mubr.bf16.mxu0 %v10794_v53  ;;  %10806 = vst [vmem:[#allocation21_spill] sm:$0xff] %v9193_v4  ;;  %v2041_v50 = vmul.f32 %v9183_v19, %v2007_v42  ;;  %v1801_v24 = vsel %vm573_vm1, %v1779_v2, 0  ;;  %v2834_v2 = vld [vmem:[%s10687_s5] sm:$0xff] }
  0xe8   : > { %v2044_v59 = vmul.f32 %v9166_v49, %v2004_v39  ;;  %v2043_v56 = vmul.f32 %v9171_v0, %v2005_v58  ;;  %v2820_v39 = vld [vmem:[%s10686_s4] sm:$0xff]  ;;  %v9208_v14 = vrot.slane %v8763_v34, %v9145_v5  ;;  %v9238_v19 = vsub.s32 7, %v8696_v12 }
  0xe9   : > { %2823 = vperm.xlu1 %8435, %v2820_v39  }
  0xea   : > { %v2052_v40 = vpack.c.bf16 %v2044_v59, %v2044_v59  ;;  %v1997_v6 = vpop.permute.xlu1 %1996  ;;  %v1995_v31 = vpop.permute.xlu0 %1994  ;;  %10807 = vst [vmem:[#allocation22_spill] sm:$0xff] %v9208_v14  ;;  %v2051_v58 = vpack.c.bf16 %v2043_v56, %v2043_v56  ;;  %v9212_v59 = vrot.slane %v8776_v37, %v9145_v5  ;;  %v2806_v56 = vld [vmem:[%s10685_s3] sm:$0xff] }
  0xeb   : > { %v2002_v49 = vsel %vm2000_vm7, %v1995_v31, %v1997_v6  ;;  %7955 = vmatmul.mubr.msk.bf16.vlgmr.msra.gmra.mrb[40].mxu1 %vm569_vm2, %v9135_v7  ;;  %2809 = vperm.xlu0 %8434, %v2806_v56  }
  0xec   : > { %1936 = vmatpush1.bf16.msra.mxu1 %v1807_v8  ;;  %7953 = vmatmul.mubr.msk.bf16.vlgmr.msra.gmra.mrb[40].mxu0 %vm569_vm2, %v9135_v7  ;;  %10808 = vst [vmem:[#allocation23_spill] sm:$0xff] %v9212_v59  ;;  %v2046_v42 = vmul.f32 %v9193_v4, %v2002_v49 }
  0xed   : > { %1895 = vmatpush1.bf16.msra.mxu0 %v1801_v24  ;;  %1967 = vmatprep.mubr.bf16.mxu1 %v10794_v53 }
  0xee   : > { %v9216_v8 = vpop.permute.xlu1 %2057  ;;  %v1999_v39 = vpop.permute.xlu0 %1998  ;;  %7960 = vmatprep.subr.msk.bf16.mxu0 %vm573_vm1, %v2050_v52  ;;  %7962 = vmatprep.subr.msk.bf16.mxu1 %vm573_vm1, %v2052_v40  ;;  %v2049_v52 = vpack.c.bf16 %v2041_v50, %v2041_v50  ;;  %v9234_v40 = vrot.slane %v8742_v26, %v9145_v5  ;;  %v2870_v5 = vld [vmem:[%s10689_s7] sm:$0xff] }
  0xef   : > { %v2001_v24 = vsel %vm2000_vm7, %v1997_v6, %v1999_v39  ;;  %v2008_v49 = vsel %vm2000_vm7, %v1999_v39, %v9133_v3  ;;  %1926 = vmatprep.mubr.bf16.mxu0 %v10794_v53  ;;  %2837 = vperm.xlu1 %8435, %v2834_v2   ;;  %v2003_v6 = vsel %vm2000_vm7, %v1993_v1, %v1995_v31  ;;  %v2069_v3 = vsel %vm573_vm1, %v2051_v58, 0  ;;  %v2856_v31 = vld [vmem:[%s10688_s6] sm:$0xff] }
  0xf0   : > { %10809 = vst [vmem:[#allocation24_spill] sm:$0xff] %v9234_v40  ;;  %v2048_v4 = vmul.f32 %v9208_v14, %v2008_v49  ;;  %v2047_v0 = vmul.f32 %v9212_v59, %v2001_v24  ;;  %v2054_v39 = vpack.c.bf16 %v2046_v42, %v2046_v42  ;;  %v2045_v12 = vmul.f32 %v9234_v40, %v2003_v6 }
  0xf1   : > { %v2063_v1 = vsel %vm573_vm1, %v2049_v52, 0  ;;  %v9264_v42 = vrot.slane %v8718_v17, %v9238_v19  ;;  %2859 = vperm.xlu0 %8434, %v2856_v31   ;;  %v9275_v17 = vrot.slane %v8737_v23, %v9238_v19  ;;  %v9280_v52 = vrot.slane %v8708_v15, %v9238_v19 }
  0xf2   : > { %v2056_v2 = vpack.c.bf16 %v2048_v4, %v2048_v4  ;;  %v2261_v50 = vpop.permute.xlu1 %2260  ;;  %v2259_v32 = vpop.permute.xlu0 %2258  ;;  %v9256_v4 = vrot.slane %v8713_v16, %v9238_v19  ;;  %v2055_v58 = vpack.c.bf16 %v2047_v0, %v2047_v0  ;;  %v2053_v0 = vpack.c.bf16 %v2045_v12, %v2045_v12 }
  0xf3   : > { %7959 = vmatmul.mubr.msk.bf16.vlgmr.msra.gmra.mrb[44].mxu1 %vm569_vm2, %v9135_v7  ;;  %2873 = vperm.xlu1 %8435, %v2870_v5   ;;  %10811 = vst [vmem:[#allocation26_spill] sm:$0xff] %v9264_v42  ;;  %10812 = vst [vmem:[#allocation27_spill] sm:$0xff] %v9275_v17  ;;  %v2281_v6 = vsel %vm2274_vm8, %v2259_v32, %v2261_v50  ;;  %v9292_v15 = vrot.slane %v8763_v34, %v9238_v19 }
  0xf4   : > { %2128 = vmatpush1.bf16.msra.mxu1 %v2069_v3  ;;  %7957 = vmatmul.mubr.msk.bf16.vlgmr.msra.gmra.mrb[44].mxu0 %vm569_vm2, %v9135_v7  ;;  %10810 = vst [vmem:[#allocation25_spill] sm:$0xff] %v9256_v4  ;;  %10813 = vst [vmem:[#allocation28_spill] sm:$0xff] %v9280_v52  ;;  %v2075_v31 = vsel %vm573_vm1, %v2053_v0, 0  ;;  %v9305_v34 = vrot.slane %v8776_v37, %v9238_v19 }
  0xf5   : > { %2087 = vmatpush1.bf16.msra.mxu0 %v2063_v1  ;;  %7966 = vmatprep.subr.msk.bf16.mxu1 %vm573_vm1, %v2056_v2  ;;  %10814 = vst [vmem:[#allocation29_spill] sm:$0xff] %v9292_v15  ;;  %v2315_v1 = vmul.f32 %v9275_v17, %v2281_v6  ;;  %v9318_v6 = vrot.slane %v8742_v26, %v9238_v19 }
  0xf6   : > { %v2265_v56 = vpop.permute.xlu1 %2264  ;;  %v2263_v7 = vpop.permute.xlu0 %2262  ;;  %7964 = vmatprep.subr.msk.bf16.mxu0 %vm573_vm1, %v2054_v39  ;;  %2159 = vmatprep.mubr.bf16.mxu1 %v10794_v53  ;;  %v2081_v39 = vsel %vm573_vm1, %v2055_v58, 0  ;;  %v9301_v58 = vrot.slane %v8771_v36, %v9238_v19  ;;  %10816 = vst [vmem:[#allocation31_spill] sm:$0xff] %v9305_v34 }
  0xf7   : > { %v2279_v16 = vsel %vm2274_vm8, %v2263_v7, %v2265_v56  ;;  %v2280_v24 = vsel %vm2274_vm8, %v2261_v50, %v2263_v7  ;;  %2118 = vmatprep.mubr.bf16.mxu0 %v10794_v53  ;;  %v2323_v37 = vpack.c.bf16 %v2315_v1, %v2315_v1  ;;  %10817 = vst [vmem:[#allocation32_spill] sm:$0xff] %v9318_v6 }
  0xf8   : > { %v2316_v49 = vmul.f32 %v9256_v4, %v2280_v24  ;;  %v2317_v3 = vmul.f32 %v9264_v42, %v2279_v16  ;;  %10815 = vst [vmem:[#allocation30_spill] sm:$0xff] %v9301_v58 }
  0xf9   : > { %v2337_v19 = vsel %vm573_vm1, %v2323_v37, 0 }
  0xfa   : > { %v2324_v2 = vpack.c.bf16 %v2316_v49, %v2316_v49  ;;  %v2269_v5 = vpop.permute.xlu1 %2268  ;;  %v2267_v12 = vpop.permute.xlu0 %2266 }
  0xfb   : > { %v2278_v23 = vsel %vm2274_vm8, %v2265_v56, %v2267_v12  ;;  %7963 = vmatmul.mubr.msk.bf16.vlgmr.msra.gmra.mrb[48].mxu1 %vm569_vm2, %v9216_v8  ;;  %v2325_v56 = vpack.c.bf16 %v2317_v3, %v2317_v3 }
  0xfc   : > { %v2318_v50 = vmul.f32 %v9280_v52, %v2278_v23  ;;  %2210 = vmatpush1.bf16.msra.mxu1 %v2081_v39  ;;  %7961 = vmatmul.mubr.msk.bf16.vlgmr.msra.gmra.mrb[48].mxu0 %vm569_vm2, %v9216_v8 }
  0xfd   : > { %2169 = vmatpush1.bf16.msra.mxu0 %v2075_v31  ;;  %2241 = vmatprep.mubr.bf16.mxu1 %v10794_v53  ;;  %v2343_v23 = vsel %vm573_vm1, %v2325_v56, 0  ;;  %v7977_v56 = vld [vmem:[%s10683_s1 + $0x48] ss:$0 sm:$0xff] }
  0xfe   : > { %v2326_v7 = vpack.c.bf16 %v2318_v50, %v2318_v50  ;;  %v2273_v16 = vpop.permute.xlu1 %2272  ;;  %v2271_v24 = vpop.permute.xlu0 %2270  ;;  %7968 = vmatprep.subr.msk.bf16.mxu0 %vm573_vm1, %v2324_v2  ;;  %2200 = vmatprep.mubr.bf16.mxu0 %v10794_v53 }
  0xff   : > { %v2282_v0 = vsel %vm2274_vm8, %v2273_v16, %v2259_v32  ;;  %v2275_v36 = vsel %vm2274_vm8, %v2271_v24, %v2273_v16  ;;  %v2276_v49 = vsel %vm2274_vm8, %v2269_v5, %v2271_v24  ;;  %v2277_v32 = vsel %vm2274_vm8, %v2267_v12, %v2269_v5  ;;  %v7976_v24 = vld [vmem:[%s10683_s1 + $0x40] ss:$0 sm:$0xff] }
 0x100   : > { %v2322_v3 = vmul.f32 %v9292_v15, %v2282_v0  ;;  %v2320_v39 = vmul.f32 %v9301_v58, %v2276_v49  ;;  %7970 = vmatprep.subr.msk.bf16.mxu1 %vm573_vm1, %v2326_v7  ;;  %v2321_v2 = vmul.f32 %v9305_v34, %v2275_v36  ;;  %v2319_v26 = vmul.f32 %v9318_v6, %v2277_v32  ;;  %v7978_v36 = vld [vmem:[%s10683_s1 + $0x50] ss:$0 sm:$0xff] }
 0x102   : > { %v2330_v50 = vpack.c.bf16 %v2322_v3, %v2322_v3  ;;  %v2328_v31 = vpack.c.bf16 %v2320_v39, %v2320_v39  ;;  %v2332_v1 = vpop.permute.xlu0 %2331  ;;  %v2329_v5 = vpack.c.bf16 %v2321_v2, %v2321_v2 }
 0x103   : > { %7967 = vmatmul.mubr.msk.bf16.vlgmr.msra.gmra.mrb[52].mxu1 %vm569_vm2, %v9216_v8 }
 0x104   : > { %2402 = vmatpush1.bf16.msra.mxu1 %v2343_v23  ;;  %7965 = vmatmul.mubr.msk.bf16.vlgmr.msra.gmra.mrb[52].mxu0 %vm569_vm2, %v9216_v8  ;;  %v2533_v7 = vpop.permute.xlu1 %2532  ;;  %v2327_v8 = vpack.c.bf16 %v2319_v26, %v2319_v26  ;;  %v2355_v37 = vsel %vm573_vm1, %v2329_v5, 0  ;;  %v7979_v26 = vld [vmem:[%s10683_s1 + $0x58] ss:$0 sm:$0xff] }
 0x105   : > { %2361 = vmatpush1.bf16.msra.mxu0 %v2337_v19  ;;  %7974 = vmatprep.subr.msk.bf16.mxu1 %vm573_vm1, %v2330_v50 }
 0x106   : > { %v2535_v12 = vpop.permute.xlu0 %2534  ;;  %7972 = vmatprep.subr.msk.bf16.mxu0 %vm573_vm1, %v2328_v31  ;;  %2433 = vmatprep.mubr.bf16.mxu1 %v10794_v53  ;;  %v2349_v31 = vsel %vm573_vm1, %v2327_v8, 0 }
 0x107   : > { %2392 = vmatprep.mubr.bf16.mxu0 %v10794_v53  ;;  %v2555_v0 = vsel %vm2548_vm9, %v2533_v7, %v2535_v12 }
 0x108   : > { %v2537_v16 = vpop.permute.xlu1 %2536  ;;  %v2589_v2 = vmul.f32 %v7976_v24, %v2555_v0  ;;  %v7980_v24 = vld [vmem:[%s10683_s1 + $0x60] ss:$0 sm:$0xff]  ;;  %v7981_v0 = vld [vmem:[%s10683_s1 + $0x68] ss:$0 sm:$0xff] }
 0x109   : > { %v2554_v49 = vsel %vm2548_vm9, %v2535_v12, %v2537_v16 }
 0x10a   : > { %v2539_v3 = vpop.permute.xlu0 %2538  ;;  %v2590_v39 = vmul.f32 %v7977_v56, %v2554_v49  ;;  %v2597_v8 = vpack.c.bf16 %v2589_v2, %v2589_v2 }
 0x10b   : > { %v2553_v32 = vsel %vm2548_vm9, %v2537_v16, %v2539_v3  ;;  %7971 = vmatmul.mubr.msk.bf16.vlgmr.msra.gmra.mrb[56].mxu1 %vm569_vm2, %v2332_v1 }
 0x10c   : > { %v2591_v23 = vmul.f32 %v7978_v36, %v2553_v32  ;;  %v2598_v50 = vpack.c.bf16 %v2590_v39, %v2590_v39  ;;  %7969 = vmatmul.mubr.msk.bf16.vlgmr.msra.gmra.mrb[56].mxu0 %vm569_vm2, %v2332_v1  ;;  %2484 = vmatpush1.bf16.msra.mxu1 %v2355_v37  ;;  %v7983_v37 = vld [vmem:[%s10683_s1 + $0x78] ss:$0 sm:$0xff] }
 0x10d   : > { %2443 = vmatpush1.bf16.msra.mxu0 %v2349_v31  ;;  %v2541_v19 = vpop.permute.xlu1 %2540  ;;  %2515 = vmatprep.mubr.bf16.mxu1 %v10794_v53 }
 0x10e   : > { %v2599_v5 = vpack.c.bf16 %v2591_v23, %v2591_v23  ;;  %v2543_v12 = vpop.permute.xlu0 %2542  ;;  %v2552_v56 = vsel %vm2548_vm9, %v2539_v3, %v2541_v19  ;;  %2474 = vmatprep.mubr.bf16.mxu0 %v10794_v53  ;;  %7984 = vmatprep.subr.msk.bf16.mxu0 %vm573_vm1, %v2598_v50  ;;  %v7982_v3 = vld [vmem:[%s10683_s1 + $0x70] ss:$0 sm:$0xff] }
 0x10f   : > { %v2592_v16 = vmul.f32 %v7979_v26, %v2552_v56  ;;  %v2551_v36 = vsel %vm2548_vm9, %v2541_v19, %v2543_v12 }
 0x110   : > { %v2617_v32 = vsel %vm573_vm1, %v2599_v5, 0  ;;  %v2593_v19 = vmul.f32 %v7980_v24, %v2551_v36  ;;  %v2611_v5 = vsel %vm573_vm1, %v2597_v8, 0 }
 0x111   : > { %v2600_v49 = vpack.c.bf16 %v2592_v16, %v2592_v16  ;;  %v2545_v39 = vpop.permute.xlu1 %2544 }
 0x112   : > { %v2547_v2 = vpop.permute.xlu0 %2546  ;;  %v2550_v23 = vsel %vm2548_vm9, %v2543_v12, %v2545_v39 }
 0x113   : > { %v2556_v50 = vsel %vm2548_vm9, %v2547_v2, %v2533_v7  ;;  %7975 = vmatmul.mubr.msk.bf16.vlgmr.msra.gmra.mrb[60].mxu1 %vm569_vm2, %v2332_v1  ;;  %v2549_v31 = vsel %vm2548_vm9, %v2545_v39, %v2547_v2  ;;  %v2594_v26 = vmul.f32 %v7981_v0, %v2550_v23  ;;  %7986 = vmatprep.subr.msk.bf16.mxu1 %vm573_vm1, %v2600_v49 }
 0x114   : > { %v2596_v56 = vmul.f32 %v7983_v37, %v2556_v50  ;;  %7973 = vmatmul.mubr.msk.bf16.vlgmr.msra.gmra.mrb[60].mxu0 %vm569_vm2, %v2332_v1  ;;  %v2595_v16 = vmul.f32 %v7982_v3, %v2549_v31  ;;  %2676 = vmatpush1.bf16.msra.mxu1 %v2617_v32  ;;  %v2601_v0 = vpack.c.bf16 %v2593_v19, %v2593_v19 }
 0x115   : > { %2635 = vmatpush1.bf16.msra.mxu0 %v2611_v5  ;;  %v2602_v12 = vpack.c.bf16 %v2594_v26, %v2594_v26  ;;  %2707 = vmatprep.mubr.bf16.mxu1 %v10794_v53  ;;  %v2606_v24 = vpop.permute.xlu1 %2605 }
 0x116   : > { %v2604_v7 = vpack.c.bf16 %v2596_v56, %v2596_v56  ;;  %v2603_v58 = vpack.c.bf16 %v2595_v16, %v2595_v16  ;;  %2666 = vmatprep.mubr.bf16.mxu0 %v10794_v53  ;;  %v2623_v8 = vsel %vm573_vm1, %v2601_v0, 0 }
 0x117   : > { %7988 = vmatprep.subr.msk.bf16.mxu0 %vm573_vm1, %v2602_v12  ;;  %v9407_v12 = vld [vmem:[%s10690_s8] sm:$0xff]  }
 0x118   : > { %7990 = vmatprep.subr.msk.bf16.mxu1 %vm573_vm1, %v2604_v7  ;;  %v2629_v1 = vsel %vm573_vm1, %v2603_v58, 0  ;;  %2971 = vrot.lane.b32.xlu1 %v9407_v12, %s8466_s28 }
 0x11b   : > { %7987 = vmatmul.mubr.msk.bf16.vlgmr.msra.gmra.mrb[64].mxu1 %vm569_vm2, %v2606_v24 }
 0x11c   : > { %7985 = vmatmul.mubr.msk.bf16.vlgmr.msra.gmra.mrb[64].mxu0 %vm569_vm2, %v2606_v24  ;;  %2758 = vmatpush1.bf16.msra.mxu1 %v2629_v1 }
 0x11d   : > { %2717 = vmatpush1.bf16.msra.mxu0 %v2623_v8  ;;  %2789 = vmatprep.mubr.bf16.mxu1 %v10794_v53 }
 0x11e   : > { %2748 = vmatprep.mubr.bf16.mxu0 %v10794_v53 }
 0x123   : > { %7991 = vmatmul.mubr.msk.bf16.vlgmr.msra.gmra.mrb[68].mxu1 %vm569_vm2, %v2606_v24 }
 0x124   : > { %7989 = vmatmul.mubr.msk.bf16.vlgmr.msra.gmra.mrb[68].mxu0 %vm569_vm2, %v2606_v24  ;;  %3075 = vmatprep.mubr.bf16.mxu1 %v10794_v53 }
 0x125   : > { %3032 = vmatprep.mubr.bf16.mxu0 %v10794_v53 }
 0x16a   : > { %v673_v58 = vpop.f32.mrb[0].mxu1 }
 0x16b   : > { %v632_v36 = vpop.f32.mrb[0].mxu0  ;;  %v675_v49 = vpop.f32.mrb[1].mxu1 }
 0x16c   : > { %v634_v37 = vpop.f32.mrb[1].mxu0  ;;  %v677_v3 = vpop.f32.mrb[2].mxu1 }
 0x16d   : > { %v636_v39 = vpop.f32.mrb[2].mxu0  ;;  %v678_v32 = vpop.f32.mrb[3].mxu1 }
 0x16e   : > { %v637_v2 = vpop.f32.mrb[3].mxu0 }
 0x172   : > { %v755_v23 = vpop.f32.mrb[4].mxu1 }
 0x173   : > { %v714_v50 = vpop.f32.mrb[4].mxu0  ;;  %v757_v31 = vpop.f32.mrb[5].mxu1 }
 0x174   : > { %v716_v26 = vpop.f32.mrb[5].mxu0  ;;  %v759_v19 = vpop.f32.mrb[6].mxu1 }
 0x175   : > { %v718_v56 = vpop.f32.mrb[6].mxu0  ;;  %v760_v5 = vpop.f32.mrb[7].mxu1 }
 0x176   : > { %v719_v16 = vpop.f32.mrb[7].mxu0 }
 0x17b   : > { %v823_v7 = vpop.f32.mrb[8].mxu0  ;;  %v864_v0 = vpop.f32.mrb[8].mxu1 }
 0x17c   : > { %v824_v24 = vadd.f32 %v823_v7, %v632_v36  ;;  %v865_v1 = vadd.f32 %v864_v0, %v673_v58  ;;  %v825_v8 = vpop.f32.mrb[9].mxu0  ;;  %v866_v3 = vpop.f32.mrb[9].mxu1 }
 0x17d   : > { %v826_v39 = vadd.f32 %v825_v8, %v634_v37  ;;  %v867_v32 = vadd.f32 %v866_v3, %v675_v49  ;;  %v827_v2 = vpop.f32.mrb[10].mxu0  ;;  %v868_v19 = vpop.f32.mrb[10].mxu1 }
 0x17e   : > { %v828_v56 = vpop.f32.mrb[11].mxu0  ;;  %v869_v5 = vpop.f32.mrb[11].mxu1 }
 0x183   : > { %v905_v16 = vpop.f32.mrb[12].mxu0  ;;  %v946_v6 = vpop.f32.mrb[12].mxu1 }
 0x184   : > { %v906_v34 = vadd.f32 %v905_v16, %v714_v50  ;;  %v947_v15 = vadd.f32 %v946_v6, %v755_v23  ;;  %v907_v17 = vpop.f32.mrb[13].mxu0  ;;  %v948_v4 = vpop.f32.mrb[13].mxu1 }
 0x185   : > { %v908_v42 = vadd.f32 %v907_v17, %v716_v26  ;;  %v949_v52 = vadd.f32 %v948_v4, %v757_v31  ;;  %v909_v40 = vpop.f32.mrb[14].mxu0  ;;  %v950_v59 = vpop.f32.mrb[14].mxu1 }
 0x186   : > { %v910_v36 = vpop.f32.mrb[15].mxu0  ;;  %v951_v58 = vpop.f32.mrb[15].mxu1 }
 0x18b   : > { %v1089_v7 = vpop.f32.mrb[16].mxu0  ;;  %v1130_v0 = vpop.f32.mrb[16].mxu1 }
 0x18c   : > { %v1219_v37 = vadd.f32 %v1089_v7, %v824_v24  ;;  %v1221_v49 = vadd.f32 %v1130_v0, %v865_v1  ;;  %v1091_v8 = vpop.f32.mrb[17].mxu0  ;;  %v1132_v3 = vpop.f32.mrb[17].mxu1 }
 0x18d   : > { %v1220_v2 = vadd.f32 %v1091_v8, %v826_v39  ;;  %v1222_v19 = vadd.f32 %v1132_v3, %v867_v32  ;;  %v1093_v56 = vpop.f32.mrb[18].mxu0  ;;  %v1134_v5 = vpop.f32.mrb[18].mxu1 }
 0x18e   : > { %v1094_v50 = vpop.f32.mrb[19].mxu0  ;;  %v1135_v6 = vpop.f32.mrb[19].mxu1 }
 0x193   : > { %v1171_v23 = vpop.f32.mrb[20].mxu0  ;;  %v1212_v16 = vpop.f32.mrb[20].mxu1 }
 0x194   : > { %v1223_v17 = vadd.f32 %v1171_v23, %v906_v34  ;;  %v1225_v4 = vadd.f32 %v1212_v16, %v947_v15  ;;  %v1173_v40 = vpop.f32.mrb[21].mxu0  ;;  %v1214_v59 = vpop.f32.mrb[21].mxu1 }
 0x195   : > { %v1224_v31 = vadd.f32 %v1173_v40, %v908_v42  ;;  %v1226_v26 = vadd.f32 %v1214_v59, %v949_v52  ;;  %v1175_v36 = vpop.f32.mrb[22].mxu0  ;;  %v1216_v58 = vpop.f32.mrb[22].mxu1 }
 0x196   : > { %v1176_v24 = vpop.f32.mrb[23].mxu0  ;;  %v1217_v1 = vpop.f32.mrb[23].mxu1 }
 0x19e   : > { %v1404_v7 = vpop.f32.mrb[24].mxu1 }
 0x19f   : > { %v1495_v0 = vadd.f32 %v1404_v7, %v1221_v49  ;;  %v1363_v39 = vpop.f32.mrb[24].mxu0  ;;  %v1406_v32 = vpop.f32.mrb[25].mxu1 }
 0x1a0   : > { %v1493_v8 = vadd.f32 %v1363_v39, %v1219_v37  ;;  %v1496_v3 = vadd.f32 %v1406_v32, %v1222_v19  ;;  %v1365_v56 = vpop.f32.mrb[25].mxu0  ;;  %v1408_v5 = vpop.f32.mrb[26].mxu1 }
 0x1a1   : > { %v1494_v50 = vadd.f32 %v1365_v56, %v1220_v2  ;;  %v1367_v6 = vpop.f32.mrb[26].mxu0  ;;  %v1409_v34 = vpop.f32.mrb[27].mxu1 }
 0x1a2   : > { %v1368_v15 = vpop.f32.mrb[27].mxu0 }
 0x1a6   : > { %v1486_v23 = vpop.f32.mrb[28].mxu1 }
 0x1a7   : > { %v1499_v16 = vadd.f32 %v1486_v23, %v1225_v4  ;;  %v1445_v42 = vpop.f32.mrb[28].mxu0  ;;  %v1488_v52 = vpop.f32.mrb[29].mxu1 }
 0x1a8   : > { %v1497_v40 = vadd.f32 %v1445_v42, %v1223_v17  ;;  %v1500_v59 = vadd.f32 %v1488_v52, %v1226_v26  ;;  %v1447_v36 = vpop.f32.mrb[29].mxu0  ;;  %v1490_v58 = vpop.f32.mrb[30].mxu1 }
 0x1a9   : > { %v1498_v24 = vadd.f32 %v1447_v36, %v1224_v31  ;;  %v1449_v49 = vpop.f32.mrb[30].mxu0  ;;  %v1491_v1 = vpop.f32.mrb[31].mxu1 }
 0x1aa   : > { %v1450_v7 = vpop.f32.mrb[31].mxu0 }
 0x1ae   : > { %v1613_v37 = vpop.f32.mrb[32].mxu1 }
 0x1af   : > { %v1704_v19 = vadd.f32 %v1613_v37, %v1495_v0  ;;  %v1572_v39 = vpop.f32.mrb[32].mxu0  ;;  %v1615_v32 = vpop.f32.mrb[33].mxu1 }
 0x1b0   : > { %v1702_v2 = vadd.f32 %v1572_v39, %v1493_v8  ;;  %v1705_v56 = vadd.f32 %v1615_v32, %v1496_v3  ;;  %v1574_v5 = vpop.f32.mrb[33].mxu0  ;;  %v1617_v6 = vpop.f32.mrb[34].mxu1 }
 0x1b1   : > { %v1703_v34 = vadd.f32 %v1574_v5, %v1494_v50  ;;  %v1576_v4 = vpop.f32.mrb[34].mxu0  ;;  %v1618_v15 = vpop.f32.mrb[35].mxu1 }
 0x1b2   : > { %v1577_v23 = vpop.f32.mrb[35].mxu0 }
 0x1b6   : > { %v1695_v17 = vpop.f32.mrb[36].mxu1 }
 0x1b7   : > { %v1708_v26 = vadd.f32 %v1695_v17, %v1499_v16  ;;  %v1654_v42 = vpop.f32.mrb[36].mxu0  ;;  %v1697_v52 = vpop.f32.mrb[37].mxu1 }
 0x1b8   : > { %v1706_v31 = vadd.f32 %v1654_v42, %v1497_v40  ;;  %v1709_v36 = vadd.f32 %v1697_v52, %v1500_v59  ;;  %v1656_v58 = vpop.f32.mrb[37].mxu0  ;;  %v1699_v49 = vpop.f32.mrb[38].mxu1 }
 0x1b9   : > { %v1707_v1 = vadd.f32 %v1656_v58, %v1498_v24  ;;  %v1658_v0 = vpop.f32.mrb[38].mxu0  ;;  %v1700_v7 = vpop.f32.mrb[39].mxu1 }
 0x1ba   : > { %v1659_v37 = vpop.f32.mrb[39].mxu0 }
 0x1be   : > { %v1887_v8 = vpop.f32.mrb[40].mxu1 }
 0x1bf   : > { %v1978_v3 = vadd.f32 %v1887_v8, %v1704_v19  ;;  %v1846_v39 = vpop.f32.mrb[40].mxu0  ;;  %v1889_v32 = vpop.f32.mrb[41].mxu1 }
 0x1c0   : > { %v1976_v50 = vadd.f32 %v1846_v39, %v1702_v2  ;;  %v1979_v5 = vadd.f32 %v1889_v32, %v1705_v56  ;;  %v1848_v6 = vpop.f32.mrb[41].mxu0  ;;  %v1891_v4 = vpop.f32.mrb[42].mxu1 }
 0x1c1   : > { %v1977_v15 = vadd.f32 %v1848_v6, %v1703_v34  ;;  %v1850_v16 = vpop.f32.mrb[42].mxu0  ;;  %v1892_v23 = vpop.f32.mrb[43].mxu1 }
 0x1c2   : > { %v1851_v17 = vpop.f32.mrb[43].mxu0 }
 0x1c6   : > { %v1969_v40 = vpop.f32.mrb[44].mxu1 }
 0x1c7   : > { %v1982_v59 = vadd.f32 %v1969_v40, %v1708_v26  ;;  %v1928_v42 = vpop.f32.mrb[44].mxu0  ;;  %v1971_v52 = vpop.f32.mrb[45].mxu1 }
 0x1c8   : > { %v1980_v24 = vadd.f32 %v1928_v42, %v1706_v31  ;;  %v1983_v58 = vadd.f32 %v1971_v52, %v1709_v36  ;;  %v1930_v49 = vpop.f32.mrb[45].mxu0  ;;  %v1973_v0 = vpop.f32.mrb[46].mxu1 }
 0x1c9   : > { %v1981_v7 = vadd.f32 %v1930_v49, %v1707_v1  ;;  %v1932_v19 = vpop.f32.mrb[46].mxu0  ;;  %v1974_v37 = vpop.f32.mrb[47].mxu1 }
 0x1ca   : > { %v1933_v8 = vpop.f32.mrb[47].mxu0 }
 0x1ce   : > { %v2161_v2 = vpop.f32.mrb[48].mxu1 }
 0x1cf   : > { %v2252_v56 = vadd.f32 %v2161_v2, %v1978_v3  ;;  %v2120_v39 = vpop.f32.mrb[48].mxu0  ;;  %v2163_v32 = vpop.f32.mrb[49].mxu1 }
 0x1d0   : > { %v2250_v34 = vadd.f32 %v2120_v39, %v1976_v50  ;;  %v2253_v6 = vadd.f32 %v2163_v32, %v1979_v5  ;;  %v2122_v4 = vpop.f32.mrb[49].mxu0  ;;  %v2165_v16 = vpop.f32.mrb[50].mxu1 }
 0x1d1   : > { %v2251_v23 = vadd.f32 %v2122_v4, %v1977_v15  ;;  %v2124_v26 = vpop.f32.mrb[50].mxu0  ;;  %v2166_v17 = vpop.f32.mrb[51].mxu1 }
 0x1d2   : > { %v2125_v40 = vpop.f32.mrb[51].mxu0 }
 0x1d6   : > { %v2243_v31 = vpop.f32.mrb[52].mxu1 }
 0x1d7   : > { %v2256_v36 = vadd.f32 %v2243_v31, %v1982_v59  ;;  %v2202_v42 = vpop.f32.mrb[52].mxu0  ;;  %v2245_v52 = vpop.f32.mrb[53].mxu1 }
 0x1d8   : > { %v2254_v1 = vadd.f32 %v2202_v42, %v1980_v24  ;;  %v2257_v49 = vadd.f32 %v2245_v52, %v1983_v58  ;;  %v2204_v0 = vpop.f32.mrb[53].mxu0  ;;  %v2247_v19 = vpop.f32.mrb[54].mxu1 }
 0x1d9   : > { %v2255_v37 = vadd.f32 %v2204_v0, %v1981_v7  ;;  %v2206_v3 = vpop.f32.mrb[54].mxu0  ;;  %v2248_v8 = vpop.f32.mrb[55].mxu1 }
 0x1da   : > { %v2207_v2 = vpop.f32.mrb[55].mxu0 }
 0x1de   : > { %v2435_v50 = vpop.f32.mrb[56].mxu1 }
 0x1df   : > { %v2526_v5 = vadd.f32 %v2435_v50, %v2252_v56  ;;  %v2394_v39 = vpop.f32.mrb[56].mxu0  ;;  %v2437_v32 = vpop.f32.mrb[57].mxu1 }
 0x1e0   : > { %v2524_v15 = vadd.f32 %v2394_v39, %v2250_v34  ;;  %v2527_v4 = vadd.f32 %v2437_v32, %v2253_v6  ;;  %v2396_v16 = vpop.f32.mrb[57].mxu0  ;;  %v2439_v26 = vpop.f32.mrb[58].mxu1 }
 0x1e1   : > { %v2525_v17 = vadd.f32 %v2396_v16, %v2251_v23  ;;  %v2398_v59 = vpop.f32.mrb[58].mxu0  ;;  %v2440_v40 = vpop.f32.mrb[59].mxu1 }
 0x1e2   : > { %v2399_v31 = vpop.f32.mrb[59].mxu0  ;;  %v2824_v34 = vpop.permute.xlu1 %2823 }
 0x1e3   : > { %v2810_v39 = vpop.permute.xlu0 %2809 }
 0x1e6   : > { %v2517_v24 = vpop.f32.mrb[60].mxu1 }
 0x1e7   : > { %v2530_v58 = vadd.f32 %v2517_v24, %v2256_v36  ;;  %v2476_v42 = vpop.f32.mrb[60].mxu0  ;;  %v2519_v52 = vpop.f32.mrb[61].mxu1 }
 0x1e8   : > { %v2528_v7 = vadd.f32 %v2476_v42, %v2254_v1  ;;  %v2531_v0 = vadd.f32 %v2519_v52, %v2257_v49  ;;  %v2478_v19 = vpop.f32.mrb[61].mxu0  ;;  %v2521_v3 = vpop.f32.mrb[62].mxu1 }
 0x1e9   : > { %v2529_v8 = vadd.f32 %v2478_v19, %v2255_v37  ;;  %v2480_v56 = vpop.f32.mrb[62].mxu0  ;;  %v2522_v2 = vpop.f32.mrb[63].mxu1 }
 0x1ea   : > { %v2481_v50 = vpop.f32.mrb[63].mxu0  ;;  %v2838_v56 = vpop.permute.xlu1 %2837 }
 0x1ee   : > { %v2709_v6 = vpop.f32.mrb[64].mxu1 }
 0x1ef   : > { %v2800_v32 = vadd.f32 %v2709_v6, %v2526_v5  ;;  %v2668_v23 = vpop.f32.mrb[64].mxu0  ;;  %v2711_v16 = vpop.f32.mrb[65].mxu1 }
 0x1f0   : > { %v2798_v26 = vadd.f32 %v2668_v23, %v2524_v15  ;;  %v2801_v59 = vadd.f32 %v2711_v16, %v2527_v4  ;;  %v2670_v40 = vpop.f32.mrb[65].mxu0  ;;  %v2713_v36 = vpop.f32.mrb[66].mxu1 }
 0x1f1   : > { %v2814_v31 = vadd.f32 %v2810_v39, %v2800_v32  ;;  %v2799_v24 = vadd.f32 %v2670_v40, %v2525_v17  ;;  %v2672_v1 = vpop.f32.mrb[66].mxu0  ;;  %v2714_v49 = vpop.f32.mrb[67].mxu1 }
 0x1f2   : > { %v2812_v42 = vadd.f32 %v2810_v39, %v2798_v26  ;;  %v2815_v52 = vadd.f32 %v2810_v39, %v2801_v59  ;;  %v2673_v37 = vpop.f32.mrb[67].mxu0  ;;  %v2860_v4 = vpop.permute.xlu0 %2859 }
 0x1f3   : > { %v2828_v19 = vmul.f32 %v2824_v34, %v2814_v31  ;;  %v2813_v3 = vadd.f32 %v2810_v39, %v2799_v24 }
 0x1f4   : > { %v2826_v2 = vmul.f32 %v2824_v34, %v2812_v42  ;;  %v2829_v50 = vmul.f32 %v2824_v34, %v2815_v52 }
 0x1f5   : > { %v2827_v14 = vmul.f32 %v2824_v34, %v2813_v3  ;;  %v9411_v5 = vadd.f32 %v2838_v56, %v2828_v19 }
 0x1f6   : > { %v9413_v6 = vadd.f32 %v2838_v56, %v2826_v2  ;;  %v9415_v15 = vadd.f32 %v2838_v56, %v2829_v50  ;;  %v2791_v32 = vpop.f32.mrb[68].mxu1 }
 0x1f7   : > { %v9417_v17 = vadd.f32 %v2838_v56, %v2827_v14  ;;  %v10767_v23 = vmax.f32 %v9411_v5, 0.0  ;;  %v2804_v16 = vadd.f32 %v2791_v32, %v2530_v58  ;;  %v2750_v26 = vpop.f32.mrb[68].mxu0  ;;  %v2793_v59 = vpop.f32.mrb[69].mxu1 }
 0x1f8   : > { %v10761_v40 = vmax.f32 %v9413_v6, 0.0  ;;  %v2802_v31 = vadd.f32 %v2750_v26, %v2528_v7  ;;  %v2805_v24 = vadd.f32 %v2793_v59, %v2531_v0  ;;  %v2752_v1 = vpop.f32.mrb[69].mxu0  ;;  %v2795_v49 = vpop.f32.mrb[70].mxu1 }
 0x1f9   : > { %v10765_v42 = vmax.f32 %v9417_v17, 0.0  ;;  %v2864_v52 = vmul.f32 %v2860_v4, %v10767_v23  ;;  %v2818_v14 = vadd.f32 %v2810_v39, %v2804_v16  ;;  %v2803_v37 = vadd.f32 %v2752_v1, %v2529_v8  ;;  %v2754_v19 = vpop.f32.mrb[70].mxu0  ;;  %v2796_v3 = vpop.f32.mrb[71].mxu1 }
 0x1fa   : > { %v2874_v58 = vpop.permute.xlu1 %2873  ;;  %v2862_v2 = vmul.f32 %v2860_v4, %v10761_v40  ;;  %v2816_v50 = vadd.f32 %v2810_v39, %v2802_v31  ;;  %v2819_v32 = vadd.f32 %v2810_v39, %v2805_v24  ;;  %v2755_v36 = vpop.f32.mrb[71].mxu0  ;;  %v10818_v49 = vmax.f32 %v9415_v15, 0.0 }
 0x1fb   : > { %v2863_v7 = vmul.f32 %v2860_v4, %v10765_v42  ;;  %v9429_v0 = vadd.f32 %v2874_v58, %v2864_v52  ;;  %v2832_v26 = vmul.f32 %v2824_v34, %v2818_v14  ;;  %v2817_v59 = vadd.f32 %v2810_v39, %v2803_v37 }
 0x1fc   : > { %v2865_v16 = vmul.f32 %v2860_v4, %v10818_v49  ;;  %v2830_v8 = vmul.f32 %v2824_v34, %v2816_v50  ;;  %v2833_v3 = vmul.f32 %v2824_v34, %v2819_v32  ;;  %v9439_v36 = vadd.f32 %v2874_v58, %v2862_v2 }
 0x1fd   : > { %v9433_v1 = vadd.f32 %v2874_v58, %v2863_v7  ;;  %v9435_v19 = vadd.f32 %v2838_v56, %v2832_v26  ;;  %v2831_v40 = vmul.f32 %v2824_v34, %v2817_v59  ;;  %2930 = vrot.lane.b32.xlu1 %v9429_v0, %s8463_s24 }
 0x1fe   : > { %v9442_v24 = vadd.f32 %v2838_v56, %v2830_v8  ;;  %v9448_v52 = vadd.f32 %v2874_v58, %v2865_v16  ;;  %v9452_v34 = vadd.f32 %v2838_v56, %v2833_v3 }
 0x1ff   : > { %v10766_v31 = vmax.f32 %v9435_v19, 0.0  ;;  %v9444_v39 = vadd.f32 %v2838_v56, %v2831_v40  ;;  %2928 = vrot.lane.b32.xlu0 %v9433_v1, %s8463_s24 }
 0x200   : > { %v10763_v40 = vmax.f32 %v9442_v24, 0.0  ;;  %v10764_v50 = vmax.f32 %v9452_v34, 0.0 }
 0x201   : > { %10819 = vst [vmem:[#allocation33_spill] sm:$0xff] %v9444_v39  ;;  %v2868_v14 = vmul.f32 %v2860_v4, %v10766_v31  ;;  %v10762_v37 = vmax.f32 %v9444_v39, 0.0  ;;  %2926 = vrot.lane.b32.xlu1 %v9439_v36, %s8463_s24 }
 0x202   : > { %v2866_v56 = vmul.f32 %v2860_v4, %v10763_v40  ;;  %v2869_v7 = vmul.f32 %v2860_v4, %v10764_v50 }
 0x203   : > { %v9457_v2 = vadd.f32 %v2874_v58, %v2868_v14  ;;  %2932 = vrot.lane.b32.xlu0 %v9448_v52, %s8463_s24  ;;  %v2867_v32 = vmul.f32 %v2860_v4, %v10762_v37  ;;  %v9577_v4 = vpop.permute.xlu1 %2971 }
 0x204   : > { %v9477_v59 = vadd.f32 %v2874_v58, %v2866_v56  ;;  %v9481_v49 = vadd.f32 %v2874_v58, %v2869_v7 }
 0x205   : > { %2938 = vrot.lane.b32.xlu1 %v9457_v2, %s8463_s24  ;;  %v9473_v26 = vadd.f32 %v2874_v58, %v2867_v32 }
 0x207   : > { %2888 = vrot.lane.b32.xlu0 %v9433_v1, %s8465_s27 }
 0x209   : > { %2890 = vrot.lane.b32.xlu1 %v9429_v0, %s8465_s27 }
 0x20b   : > { %2936 = vrot.lane.b32.xlu0 %v9473_v26, %s8463_s24 }
 0x20d   : > { %2934 = vrot.lane.b32.xlu1 %v9477_v59, %s8463_s24 }
 0x20f   : > { %2940 = vrot.lane.b32.xlu0 %v9481_v49, %s8463_s24 }
 0x211   : > { %2896 = vrot.lane.b32.xlu1 %v9473_v26, %s8465_s27 }
 0x213   : > { %2892 = vrot.lane.b32.xlu0 %v9448_v52, %s8465_s27 }
 0x215   : > { %2900 = vrot.lane.b32.xlu1 %v9481_v49, %s8465_s27 }
 0x217   : > { %2886 = vrot.lane.b32.xlu0 %v9439_v36, %s8465_s27 }
 0x219   : > { %3373 = vrot.lane.b32.xlu1 %v9433_v1, %s8467_s29 }
 0x21b   : > { %2898 = vrot.lane.b32.xlu0 %v9457_v2, %s8465_s27 }
 0x21d   : > { %3377 = vrot.lane.b32.xlu1 %v9448_v52, %s8467_s29 }
 0x21f   : > { %2894 = vrot.lane.b32.xlu0 %v9477_v59, %s8465_s27 }
 0x221   : > { %3381 = vrot.lane.b32.xlu1 %v9473_v26, %s8467_s29 }
 0x223   : > { %3375 = vrot.lane.b32.xlu0 %v9429_v0, %s8467_s29 }
 0x225   : > { %3385 = vrot.lane.b32.xlu1 %v9481_v49, %s8467_s29 }
 0x227   : > { %3371 = vrot.lane.b32.xlu0 %v9439_v36, %s8467_s29 }
 0x229   : > { %3379 = vrot.lane.b32.xlu1 %v9477_v59, %s8467_s29 }
 0x22b   : > { %3383 = vrot.lane.b32.xlu0 %v9457_v2, %s8467_s29 }
 0x22d   : > { %3632 = vrot.lane.b32.xlu1 %v9429_v0, %s8469_s12 }
 0x22f   : > { %3411 = vrot.lane.b32.xlu0 %v9407_v12, %s8468_s30 }
 0x231   : > { %3628 = vrot.lane.b32.xlu1 %v9439_v36, %s8469_s12 }
 0x233   : > { %3630 = vrot.lane.b32.xlu0 %v9433_v1, %s8469_s12 }
 0x235   : > { %3640 = vrot.lane.b32.xlu1 %v9457_v2, %s8469_s12 }
 0x237   : > { %3634 = vrot.lane.b32.xlu0 %v9448_v52, %s8469_s12 }
 0x239   : > { %3668 = vrot.lane.b32.xlu1 %v9407_v12, %s8471_s14 }
 0x23b   : > { %3638 = vrot.lane.b32.xlu0 %v9473_v26, %s8469_s12 }
 0x23d   : > { %3893 = vrot.lane.b32.xlu1 %v9407_v12, %s10774_s13 }
 0x23f   : > { %3642 = vrot.lane.b32.xlu0 %v9481_v49, %s8469_s12 }
 0x241   : > { %4116 = vrot.lane.b32.xlu1 %v9448_v52, %s10776_s15 }
 0x243   : > { %3636 = vrot.lane.b32.xlu0 %v9477_v59, %s8469_s12 }
 0x245   : > { %4110 = vrot.lane.b32.xlu1 %v9439_v36, %s10776_s15 }
 0x247   : > { %4114 = vrot.lane.b32.xlu0 %v9429_v0, %s10776_s15 }
 0x249   : > { %4122 = vrot.lane.b32.xlu1 %v9457_v2, %s10776_s15 }
 0x24b   : > { %4118 = vrot.lane.b32.xlu0 %v9477_v59, %s10776_s15 }
 0x24d   : > { %4150 = vrot.lane.b32.xlu1 %v9407_v12, %s10820_s20 }
 0x24f   : > { %4112 = vrot.lane.b32.xlu0 %v9433_v1, %s10776_s15 }
 0x251   : > { %4371 = vrot.lane.b32.xlu1 %v9429_v0, %s10821_s23 }
 0x253   : > { %4373 = vrot.lane.b32.xlu0 %v9448_v52, %s10821_s23 }
 0x255   : > { %4375 = vrot.lane.b32.xlu1 %v9477_v59, %s10821_s23 }
 0x257   : > { %4124 = vrot.lane.b32.xlu0 %v9481_v49, %s10776_s15 }
 0x259   : > { %4369 = vrot.lane.b32.xlu1 %v9433_v1, %s10821_s23 }
 0x25b   : > { %4367 = vrot.lane.b32.xlu0 %v9439_v36, %s10821_s23 }
 0x25d   : > { %4630 = vrot.lane.b32.xlu1 %v9448_v52, %s10774_s13 }
 0x25f   : > { %4120 = vrot.lane.b32.xlu0 %v9473_v26, %s10776_s15 }
 0x261   : > { %4381 = vrot.lane.b32.xlu1 %v9481_v49, %s10821_s23 }
 0x263   : > { %4379 = vrot.lane.b32.xlu0 %v9457_v2, %s10821_s23 }
 0x265   : > { %4624 = vrot.lane.b32.xlu1 %v9439_v36, %s10774_s13 }
 0x267   : > { %4407 = vrot.lane.b32.xlu0 %v9407_v12, %s10822_s21 }
 0x269   : > { %4377 = vrot.lane.b32.xlu1 %v9473_v26, %s10821_s23 }
 0x26b   : > { %4628 = vrot.lane.b32.xlu0 %v9429_v0, %s10774_s13 }
 0x26d   : > { %4636 = vrot.lane.b32.xlu1 %v9457_v2, %s10774_s13 }
 0x26f   : > { %v2931_v58 = vpop.permute.xlu1 %2930  ;;  %4632 = vrot.lane.b32.xlu0 %v9477_v59, %s10774_s13 }
 0x271   : > { %v2929_v16 = vpop.permute.xlu0 %2928  ;;  %4664 = vrot.lane.b32.xlu1 %v9407_v12, %s10823_s22 }
 0x272   : > { %v2947_v8 = vsel %vm507_vm0, %v2929_v16, %v2931_v58 }
 0x273   : > { %v2952_v3 = vmul.f32 %v2947_v8, %v8732_v22  ;;  %v2927_v14 = vpop.permute.xlu1 %2926  ;;  %4626 = vrot.lane.b32.xlu0 %v9433_v1, %s10774_s13 }
 0x274   : > { %v2948_v32 = vsel %vm507_vm0, %v2927_v14, %v2929_v16 }
 0x275   : > { %v2951_v56 = vmul.f32 %v2948_v32, %v8729_v21  ;;  %v2933_v7 = vpop.permute.xlu0 %2932  ;;  %4885 = vrot.lane.b32.xlu1 %v9429_v0, %s10824_s25  ;;  %v2960_v40 = vpack.c.bf16 %v2952_v3, %v2952_v3 }
 0x276   : > { %v2946_v37 = vsel %vm507_vm0, %v2931_v58, %v2933_v7 }
 0x277   : > { %v2959_v50 = vpack.c.bf16 %v2951_v56, %v2951_v56  ;;  %v2953_v8 = vmul.f32 %v2946_v37, %v8726_v20  ;;  %v2939_v42 = vpop.permute.xlu1 %2938  ;;  %4638 = vrot.lane.b32.xlu0 %v9481_v49, %s10774_s13  ;;  %v2983_v58 = vsel %vm573_vm1, %v2960_v40, 0 }
 0x279   : > { %v2961_v31 = vpack.c.bf16 %v2953_v8, %v2953_v8  ;;  %7993 = vmatprep.subr.msk.bf16.mxu0 %vm573_vm1, %v2959_v50  ;;  %v2889_v16 = vpop.permute.xlu0 %2888  ;;  %4889 = vrot.lane.b32.xlu1 %v9477_v59, %s10824_s25 }
 0x27b   : > { %v2891_v32 = vpop.permute.xlu1 %2890  ;;  %7995 = vmatprep.subr.msk.bf16.mxu1 %vm573_vm1, %v2961_v31  ;;  %4887 = vrot.lane.b32.xlu0 %v9448_v52, %s10824_s25 }
 0x27c   : > { %3044 = vmatpush1.bf16.msra.mxu1 %v2983_v58  ;;  %v2907_v40 = vsel %vm434_vm3, %v2889_v16, %v2891_v32 }
 0x27d   : > { %4883 = vrot.lane.b32.xlu1 %v9433_v1, %s10824_s25  ;;  %v2937_v37 = vpop.permute.xlu0 %2936 }
 0x27e   : > { %v2943_v50 = vsel %vm507_vm0, %v2937_v37, %v2939_v42 }
 0x27f   : > { %v2956_v3 = vmul.f32 %v2943_v50, %v8793_v48  ;;  %7996 = vmatmul.mubr.msk.bf16.vlgmr.msra.gmra.mrb[72].mxu1 %vm569_vm2, %v9577_v4  ;;  %v2935_v56 = vpop.permute.xlu1 %2934  ;;  %4634 = vrot.lane.b32.xlu0 %v9473_v26, %s10774_s13 }
 0x280   : > { %v2944_v31 = vsel %vm507_vm0, %v2935_v56, %v2937_v37  ;;  %3161 = vmatprep.mubr.bf16.mxu1 %v10794_v53  ;;  %v2945_v8 = vsel %vm507_vm0, %v2933_v7, %v2935_v56  ;;  %v2912_v7 = vmul.f32 %v2907_v40, %v8829_v27 }
 0x281   : > { %4895 = vrot.lane.b32.xlu1 %v9481_v49, %s10824_s25  ;;  %v2941_v58 = vpop.permute.xlu0 %2940  ;;  %v2964_v48 = vpack.c.bf16 %v2956_v3, %v2956_v3  ;;  %v2955_v37 = vmul.f32 %v2944_v31, %v8790_v47  ;;  %v2954_v56 = vmul.f32 %v2945_v8, %v8766_v35 }
 0x282   : > { %v2942_v50 = vsel %vm507_vm0, %v2939_v42, %v2941_v58  ;;  %v2949_v23 = vsel %vm507_vm0, %v2941_v58, %v2927_v14  ;;  %v2920_v40 = vpack.c.bf16 %v2912_v7, %v2912_v7 }
 0x283   : > { %v2950_v22 = vmul.f32 %v2949_v23, %v8751_v30  ;;  %v2957_v21 = vmul.f32 %v2942_v50, %v8783_v45  ;;  %v2897_v20 = vpop.permute.xlu1 %2896  ;;  %4881 = vrot.lane.b32.xlu0 %v9439_v36, %s10824_s25  ;;  %v8069_v23 = vld [vmem:[%s10688_s6 + $0x8] sm:$0xff]  ;;  %v2963_v31 = vpack.c.bf16 %v2955_v37, %v2955_v37  ;;  %v2962_v8 = vpack.c.bf16 %v2954_v56, %v2954_v56 }
 0x284   : > { %v3182_v7 = vsel %vm573_vm1, %v2920_v40, 0 }
 0x285   : > { %v2958_v39 = vpack.c.bf16 %v2950_v22, %v2950_v22  ;;  %v2965_v42 = vpack.c.bf16 %v2957_v21, %v2957_v21  ;;  %4891 = vrot.lane.b32.xlu1 %v9473_v26, %s10824_s25  ;;  %v2893_v14 = vpop.permute.xlu0 %2892  ;;  %v2995_v22 = vsel %vm573_vm1, %v2964_v48, 0 }
 0x286   : > { %v2906_v3 = vsel %vm434_vm3, %v2891_v32, %v2893_v14 }
 0x287   : > { %v2913_v58 = vmul.f32 %v2906_v3, %v8851_v41  ;;  %v2901_v50 = vpop.permute.xlu1 %2900  ;;  %4893 = vrot.lane.b32.xlu0 %v9457_v2, %s10824_s25  ;;  %7999 = vmatprep.subr.msk.bf16.mxu1 %vm573_vm1, %v2965_v42  ;;  %v2977_v21 = vsel %vm573_vm1, %v2958_v39, 0 }
 0x288   : > { %3001 = vmatpush1.bf16.msra.mxu0 %v2977_v21  ;;  %3130 = vmatpush1.bf16.msra.mxu1 %v2995_v22 }
 0x289   : > { %v2921_v32 = vpack.c.bf16 %v2913_v58, %v2913_v58  ;;  %5349 = vperm.xlu1 %8435, %v8069_v23   ;;  %7997 = vmatprep.subr.msk.bf16.mxu0 %vm573_vm1, %v2963_v31  ;;  %v2887_v37 = vpop.permute.xlu0 %2886 }
 0x28a   : > { %v2908_v3 = vsel %vm434_vm3, %v2887_v37, %v2889_v16  ;;  %v2909_v41 = vsel %vm434_vm3, %v2901_v50, %v2887_v37  ;;  %v2989_v16 = vsel %vm573_vm1, %v2962_v8, 0 }
 0x28b   : > { %v2910_v42 = vmul.f32 %v2909_v41, %v8842_v38  ;;  %v2911_v39 = vmul.f32 %v2908_v3, %v8825_v25  ;;  %v3374_v48 = vpop.permute.xlu1 %3373  ;;  %4921 = vrot.lane.b32.xlu0 %v9407_v12, %s10825_s18  ;;  %7994 = vmatmul.mubr.msk.bf16.vlgmr.msra.gmra.mrb[72].mxu0 %vm569_vm2, %v9577_v4  ;;  %v5163_v41 = vld [vmem:[%s10692_s10] sm:$0xff] }
 0x28c   : > { %8000 = vmatmul.mubr.msk.bf16.vlgmr.msra.gmra.mrb[76].mxu1 %vm569_vm2, %v9577_v4  ;;  %8003 = vmatprep.subr.msk.bf16.mxu1 %vm573_vm1, %v2921_v32 }
 0x28d   : > { %v2919_v56 = vpack.c.bf16 %v2911_v39, %v2911_v39  ;;  %3087 = vmatpush1.bf16.msra.mxu0 %v2989_v16  ;;  %3243 = vmatpush1.bf16.msra.mxu1 %v3182_v7  ;;  %v2899_v23 = vpop.permute.xlu0 %2898  ;;  %v2918_v21 = vpack.c.bf16 %v2910_v42, %v2910_v42 }
 0x28e   : > { %v2902_v31 = vsel %vm434_vm3, %v2899_v23, %v2901_v50  ;;  %v2903_v58 = vsel %vm434_vm3, %v2897_v20, %v2899_v23  ;;  %3118 = vmatprep.mubr.bf16.mxu0 %v10794_v53  ;;  %3274 = vmatprep.mubr.bf16.mxu1 %v10794_v53  ;;  %v8070_v50 = vld [vmem:[%s10689_s7 + $0x8] sm:$0xff] }
 0x28f   : > { %v2916_v22 = vmul.f32 %v2903_v58, %v8878_v60  ;;  %v2917_v40 = vmul.f32 %v2902_v31, %v8887_v63  ;;  %v3378_v8 = vpop.permute.xlu1 %3377  ;;  %5166 = vperm.xlu0 %8434, %v5163_v41   ;;  %8001 = vmatprep.subr.msk.bf16.mxu0 %vm573_vm1, %v2919_v56  ;;  %v3176_v56 = vsel %vm573_vm1, %v2918_v21, 0 }
 0x291   : > { %v2924_v32 = vpack.c.bf16 %v2916_v22, %v2916_v22  ;;  %v2925_v37 = vpack.c.bf16 %v2917_v40, %v2917_v40  ;;  %v2895_v3 = vpop.permute.xlu0 %2894 }
 0x292   : > { %v2904_v39 = vsel %vm434_vm3, %v2895_v3, %v2897_v20  ;;  %v2905_v42 = vsel %vm434_vm3, %v2893_v14, %v2895_v3 }
 0x293   : > { %v2914_v16 = vmul.f32 %v2905_v42, %v8856_v46  ;;  %v2915_v7 = vmul.f32 %v2904_v39, %v8865_v51  ;;  %v3382_v41 = vpop.permute.xlu1 %3381  ;;  %5364 = vperm.xlu0 %8434, %v8070_v50   ;;  %7998 = vmatmul.mubr.msk.bf16.vlgmr.msra.gmra.mrb[76].mxu0 %vm569_vm2, %v9577_v4  ;;  %v3194_v23 = vsel %vm573_vm1, %v2924_v32, 0 }
 0x294   : > { %3200 = vmatpush1.bf16.msra.mxu0 %v3176_v56  ;;  %8004 = vmatmul.mubr.msk.bf16.vlgmr.msra.gmra.mrb[72].mxu1 %vm569_vm2, %v9407_v12 }
 0x295   : > { %v2923_v20 = vpack.c.bf16 %v2915_v7, %v2915_v7  ;;  %8007 = vmatprep.subr.msk.bf16.mxu1 %vm573_vm1, %v2925_v37  ;;  %v3376_v14 = vpop.permute.xlu0 %3375  ;;  %3231 = vmatprep.mubr.bf16.mxu0 %v10794_v53  ;;  %v2922_v58 = vpack.c.bf16 %v2914_v16, %v2914_v16 }
 0x296   : > { %3329 = vmatpush1.bf16.msra.mxu1 %v3194_v23  ;;  %v3391_v31 = vsel %vm969_vm4, %v3376_v14, %v3378_v8  ;;  %v3392_v4 = vsel %vm969_vm4, %v3374_v48, %v3376_v14  ;;  %3360 = vmatprep.mubr.bf16.mxu1 %v10794_v53 }
 0x297   : > { %v3397_v21 = vmul.f32 %v3392_v4, %v8913_v43  ;;  %v3398_v22 = vmul.f32 %v3391_v31, %v8930_v61  ;;  %v3386_v40 = vpop.permute.xlu1 %3385  ;;  %8005 = vmatprep.subr.msk.bf16.mxu0 %vm573_vm1, %v2923_v20  ;;  %v3188_v56 = vsel %vm573_vm1, %v2922_v58, 0 }
 0x299   : > { %v3405_v50 = vpack.c.bf16 %v3397_v21, %v3397_v21  ;;  %v3406_v32 = vpack.c.bf16 %v3398_v22, %v3398_v22  ;;  %v3372_v37 = vpop.permute.xlu0 %3371 }
 0x29a   : > { %v3393_v3 = vsel %vm969_vm4, %v3372_v37, %v3374_v48  ;;  %v3394_v39 = vsel %vm969_vm4, %v3386_v40, %v3372_v37 }
 0x29b   : > { %v3395_v42 = vmul.f32 %v3394_v39, %v8923_v55  ;;  %v3396_v16 = vmul.f32 %v3393_v3, %v8903_v33  ;;  %v3380_v7 = vpop.permute.xlu1 %3379  ;;  %8002 = vmatmul.mubr.msk.bf16.vlgmr.msra.gmra.mrb[72].mxu0 %vm569_vm2, %v9407_v12  ;;  %8011 = vmatprep.subr.msk.bf16.mxu1 %vm573_vm1, %v3406_v32  ;;  %v3423_v23 = vsel %vm573_vm1, %v3405_v50, 0 }
 0x29c   : > { %v3389_v48 = vsel %vm969_vm4, %v3380_v7, %v3382_v41  ;;  %3286 = vmatpush1.bf16.msra.mxu0 %v3188_v56  ;;  %8008 = vmatmul.mubr.msk.bf16.vlgmr.msra.gmra.mrb[76].mxu1 %vm569_vm2, %v9407_v12 }
 0x29d   : > { %v3404_v20 = vpack.c.bf16 %v3396_v16, %v3396_v16  ;;  %3484 = vmatpush1.bf16.msra.mxu1 %v3423_v23  ;;  %v3384_v14 = vpop.permute.xlu0 %3383  ;;  %3317 = vmatprep.mubr.bf16.mxu0 %v10794_v53  ;;  %v3403_v58 = vpack.c.bf16 %v3395_v42, %v3395_v42  ;;  %v3400_v21 = vmul.f32 %v3389_v48, %v8940_v28 }
 0x29e   : > { %v3387_v31 = vsel %vm969_vm4, %v3384_v14, %v3386_v40  ;;  %v3388_v4 = vsel %vm969_vm4, %v3382_v41, %v3384_v14  ;;  %3515 = vmatprep.mubr.bf16.mxu1 %v10794_v53  ;;  %v3390_v40 = vsel %vm969_vm4, %v3378_v8, %v3380_v7 }
 0x29f   : > { %v3401_v22 = vmul.f32 %v3388_v4, %v8951_v44  ;;  %v3402_v50 = vmul.f32 %v3387_v31, %v8959_v9  ;;  %v3633_v32 = vpop.permute.xlu1 %3632  ;;  %8009 = vmatprep.subr.msk.bf16.mxu0 %vm573_vm1, %v3404_v20  ;;  %v3399_v39 = vmul.f32 %v3390_v40, %v8937_v57  ;;  %v3408_v16 = vpack.c.bf16 %v3400_v21, %v3400_v21 }
 0x2a0   : > { %v3417_v42 = vsel %vm573_vm1, %v3403_v58, 0 }
 0x2a1   : > { %v3409_v37 = vpack.c.bf16 %v3401_v22, %v3401_v22  ;;  %v3410_v3 = vpack.c.bf16 %v3402_v50, %v3402_v50  ;;  %v3412_v41 = vpop.permute.xlu0 %3411  ;;  %v10826_v50 = vld [vmem:[#allocation7_spill] sm:$0xff] }
 0x2a3   : > { %v3629_v56 = vpop.permute.xlu1 %3628  ;;  %8006 = vmatmul.mubr.msk.bf16.vlgmr.msra.gmra.mrb[76].mxu0 %vm569_vm2, %v9407_v12  ;;  %8015 = vmatprep.subr.msk.bf16.mxu1 %vm573_vm1, %v3410_v3  ;;  %v3435_v23 = vsel %vm573_vm1, %v3409_v37, 0  ;;  %v3407_v12 = vpack.c.bf16 %v3399_v39, %v3399_v39 }
 0x2a4   : > { %3441 = vmatpush1.bf16.msra.mxu0 %v3417_v42  ;;  %8012 = vmatmul.mubr.msk.bf16.vlgmr.msra.gmra.mrb[72].mxu1 %vm569_vm2, %v3412_v41 }
 0x2a5   : > { %8013 = vmatprep.subr.msk.bf16.mxu0 %vm573_vm1, %v3408_v16  ;;  %3570 = vmatpush1.bf16.msra.mxu1 %v3435_v23  ;;  %v3631_v8 = vpop.permute.xlu0 %3630  ;;  %v3429_v3 = vsel %vm573_vm1, %v3407_v12, 0 }
 0x2a6   : > { %v3649_v7 = vsel %vm1243_vm5, %v3631_v8, %v3633_v32  ;;  %v3650_v48 = vsel %vm1243_vm5, %v3629_v56, %v3631_v8  ;;  %3472 = vmatprep.mubr.bf16.mxu0 %v10794_v53  ;;  %3601 = vmatprep.mubr.bf16.mxu1 %v10794_v53 }
 0x2a7   : > { %v3653_v20 = vmul.f32 %v3650_v48, %v8978_v29  ;;  %v3654_v14 = vmul.f32 %v3649_v7, %v8989_v54  ;;  %v3641_v31 = vpop.permute.xlu1 %3640 }
 0x2a9   : > { %v3661_v4 = vpack.c.bf16 %v3653_v20, %v3653_v20  ;;  %v3635_v58 = vpop.permute.xlu0 %3634  ;;  %v3662_v22 = vpack.c.bf16 %v3654_v14, %v3654_v14  ;;  %v10827_v14 = vld [vmem:[#allocation9_spill] sm:$0xff] }
 0x2aa   : > { %v3648_v21 = vsel %vm1243_vm5, %v3633_v32, %v3635_v58 }
 0x2ab   : > { %v3655_v40 = vmul.f32 %v3648_v21, %v10826_v50  ;;  %v9750_v37 = vpop.permute.xlu1 %3668  ;;  %8010 = vmatmul.mubr.msk.bf16.vlgmr.msra.gmra.mrb[72].mxu0 %vm569_vm2, %v3412_v41  ;;  %v3680_v8 = vsel %vm573_vm1, %v3662_v22, 0 }
 0x2ac   : > { %3527 = vmatpush1.bf16.msra.mxu0 %v3429_v3  ;;  %8016 = vmatmul.mubr.msk.bf16.vlgmr.msra.gmra.mrb[76].mxu1 %vm569_vm2, %v3412_v41 }
 0x2ad   : > { %v3663_v39 = vpack.c.bf16 %v3655_v40, %v3655_v40  ;;  %8017 = vmatprep.subr.msk.bf16.mxu0 %vm573_vm1, %v3661_v4  ;;  %v3639_v16 = vpop.permute.xlu0 %3638  ;;  %3558 = vmatprep.mubr.bf16.mxu0 %v10794_v53 }
 0x2ae   : > { %v3645_v32 = vsel %vm1243_vm5, %v3639_v16, %v3641_v31  ;;  %3772 = vmatprep.mubr.bf16.mxu1 %v10794_v53 }
 0x2af   : > { %v3658_v42 = vmul.f32 %v3645_v32, %v9026_v10  ;;  %v9761_v23 = vpop.permute.xlu1 %3893  ;;  %8019 = vmatprep.subr.msk.bf16.mxu1 %vm573_vm1, %v3663_v39  ;;  %v3888_v32 = vpack.c.bf16 %v9448_v52, %v9448_v52 }
 0x2b0   : > { %3741 = vmatpush1.bf16.msra.mxu1 %v3680_v8 }
 0x2b1   : > { %v3643_v7 = vpop.permute.xlu0 %3642  ;;  %v3666_v20 = vpack.c.bf16 %v3658_v42, %v3658_v42 }
 0x2b2   : > { %v3644_v48 = vsel %vm1243_vm5, %v3641_v31, %v3643_v7  ;;  %v3651_v12 = vsel %vm1243_vm5, %v3643_v7, %v3629_v56 }
 0x2b3   : > { %v3652_v4 = vmul.f32 %v3651_v12, %v10827_v14  ;;  %v3659_v21 = vmul.f32 %v3644_v48, %v9016_v18  ;;  %v4117_v40 = vpop.permute.xlu1 %4116  ;;  %8014 = vmatmul.mubr.msk.bf16.vlgmr.msra.gmra.mrb[76].mxu0 %vm569_vm2, %v3412_v41  ;;  %v10828_v41 = vld [vmem:[#allocation8_spill] sm:$0xff]  ;;  %v3692_v12 = vsel %vm573_vm1, %v3666_v20, 0  ;;  %v3886_v20 = vpack.c.bf16 %v9433_v1, %v9433_v1 }
 0x2b4   : > { %8020 = vmatmul.mubr.msk.bf16.vlgmr.msra.gmra.mrb[72].mxu1 %vm569_vm2, %v9750_v37  ;;  %3729 = vmatprep.mubr.bf16.mxu0 %v10794_v53 }
 0x2b5   : > { %v3660_v22 = vpack.c.bf16 %v3652_v4, %v3652_v4  ;;  %v3667_v3 = vpack.c.bf16 %v3659_v21, %v3659_v21  ;;  %v3637_v39 = vpop.permute.xlu0 %3636  ;;  %3858 = vmatprep.mubr.bf16.mxu1 %v10794_v53 }
 0x2b6   : > { %v3646_v56 = vsel %vm1243_vm5, %v3637_v39, %v3639_v16  ;;  %v3647_v31 = vsel %vm1243_vm5, %v3635_v58, %v3637_v39  ;;  %v3887_v16 = vpack.c.bf16 %v9429_v0, %v9429_v0 }
 0x2b7   : > { %v3656_v42 = vmul.f32 %v3647_v31, %v10828_v41  ;;  %v3657_v8 = vmul.f32 %v3646_v56, %v9019_v62  ;;  %v4111_v7 = vpop.permute.xlu1 %4110  ;;  %8023 = vmatprep.subr.msk.bf16.mxu1 %vm573_vm1, %v3667_v3  ;;  %v3674_v48 = vsel %vm573_vm1, %v3660_v22, 0  ;;  %v3892_v3 = vpack.c.bf16 %v9481_v49, %v9481_v49 }
 0x2b8   : > { %3698 = vmatpush1.bf16.msra.mxu0 %v3674_v48  ;;  %3827 = vmatpush1.bf16.msra.mxu1 %v3692_v12  ;;  %v3905_v0 = vsel %vm573_vm1, %v3887_v16, 0  ;;  %v3885_v49 = vpack.c.bf16 %v9439_v36, %v9439_v36 }
 0x2b9   : > { %v3664_v58 = vpack.c.bf16 %v3656_v42, %v3656_v42  ;;  %v3665_v4 = vpack.c.bf16 %v3657_v8, %v3657_v8  ;;  %8027 = vmatprep.subr.msk.bf16.mxu1 %vm573_vm1, %v3888_v32  ;;  %v4115_v52 = vpop.permute.xlu0 %4114  ;;  %v3891_v32 = vpack.c.bf16 %v9457_v2, %v9457_v2 }
 0x2ba   : > { %v4130_v42 = vsel %vm1726_vm6, %v4115_v52, %v4117_v40  ;;  %v3899_v16 = vsel %vm573_vm1, %v3885_v49, 0 }
 0x2bb   : > { %v9790_v21 = vpop.permute.xlu1 %4122  ;;  %8018 = vmatmul.mubr.msk.bf16.vlgmr.msra.gmra.mrb[72].mxu0 %vm569_vm2, %v9750_v37  ;;  %8021 = vmatprep.subr.msk.bf16.mxu0 %vm573_vm1, %v3665_v4  ;;  %v3686_v22 = vsel %vm573_vm1, %v3664_v58, 0  ;;  %v3890_v58 = vpack.c.bf16 %v9473_v26, %v9473_v26  ;;  %v10829_v4 = vld [vmem:[#allocation11_spill] sm:$0xff]  ;;  %v3917_v2 = vsel %vm573_vm1, %v3891_v32, 0  ;;  %v10830_v26 = vld [vmem:[#allocation10_spill] sm:$0xff]  ;;  %v10831_v32 = vld [vmem:[#allocation12_spill] sm:$0xff] }
 0x2bc   : > { %8024 = vmatmul.mubr.msk.bf16.vlgmr.msra.gmra.mrb[76].mxu1 %vm569_vm2, %v9750_v37  ;;  %3784 = vmatpush1.bf16.msra.mxu0 %v3686_v22  ;;  %v4136_v22 = vmul.f32 %v4130_v42, %v10829_v4 }
 0x2bd   : > { %3966 = vmatpush1.bf16.msra.mxu1 %v3905_v0  ;;  %8025 = vmatprep.subr.msk.bf16.mxu0 %vm573_vm1, %v3886_v20  ;;  %v4119_v39 = vpop.permute.xlu0 %4118 }
 0x2be   : > { %8031 = vmatprep.subr.msk.bf16.mxu1 %vm573_vm1, %v3892_v3  ;;  %v4129_v56 = vsel %vm1726_vm6, %v4117_v40, %v4119_v39  ;;  %3815 = vmatprep.mubr.bf16.mxu0 %v10794_v53  ;;  %v4144_v0 = vpack.c.bf16 %v4136_v22, %v4136_v22 }
 0x2bf   : > { %v4137_v1 = vmul.f32 %v4129_v56, %v9078_v11  ;;  %v9809_v31 = vpop.permute.xlu1 %4150  ;;  %3997 = vmatprep.mubr.bf16.mxu1 %v10794_v53 }
 0x2c1   : > { %v4113_v8 = vpop.permute.xlu0 %4112  ;;  %v4145_v48 = vpack.c.bf16 %v4137_v1, %v4137_v1 }
 0x2c2   : > { %v4131_v36 = vsel %vm1726_vm6, %v4113_v8, %v4115_v52  ;;  %v3889_v52 = vpack.c.bf16 %v9477_v59, %v9477_v59  ;;  %v4132_v3 = vsel %vm1726_vm6, %v4111_v7, %v4113_v8  ;;  %v10833_v8 = vld [vmem:[#allocation15_spill] sm:$0xff] }
 0x2c3   : > { %v4372_v12 = vpop.permute.xlu1 %4371  ;;  %8022 = vmatmul.mubr.msk.bf16.vlgmr.msra.gmra.mrb[76].mxu0 %vm569_vm2, %v9750_v37  ;;  %v4135_v40 = vmul.f32 %v4131_v36, %v10830_v26  ;;  %v4134_v42 = vmul.f32 %v4132_v3, %v10831_v32 }
 0x2c4   : > { %3923 = vmatpush1.bf16.msra.mxu0 %v3899_v16  ;;  %8028 = vmatmul.mubr.msk.bf16.vlgmr.msra.gmra.mrb[72].mxu1 %vm569_vm2, %v9761_v23  ;;  %v10832_v16 = vld [vmem:[#allocation14_spill] sm:$0xff]  ;;  %v3911_v59 = vsel %vm573_vm1, %v3889_v52, 0 }
 0x2c5   : > { %4052 = vmatpush1.bf16.msra.mxu1 %v3917_v2  ;;  %8029 = vmatprep.subr.msk.bf16.mxu0 %vm573_vm1, %v3890_v58  ;;  %v4374_v37 = vpop.permute.xlu0 %4373  ;;  %v4162_v2 = vsel %vm573_vm1, %v4144_v0, 0  ;;  %v4142_v52 = vpack.c.bf16 %v4134_v42, %v4134_v42  ;;  %v10836_v42 = vld [vmem:[#allocation13_spill] sm:$0xff] }
 0x2c6   : > { %8035 = vmatprep.subr.msk.bf16.mxu1 %vm573_vm1, %v4145_v48  ;;  %3954 = vmatprep.mubr.bf16.mxu0 %v10794_v53  ;;  %v4143_v48 = vpack.c.bf16 %v4135_v40, %v4135_v40 }
 0x2c7   : > { %v9833_v20 = vpop.permute.xlu1 %4375  ;;  %4083 = vmatprep.mubr.bf16.mxu1 %v10794_v53 }
 0x2c9   : > { %v4125_v56 = vpop.permute.xlu0 %4124 }
 0x2ca   : > { %v4126_v1 = vsel %vm1726_vm6, %v9790_v21, %v4125_v56  ;;  %v4133_v49 = vsel %vm1726_vm6, %v4125_v56, %v4111_v7  ;;  %v4386_v7 = vsel %vm2000_vm7, %v4374_v37, %v9833_v20 }
 0x2cb   : > { %v4141_v58 = vmul.f32 %v4133_v49, %v10832_v16  ;;  %v4370_v36 = vpop.permute.xlu1 %4369  ;;  %8026 = vmatmul.mubr.msk.bf16.vlgmr.msra.gmra.mrb[72].mxu0 %vm569_vm2, %v9761_v23  ;;  %v4140_v22 = vmul.f32 %v4126_v1, %v10833_v8  ;;  %v10834_v1 = vld [vmem:[#allocation18_spill] sm:$0xff] }
 0x2cc   : > { %4009 = vmatpush1.bf16.msra.mxu0 %v3911_v59  ;;  %8032 = vmatmul.mubr.msk.bf16.vlgmr.msra.gmra.mrb[76].mxu1 %vm569_vm2, %v9761_v23  ;;  %v4394_v49 = vmul.f32 %v4386_v7, %v10834_v1  ;;  %v4387_v59 = vsel %vm2000_vm7, %v4372_v12, %v4374_v37  ;;  %v10837_v7 = vld [vmem:[#allocation19_spill] sm:$0xff]  ;;  %v4388_v1 = vsel %vm2000_vm7, %v4370_v36, %v4372_v12 }
 0x2cd   : > { %v4149_v40 = vpack.c.bf16 %v4141_v58, %v4141_v58  ;;  %4223 = vmatpush1.bf16.msra.mxu1 %v4162_v2  ;;  %8033 = vmatprep.subr.msk.bf16.mxu0 %vm573_vm1, %v4143_v48  ;;  %v4368_v3 = vpop.permute.xlu0 %4367  ;;  %v4148_v0 = vpack.c.bf16 %v4140_v22, %v4140_v22  ;;  %v10835_v2 = vld [vmem:[#allocation16_spill] sm:$0xff]  ;;  %v4156_v22 = vsel %vm573_vm1, %v4142_v52, 0  ;;  %v4393_v37 = vmul.f32 %v4387_v59, %v10837_v7  ;;  %v10838_v52 = vld [vmem:[#allocation17_spill] sm:$0xff] }
 0x2ce   : > { %4040 = vmatprep.mubr.bf16.mxu0 %v10794_v53  ;;  %4254 = vmatprep.mubr.bf16.mxu1 %v10794_v53  ;;  %v4392_v12 = vmul.f32 %v4388_v1, %v10838_v52  ;;  %v10840_v7 = vld [vmem:[#allocation20_spill] sm:$0xff] }
 0x2cf   : > { %v4631_v56 = vpop.permute.xlu1 %4630  ;;  %8039 = vmatprep.subr.msk.bf16.mxu1 %vm573_vm1, %v4149_v40  ;;  %v4402_v40 = vpack.c.bf16 %v4394_v49, %v4394_v49 }
 0x2d1   : > { %v4121_v8 = vpop.permute.xlu0 %4120 }
 0x2d2   : > { %v4127_v48 = vsel %vm1726_vm6, %v4121_v8, %v9790_v21  ;;  %v4128_v58 = vsel %vm1726_vm6, %v4119_v39, %v4121_v8  ;;  %v4174_v21 = vsel %vm573_vm1, %v4148_v0, 0  ;;  %v10839_v0 = vld [vmem:[#allocation22_spill] sm:$0xff] }
 0x2d3   : > { %v4138_v16 = vmul.f32 %v4128_v58, %v10835_v2  ;;  %v4139_v4 = vmul.f32 %v4127_v48, %v10836_v42  ;;  %v4382_v32 = vpop.permute.xlu1 %4381  ;;  %8030 = vmatmul.mubr.msk.bf16.vlgmr.msra.gmra.mrb[76].mxu0 %vm569_vm2, %v9761_v23  ;;  %v4401_v48 = vpack.c.bf16 %v4393_v37, %v4393_v37  ;;  %v10841_v37 = vld [vmem:[#allocation23_spill] sm:$0xff] }
 0x2d4   : > { %4180 = vmatpush1.bf16.msra.mxu0 %v4156_v22  ;;  %8036 = vmatmul.mubr.msk.bf16.vlgmr.msra.gmra.mrb[72].mxu1 %vm569_vm2, %v9809_v31  ;;  %v4390_v8 = vsel %vm2000_vm7, %v4382_v32, %v4368_v3 }
 0x2d5   : > { %v4147_v39 = vpack.c.bf16 %v4139_v4, %v4139_v4  ;;  %4309 = vmatpush1.bf16.msra.mxu1 %v4174_v21  ;;  %v4380_v23 = vpop.permute.xlu0 %4379  ;;  %4211 = vmatprep.mubr.bf16.mxu0 %v10794_v53  ;;  %v4146_v49 = vpack.c.bf16 %v4138_v16, %v4138_v16  ;;  %v4389_v4 = vsel %vm2000_vm7, %v4368_v3, %v4370_v36 }
 0x2d6   : > { %8043 = vmatprep.subr.msk.bf16.mxu1 %vm573_vm1, %v4402_v40  ;;  %4340 = vmatprep.mubr.bf16.mxu1 %v10794_v53  ;;  %v4398_v58 = vmul.f32 %v4390_v8, %v10839_v0  ;;  %v4383_v22 = vsel %vm2000_vm7, %v4380_v23, %v4382_v32  ;;  %v4400_v40 = vpack.c.bf16 %v4392_v12, %v4392_v12  ;;  %v4419_v32 = vsel %vm573_vm1, %v4401_v48, 0  ;;  %v10842_v12 = vld [vmem:[#allocation21_spill] sm:$0xff] }
 0x2d7   : > { %v4625_v59 = vpop.permute.xlu1 %4624  ;;  %8037 = vmatprep.subr.msk.bf16.mxu0 %vm573_vm1, %v4147_v39  ;;  %v4391_v42 = vmul.f32 %v4389_v4, %v10840_v7  ;;  %v4168_v16 = vsel %vm573_vm1, %v4146_v49, 0  ;;  %v4397_v39 = vmul.f32 %v4383_v22, %v10841_v37 }
 0x2d8   : > { %v4406_v1 = vpack.c.bf16 %v4398_v58, %v4398_v58 }
 0x2d9   : > { %v9892_v21 = vpop.permute.xlu0 %4407  ;;  %v4399_v8 = vpack.c.bf16 %v4391_v42, %v4391_v42 }
 0x2db   : > { %v4378_v2 = vpop.permute.xlu1 %4377  ;;  %8034 = vmatmul.mubr.msk.bf16.vlgmr.msra.gmra.mrb[72].mxu0 %vm569_vm2, %v9809_v31 }
 0x2dc   : > { %v4384_v36 = vsel %vm2000_vm7, %v4378_v2, %v4380_v23  ;;  %4266 = vmatpush1.bf16.msra.mxu0 %v4168_v16  ;;  %8040 = vmatmul.mubr.msk.bf16.vlgmr.msra.gmra.mrb[76].mxu1 %vm569_vm2, %v9809_v31  ;;  %v4405_v23 = vpack.c.bf16 %v4397_v39, %v4397_v39  ;;  %v4385_v58 = vsel %vm2000_vm7, %v9833_v20, %v4378_v2  ;;  %v10843_v16 = vld [vmem:[#allocation24_spill] sm:$0xff]  ;;  %v4413_v39 = vsel %vm573_vm1, %v4399_v8, 0  ;;  %v10845_v20 = vld [vmem:[#allocation26_spill] sm:$0xff]  ;;  %v10846_v8 = vld [vmem:[#allocation25_spill] sm:$0xff] }
 0x2dd   : > { %4480 = vmatpush1.bf16.msra.mxu1 %v4419_v32  ;;  %8041 = vmatprep.subr.msk.bf16.mxu0 %vm573_vm1, %v4400_v40  ;;  %v4629_v3 = vpop.permute.xlu0 %4628  ;;  %v4396_v49 = vmul.f32 %v4384_v36, %v10842_v12  ;;  %v10844_v32 = vld [vmem:[#allocation28_spill] sm:$0xff] }
 0x2de   : > { %8047 = vmatprep.subr.msk.bf16.mxu1 %vm573_vm1, %v4406_v1  ;;  %4297 = vmatprep.mubr.bf16.mxu0 %v10794_v53  ;;  %v4644_v48 = vsel %vm2274_vm8, %v4629_v3, %v4631_v56  ;;  %v4395_v1 = vmul.f32 %v4385_v58, %v10843_v16 }
 0x2df   : > { %v4637_v4 = vpop.permute.xlu1 %4636  ;;  %4511 = vmatprep.mubr.bf16.mxu1 %v10794_v53  ;;  %v4404_v42 = vpack.c.bf16 %v4396_v49, %v4396_v49  ;;  %v4650_v2 = vmul.f32 %v4644_v48, %v10845_v20 }
 0x2e1   : > { %v4633_v22 = vpop.permute.xlu0 %4632 }
 0x2e2   : > { %v4643_v40 = vsel %vm2274_vm8, %v4631_v56, %v4633_v22  ;;  %v4431_v56 = vsel %vm573_vm1, %v4405_v23, 0 }
 0x2e3   : > { %v4651_v36 = vmul.f32 %v4643_v40, %v10844_v32  ;;  %v9918_v12 = vpop.permute.xlu1 %4664  ;;  %8038 = vmatmul.mubr.msk.bf16.vlgmr.msra.gmra.mrb[76].mxu0 %vm569_vm2, %v9809_v31  ;;  %v4403_v31 = vpack.c.bf16 %v4395_v1, %v4395_v1  ;;  %v10847_v32 = vld [vmem:[#allocation27_spill] sm:$0xff]  ;;  %v10848_v1 = vld [vmem:[#allocation29_spill] sm:$0xff] }
 0x2e4   : > { %4437 = vmatpush1.bf16.msra.mxu0 %v4413_v39  ;;  %8044 = vmatmul.mubr.msk.bf16.vlgmr.msra.gmra.mrb[72].mxu1 %vm569_vm2, %v9892_v21  ;;  %v4658_v39 = vpack.c.bf16 %v4650_v2, %v4650_v2  ;;  %v10849_v2 = vld [vmem:[#allocation31_spill] sm:$0xff] }
 0x2e5   : > { %v4659_v37 = vpack.c.bf16 %v4651_v36, %v4651_v36  ;;  %4566 = vmatpush1.bf16.msra.mxu1 %v4431_v56  ;;  %8045 = vmatprep.subr.msk.bf16.mxu0 %vm573_vm1, %v4404_v42  ;;  %v4627_v49 = vpop.permute.xlu0 %4626 }
 0x2e6   : > { %v4645_v58 = vsel %vm2274_vm8, %v4627_v49, %v4629_v3  ;;  %4468 = vmatprep.mubr.bf16.mxu0 %v10794_v53  ;;  %4597 = vmatprep.mubr.bf16.mxu1 %v10794_v53  ;;  %v4646_v23 = vsel %vm2274_vm8, %v4625_v59, %v4627_v49 }
 0x2e7   : > { %v4649_v48 = vmul.f32 %v4645_v58, %v10846_v8  ;;  %v4886_v40 = vpop.permute.xlu1 %4885  ;;  %8051 = vmatprep.subr.msk.bf16.mxu1 %vm573_vm1, %v4659_v37  ;;  %v4648_v20 = vmul.f32 %v4646_v23, %v10847_v32  ;;  %v4425_v37 = vsel %vm573_vm1, %v4403_v31, 0  ;;  %v10851_v8 = vld [vmem:[#allocation30_spill] sm:$0xff] }
 0x2e9   : > { %v4657_v36 = vpack.c.bf16 %v4649_v48, %v4649_v48  ;;  %v4639_v42 = vpop.permute.xlu0 %4638  ;;  %v4676_v48 = vsel %vm573_vm1, %v4658_v39, 0  ;;  %v4656_v31 = vpack.c.bf16 %v4648_v20, %v4648_v20 }
 0x2ea   : > { %v4640_v56 = vsel %vm2274_vm8, %v4637_v4, %v4639_v42  ;;  %v4647_v3 = vsel %vm2274_vm8, %v4639_v42, %v4625_v59 }
 0x2eb   : > { %v4655_v16 = vmul.f32 %v4647_v3, %v10848_v1  ;;  %v9942_v58 = vpop.permute.xlu1 %4889  ;;  %8042 = vmatmul.mubr.msk.bf16.vlgmr.msra.gmra.mrb[72].mxu0 %vm569_vm2, %v9892_v21  ;;  %v4654_v49 = vmul.f32 %v4640_v56, %v10849_v2  ;;  %v8439_v56 = vld [vmem:[%s10683_s1 + $0x58] ss:$0 sm:$0xff]  ;;  %v10850_v1 = vld [vmem:[#allocation32_spill] sm:$0xff] }
 0x2ec   : > { %4523 = vmatpush1.bf16.msra.mxu0 %v4425_v37  ;;  %8048 = vmatmul.mubr.msk.bf16.vlgmr.msra.gmra.mrb[76].mxu1 %vm569_vm2, %v9892_v21 }
 0x2ed   : > { %v4663_v59 = vpack.c.bf16 %v4655_v16, %v4655_v16  ;;  %4737 = vmatpush1.bf16.msra.mxu1 %v4676_v48  ;;  %8049 = vmatprep.subr.msk.bf16.mxu0 %vm573_vm1, %v4657_v36  ;;  %v4888_v23 = vpop.permute.xlu0 %4887  ;;  %v4662_v16 = vpack.c.bf16 %v4654_v49, %v4654_v49  ;;  %v4670_v49 = vsel %vm573_vm1, %v4656_v31, 0 }
 0x2ee   : > { %v4900_v42 = vsel %vm2548_vm9, %v4888_v23, %v9942_v58  ;;  %4554 = vmatprep.mubr.bf16.mxu0 %v10794_v53  ;;  %4768 = vmatprep.mubr.bf16.mxu1 %v10794_v53  ;;  %v4901_v36 = vsel %vm2548_vm9, %v4886_v40, %v4888_v23 }
 0x2ef   : > { %v4908_v3 = vmul.f32 %v8439_v56, %v4900_v42  ;;  %v4884_v39 = vpop.permute.xlu1 %4883  ;;  %8055 = vmatprep.subr.msk.bf16.mxu1 %vm573_vm1, %v4663_v59  ;;  %v8440_v59 = vld [vmem:[%s10683_s1 + $0x50] ss:$0 sm:$0xff] }
 0x2f0   : > { %v4907_v23 = vmul.f32 %v8440_v59, %v4901_v36 }
 0x2f1   : > { %v4635_v37 = vpop.permute.xlu0 %4634  ;;  %v4916_v48 = vpack.c.bf16 %v4908_v3, %v4908_v3 }
 0x2f2   : > { %v4641_v2 = vsel %vm2274_vm8, %v4635_v37, %v4637_v4  ;;  %v4642_v20 = vsel %vm2274_vm8, %v4633_v22, %v4635_v37  ;;  %v4902_v4 = vsel %vm2548_vm9, %v4884_v39, %v4886_v40  ;;  %v4688_v22 = vsel %vm573_vm1, %v4662_v16, 0  ;;  %v8441_v40 = vld [vmem:[%s10683_s1 + $0x48] ss:$0 sm:$0xff] }
 0x2f3   : > { %v4652_v32 = vmul.f32 %v4642_v20, %v10850_v1  ;;  %v4653_v0 = vmul.f32 %v4641_v2, %v10851_v8  ;;  %8046 = vmatmul.mubr.msk.bf16.vlgmr.msra.gmra.mrb[76].mxu0 %vm569_vm2, %v9892_v21  ;;  %v4896_v42 = vpop.permute.xlu1 %4895  ;;  %v4906_v56 = vmul.f32 %v8441_v40, %v4902_v4  ;;  %v4915_v36 = vpack.c.bf16 %v4907_v23, %v4907_v23  ;;  %v8445_v40 = vld [vmem:[%s10683_s1 + $0x68] ss:$0 sm:$0xff] }
 0x2f4   : > { %4694 = vmatpush1.bf16.msra.mxu0 %v4670_v49  ;;  %8052 = vmatmul.mubr.msk.bf16.vlgmr.msra.gmra.mrb[72].mxu1 %vm569_vm2, %v9918_v12 }
 0x2f5   : > { %v4661_v2 = vpack.c.bf16 %v4653_v0, %v4653_v0  ;;  %4823 = vmatpush1.bf16.msra.mxu1 %v4688_v22  ;;  %v4882_v21 = vpop.permute.xlu0 %4881  ;;  %4725 = vmatprep.mubr.bf16.mxu0 %v10794_v53  ;;  %v4660_v3 = vpack.c.bf16 %v4652_v32, %v4652_v32  ;;  %v8442_v0 = vld [vmem:[%s10683_s1 + $0x78] ss:$0 sm:$0xff]  ;;  %v4914_v59 = vpack.c.bf16 %v4906_v56, %v4906_v56  ;;  %v8443_v32 = vld [vmem:[%s10683_s1 + $0x40] ss:$0 sm:$0xff] }
 0x2f6   : > { %8059 = vmatprep.subr.msk.bf16.mxu1 %vm573_vm1, %v4916_v48  ;;  %v4904_v31 = vsel %vm2548_vm9, %v4896_v42, %v4882_v21  ;;  %4854 = vmatprep.mubr.bf16.mxu1 %v10794_v53  ;;  %v4903_v37 = vsel %vm2548_vm9, %v4882_v21, %v4884_v39  ;;  %v4933_v21 = vsel %vm573_vm1, %v4915_v36, 0  ;;  %v8446_v36 = vld [vmem:[%s10683_s1 + $0x60] ss:$0 sm:$0xff] }
 0x2f7   : > { %v4912_v16 = vmul.f32 %v8442_v0, %v4904_v31  ;;  %8053 = vmatprep.subr.msk.bf16.mxu0 %vm573_vm1, %v4661_v2  ;;  %v4905_v4 = vmul.f32 %v8443_v32, %v4903_v37  ;;  %v4892_v22 = vpop.permute.xlu1 %4891  ;;  %v4682_v23 = vsel %vm573_vm1, %v4660_v3, 0  ;;  %v8444_v2 = vld [vmem:[%s10683_s1 + $0x70] ss:$0 sm:$0xff] }
 0x2f8   : > { %v4899_v3 = vsel %vm2548_vm9, %v9942_v58, %v4892_v22 }
 0x2f9   : > { %v4894_v48 = vpop.permute.xlu0 %4893  ;;  %v4920_v20 = vpack.c.bf16 %v4912_v16, %v4912_v16  ;;  %v4913_v31 = vpack.c.bf16 %v4905_v4, %v4905_v4  ;;  %v4909_v37 = vmul.f32 %v8446_v36, %v4899_v3 }
 0x2fa   : > { %v4897_v49 = vsel %vm2548_vm9, %v4894_v48, %v4896_v42  ;;  %v4898_v39 = vsel %vm2548_vm9, %v4892_v22, %v4894_v48 }
 0x2fb   : > { %8050 = vmatmul.mubr.msk.bf16.vlgmr.msra.gmra.mrb[72].mxu0 %vm569_vm2, %v9918_v12  ;;  %v4911_v42 = vmul.f32 %v8444_v2, %v4897_v49  ;;  %v4910_v56 = vmul.f32 %v8445_v40, %v4898_v39  ;;  %v4917_v58 = vpack.c.bf16 %v4909_v37, %v4909_v37 }
 0x2fc   : > { %4780 = vmatpush1.bf16.msra.mxu0 %v4682_v23  ;;  %8056 = vmatmul.mubr.msk.bf16.vlgmr.msra.gmra.mrb[76].mxu1 %vm569_vm2, %v9918_v12 }
 0x2fd   : > { %4994 = vmatpush1.bf16.msra.mxu1 %v4933_v21  ;;  %8057 = vmatprep.subr.msk.bf16.mxu0 %vm573_vm1, %v4914_v59  ;;  %v4919_v0 = vpack.c.bf16 %v4911_v42, %v4911_v42  ;;  %v4922_v16 = vpop.permute.xlu0 %4921  ;;  %v4918_v48 = vpack.c.bf16 %v4910_v56, %v4910_v56  ;;  %v4939_v59 = vsel %vm573_vm1, %v4917_v58, 0 }
 0x2fe   : > { %8063 = vmatprep.subr.msk.bf16.mxu1 %vm573_vm1, %v4920_v20  ;;  %5025 = vmatprep.mubr.bf16.mxu1 %v10794_v53  ;;  %v4927_v20 = vsel %vm573_vm1, %v4913_v31, 0 }
 0x2ff   : > { %4811 = vmatprep.mubr.bf16.mxu0 %v10794_v53  ;;  %v4945_v49 = vsel %vm573_vm1, %v4919_v0, 0 }
 0x303   : > { %8054 = vmatmul.mubr.msk.bf16.vlgmr.msra.gmra.mrb[76].mxu0 %vm569_vm2, %v9918_v12 }
 0x304   : > { %4951 = vmatpush1.bf16.msra.mxu0 %v4927_v20  ;;  %8060 = vmatmul.mubr.msk.bf16.vlgmr.msra.gmra.mrb[72].mxu1 %vm569_vm2, %v4922_v16 }
 0x305   : > { %5080 = vmatpush1.bf16.msra.mxu1 %v4945_v49  ;;  %8061 = vmatprep.subr.msk.bf16.mxu0 %vm573_vm1, %v4918_v48 }
 0x306   : > { %4982 = vmatprep.mubr.bf16.mxu0 %v10794_v53  ;;  %5111 = vmatprep.mubr.bf16.mxu1 %v10794_v53 }
 0x30b   : > { %8058 = vmatmul.mubr.msk.bf16.vlgmr.msra.gmra.mrb[72].mxu0 %vm569_vm2, %v4922_v16 }
 0x30c   : > { %5037 = vmatpush1.bf16.msra.mxu0 %v4939_v59  ;;  %8064 = vmatmul.mubr.msk.bf16.vlgmr.msra.gmra.mrb[76].mxu1 %vm569_vm2, %v4922_v16 }
 0x30d   : > { %5068 = vmatprep.mubr.bf16.mxu0 %v10794_v53  ;;  %5246 = vmatprep.mubr.bf16.mxu1 %v10794_v53 }
 0x313   : > { %8062 = vmatmul.mubr.msk.bf16.vlgmr.msra.gmra.mrb[76].mxu0 %vm569_vm2, %v4922_v16  ;;  %v5154_v16 = vld [vmem:[%s10691_s9] sm:$0xf] }
 0x314   : > { %5205 = vmatprep.mubr.bf16.mxu0 %v10794_v53 }
 0x3d7   : > { %v5027_v12 = vpop.f32.mrb[72].mxu1 }
 0x3d8   : > { %v5029_v32 = vpop.f32.mrb[73].mxu1  ;;  %v5140_v22 = vmax.f32 %v5027_v12, 0.0 }
 0x3d9   : > { %v5031_v4 = vpop.f32.mrb[74].mxu1  ;;  %v5141_v2 = vmax.f32 %v5029_v32, 0.0 }
 0x3da   : > { %v5148_v23 = vmax.f32 %v5031_v4, 0.0  ;;  %v5033_v39 = vpop.f32.mrb[75].mxu1 }
 0x3db   : > { %v5149_v42 = vmax.f32 %v5033_v39, 0.0 }
 0x3dc   : > { %v5157_v21 = vpack.c.bf16 %v5148_v23, %v5140_v22 }
 0x3dd   : > { %v5158_v31 = vpack.c.bf16 %v5149_v42, %v5141_v2 }
 0x3de   : > { %v4984_v40 = vpop.f32.mrb[72].mxu0 }
 0x3df   : > { %v5113_v56 = vpop.f32.mrb[76].mxu1  ;;  %5214 = vmatprep.subr.bf16.mxu1 %v5158_v31  ;;  %v4986_v3 = vpop.f32.mrb[73].mxu0  ;;  %v5138_v37 = vmax.f32 %v4984_v40, 0.0 }
 0x3e0   : > { %v5115_v0 = vpop.f32.mrb[77].mxu1  ;;  %5215 = vmatpush1.bf16.msra.mxu1 %v5157_v21  ;;  %v4988_v36 = vpop.f32.mrb[74].mxu0  ;;  %v5144_v58 = vmax.f32 %v5113_v56, 0.0  ;;  %v5139_v59 = vmax.f32 %v4986_v3, 0.0 }
 0x3e1   : > { %v5146_v48 = vmax.f32 %v4988_v36, 0.0  ;;  %v5117_v20 = vpop.f32.mrb[78].mxu1  ;;  %v4990_v49 = vpop.f32.mrb[75].mxu0  ;;  %v5145_v22 = vmax.f32 %v5115_v0, 0.0 }
 0x3e2   : > { %v5152_v12 = vmax.f32 %v5117_v20, 0.0  ;;  %v5147_v32 = vmax.f32 %v4990_v49, 0.0  ;;  %v5119_v4 = vpop.f32.mrb[79].mxu1 }
 0x3e3   : > { %v5155_v23 = vpack.c.bf16 %v5146_v48, %v5138_v37  ;;  %v5153_v39 = vmax.f32 %v5119_v4, 0.0  ;;  %8066 = vmatmul.mubr.msk.bf16.vlgmr.msra.gmra.mrb[80].mxu1 %vm5169_vm10, %v5154_v16 }
 0x3e4   : > { %v5161_v2 = vpack.c.bf16 %v5152_v12, %v5144_v58  ;;  %v5156_v42 = vpack.c.bf16 %v5147_v32, %v5139_v59  ;;  %5328 = vmatprep.mubr.bf16.mxu1 %v10794_v53  ;;  %v10052_v58 = vld [vmem:[%s10690_s8 + $0x8] sm:$0xff]   ;;  %v5167_v59 = vpop.permute.xlu0 %5166 }
 0x3e5   : > { %v5162_v21 = vpack.c.bf16 %v5153_v39, %v5145_v22  ;;  %5463 = vrot.lane.b32.xlu1 %v10052_v58, %s8466_s28  ;;  %v10852_v39 = vmax.f32 %v9411_v5, 0.0 }
 0x3e6   : > { %v5070_v31 = vpop.f32.mrb[76].mxu0  ;;  %5173 = vmatprep.subr.bf16.mxu0 %v5156_v42  ;;  %v5350_v42 = vpop.permute.xlu1 %5349 }
 0x3e7   : > { %5296 = vmatprep.subr.bf16.mxu1 %v5162_v21  ;;  %v5072_v40 = vpop.f32.mrb[77].mxu0  ;;  %5174 = vmatpush1.bf16.msra.mxu0 %v5155_v23  ;;  %v5142_v3 = vmax.f32 %v5070_v31, 0.0  ;;  %v10854_v21 = vmax.f32 %v9415_v15, 0.0 }
 0x3e8   : > { %5297 = vmatpush1.bf16.msra.mxu1 %v5161_v2  ;;  %v5074_v56 = vpop.f32.mrb[78].mxu0  ;;  %v5143_v0 = vmax.f32 %v5072_v40, 0.0 }
 0x3e9   : > { %v5150_v36 = vmax.f32 %v5074_v56, 0.0  ;;  %v5076_v20 = vpop.f32.mrb[79].mxu0  ;;  %v5365_v56 = vpop.permute.xlu0 %5364 }
 0x3ea   : > { %v5151_v37 = vmax.f32 %v5076_v20, 0.0  ;;  %8065 = vmatmul.mubr.msk.bf16.vlgmr.msra.gmra.mrb[80].mxu0 %vm5169_vm10, %v5154_v16 }
 0x3eb   : > { %v5159_v48 = vpack.c.bf16 %v5150_v36, %v5142_v3  ;;  %8068 = vmatmul.mubr.msk.bf16.vlgmr.msra.gmra.mrb[84].mxu1 %vm5169_vm10, %v5154_v16  ;;  %5287 = vmatprep.mubr.bf16.mxu0 %v10794_v53 }
 0x3ec   : > { %v5160_v49 = vpack.c.bf16 %v5151_v37, %v5143_v0  ;;  %5567 = vmatprep.mubr.bf16.mxu1 %v10794_v53 }
 0x3ee   : > { %5255 = vmatprep.subr.bf16.mxu0 %v5160_v49 }
 0x3ef   : > { %5256 = vmatpush1.bf16.msra.mxu0 %v5159_v48 }
 0x3f2   : > { %8067 = vmatmul.mubr.msk.bf16.vlgmr.msra.gmra.mrb[84].mxu0 %vm5169_vm10, %v5154_v16 }
 0x3f3   : > { %5524 = vmatprep.mubr.bf16.mxu0 %v10794_v53 }
 0x4b6   : > { %v5248_v12 = vpop.f32.mrb[80].mxu1 }
 0x4b7   : > { %v5249_v32 = vadd.f32 %v5248_v12, %v5167_v59  ;;  %v5250_v4 = vpop.f32.mrb[81].mxu1 }
 0x4b8   : > { %v5251_v22 = vadd.f32 %v5250_v4, %v5167_v59  ;;  %v5252_v23 = vpop.f32.mrb[82].mxu1  ;;  %v10856_v4 = vmax.f32 %v9413_v6, 0.0  ;;  %v10862_v6 = vmax.f32 %v9452_v34, 0.0 }
 0x4b9   : > { %v10058_v2 = vadd.f32 %v5249_v32, %v10852_v39  ;;  %v5253_v16 = vpop.f32.mrb[83].mxu1 }
 0x4ba   : > { %v10062_v31 = vadd.f32 %v5251_v22, %v10854_v21  ;;  %v10858_v21 = vmax.f32 %v9435_v19, 0.0 }
 0x4bb   : > { %10853 = vst [vmem:[#allocation7_spill] sm:$0xff] %v10058_v2  ;;  %v5354_v40 = vmul.f32 %v5350_v42, %v10058_v2 }
 0x4bc   : > { %10855 = vst [vmem:[#allocation9_spill] sm:$0xff] %v10062_v31  ;;  %v5355_v3 = vmul.f32 %v5350_v42, %v10062_v31 }
 0x4bd   : > { %v10066_v36 = vadd.f32 %v5365_v56, %v5354_v40  ;;  %v5207_v20 = vpop.f32.mrb[80].mxu0 }
 0x4be   : > { %v10068_v0 = vadd.f32 %v5365_v56, %v5355_v3  ;;  %v5208_v37 = vadd.f32 %v5207_v20, %v5167_v59  ;;  %v5330_v5 = vpop.f32.mrb[84].mxu1  ;;  %v5209_v48 = vpop.f32.mrb[81].mxu0  ;;  %v10860_v3 = vmax.f32 %v9417_v17, 0.0 }
 0x4bf   : > { %v5331_v49 = vadd.f32 %v5330_v5, %v5167_v59  ;;  %v5332_v12 = vpop.f32.mrb[85].mxu1  ;;  %5422 = vrot.lane.b32.xlu1 %v10066_v36, %s8463_s24  ;;  %v5210_v15 = vadd.f32 %v5209_v48, %v5167_v59  ;;  %v5211_v32 = vpop.f32.mrb[82].mxu0 }
 0x4c0   : > { %v10074_v22 = vadd.f32 %v5208_v37, %v10856_v4  ;;  %v5333_v23 = vadd.f32 %v5332_v12, %v5167_v59  ;;  %v5334_v39 = vpop.f32.mrb[86].mxu1  ;;  %5424 = vrot.lane.b32.xlu0 %v10068_v0, %s8463_s24  ;;  %v5212_v16 = vpop.f32.mrb[83].mxu0 }
 0x4c1   : > { %v10080_v40 = vadd.f32 %v5331_v49, %v10858_v21  ;;  %v10084_v20 = vadd.f32 %v5210_v15, %v10860_v3  ;;  %v5335_v5 = vpop.f32.mrb[87].mxu1 }
 0x4c2   : > { %10857 = vst [vmem:[#allocation8_spill] sm:$0xff] %v10074_v22  ;;  %v5352_v48 = vmul.f32 %v5350_v42, %v10074_v22  ;;  %v10089_v37 = vadd.f32 %v5333_v23, %v10862_v6  ;;  %v10864_v5 = vmax.f32 %v9442_v24, 0.0  ;;  %v10866_v6 = vld [vmem:[#allocation33_spill] sm:$0xff] }
 0x4c3   : > { %10859 = vst [vmem:[#allocation10_spill] sm:$0xff] %v10080_v40  ;;  %10861 = vst [vmem:[#allocation17_spill] sm:$0xff] %v10084_v20  ;;  %v5358_v12 = vmul.f32 %v5350_v42, %v10080_v40  ;;  %v5353_v49 = vmul.f32 %v5350_v42, %v10084_v20  ;;  %v10873_v40 = vld [vmem:[#allocation4_spill] sm:$0xff] }
 0x4c4   : > { %10863 = vst [vmem:[#allocation20_spill] sm:$0xff] %v10089_v37  ;;  %v10092_v32 = vadd.f32 %v5365_v56, %v5352_v48  ;;  %v5359_v4 = vmul.f32 %v5350_v42, %v10089_v37  ;;  %v10872_v37 = vld [vmem:[#allocation3_spill] sm:$0xff] }
 0x4c5   : > { %v10095_v19 = vadd.f32 %v5365_v56, %v5358_v12  ;;  %v5289_v17 = vpop.f32.mrb[84].mxu0  ;;  %v10104_v3 = vadd.f32 %v5365_v56, %v5353_v49  ;;  %v10867_v12 = vmax.f32 %v10866_v6, 0.0 }
 0x4c6   : > { %v5290_v15 = vadd.f32 %v5289_v17, %v5167_v59  ;;  %5418 = vrot.lane.b32.xlu1 %v10092_v32, %s8463_s24  ;;  %v5291_v39 = vpop.f32.mrb[85].mxu0  ;;  %v10102_v16 = vadd.f32 %v5365_v56, %v5359_v4 }
 0x4c7   : > { %5430 = vrot.lane.b32.xlu0 %v10095_v19, %s8463_s24  ;;  %v5292_v34 = vadd.f32 %v5291_v39, %v5167_v59  ;;  %v5293_v23 = vpop.f32.mrb[86].mxu0 }
 0x4c8   : > { %v5294_v21 = vpop.f32.mrb[87].mxu0  ;;  %v10108_v48 = vadd.f32 %v5290_v15, %v10864_v5 }
 0x4c9   : > { %v10112_v17 = vadd.f32 %v5292_v34, %v10867_v12  ;;  %v10871_v34 = vld [vmem:[#allocation2_spill] sm:$0xff] }
 0x4ca   : > { %10865 = vst [vmem:[#allocation32_spill] sm:$0xff] %v10108_v48  ;;  %5432 = vrot.lane.b32.xlu1 %v10102_v16, %s8463_s24  ;;  %v5356_v4 = vmul.f32 %v5350_v42, %v10108_v48 }
 0x4cb   : > { %10868 = vst [vmem:[#allocation30_spill] sm:$0xff] %v10112_v17  ;;  %5420 = vrot.lane.b32.xlu0 %v10104_v3, %s8463_s24  ;;  %v5357_v59 = vmul.f32 %v5350_v42, %v10112_v17  ;;  %v10220_v42 = vpop.permute.xlu1 %5463 }
 0x4cc   : > { %v10126_v49 = vadd.f32 %v5365_v56, %v5356_v4 }
 0x4cd   : > { %v10124_v24 = vadd.f32 %v5365_v56, %v5357_v59 }
 0x4ce   : > { %5380 = vrot.lane.b32.xlu1 %v10104_v3, %s8465_s27 }
 0x4cf   : > { %5378 = vrot.lane.b32.xlu0 %v10092_v32, %s8465_s27 }
 0x4d2   : > { %5428 = vrot.lane.b32.xlu1 %v10124_v24, %s8463_s24 }
 0x4d3   : > { %5426 = vrot.lane.b32.xlu0 %v10126_v49, %s8463_s24  ;;  %s10869_s24 = smov 127  }
 0x4d6   : > { %5384 = vrot.lane.b32.xlu1 %v10068_v0, %s8465_s27 }
 0x4d7   : > { %5382 = vrot.lane.b32.xlu0 %v10066_v36, %s8465_s27 }
 0x4da   : > { %5386 = vrot.lane.b32.xlu1 %v10126_v49, %s8465_s27 }
 0x4db   : > { %5392 = vrot.lane.b32.xlu0 %v10102_v16, %s8465_s27 }
 0x4de   : > { %5390 = vrot.lane.b32.xlu1 %v10095_v19, %s8465_s27 }
 0x4df   : > { %5863 = vrot.lane.b32.xlu0 %v10092_v32, %s8467_s29 }
 0x4e2   : > { %5865 = vrot.lane.b32.xlu1 %v10104_v3, %s8467_s29 }
 0x4e3   : > { %5388 = vrot.lane.b32.xlu0 %v10124_v24, %s8465_s27  ;;  %s10870_s27 = smov 96  }
 0x4e6   : > { %5869 = vrot.lane.b32.xlu1 %v10068_v0, %s8467_s29 }
 0x4e7   : > { %5867 = vrot.lane.b32.xlu0 %v10066_v36, %s8467_s29 }
 0x4ea   : > { %5871 = vrot.lane.b32.xlu1 %v10126_v49, %s8467_s29 }
 0x4eb   : > { %5877 = vrot.lane.b32.xlu0 %v10102_v16, %s8467_s29 }
 0x4ee   : > { %5875 = vrot.lane.b32.xlu1 %v10095_v19, %s8467_s29 }
 0x4ef   : > { %5903 = vrot.lane.b32.xlu0 %v10052_v58, %s8468_s30 }
 0x4f2   : > { %6120 = vrot.lane.b32.xlu1 %v10092_v32, %s8469_s12 }
 0x4f3   : > { %5873 = vrot.lane.b32.xlu0 %v10124_v24, %s8467_s29 }
 0x4f6   : > { %6124 = vrot.lane.b32.xlu1 %v10066_v36, %s8469_s12 }
 0x4f7   : > { %6122 = vrot.lane.b32.xlu0 %v10104_v3, %s8469_s12 }
 0x4fa   : > { %6134 = vrot.lane.b32.xlu1 %v10102_v16, %s8469_s12 }
 0x4fb   : > { %6126 = vrot.lane.b32.xlu0 %v10068_v0, %s8469_s12 }
 0x4fe   : > { %6130 = vrot.lane.b32.xlu1 %v10124_v24, %s8469_s12 }
 0x4ff   : > { %6128 = vrot.lane.b32.xlu0 %v10126_v49, %s8469_s12 }
 0x502   : > { %6160 = vrot.lane.b32.xlu1 %v10052_v58, %s8471_s14 }
 0x503   : > { %6132 = vrot.lane.b32.xlu0 %v10095_v19, %s8469_s12  ;;  %s10894_s12 = sshll.u32 %s10904_s19, 3 }
 0x506   : > { %6602 = vrot.lane.b32.xlu1 %v10092_v32, %s10869_s24 }
 0x507   : > { %6385 = vrot.lane.b32.xlu0 %v10052_v58, %s10870_s27 }
 0x50a   : > { %6606 = vrot.lane.b32.xlu1 %v10066_v36, %s10869_s24 }
 0x50b   : > { %6604 = vrot.lane.b32.xlu0 %v10104_v3, %s10869_s24 }
 0x50e   : > { %6610 = vrot.lane.b32.xlu1 %v10126_v49, %s10869_s24 }
 0x50f   : > { %6608 = vrot.lane.b32.xlu0 %v10068_v0, %s10869_s24 }
 0x512   : > { %6614 = vrot.lane.b32.xlu1 %v10095_v19, %s10869_s24 }
 0x513   : > { %6616 = vrot.lane.b32.xlu0 %v10102_v16, %s10869_s24 }
 0x516   : > { %6642 = vrot.lane.b32.xlu1 %v10052_v58, %s10820_s20 }
 0x517   : > { %6859 = vrot.lane.b32.xlu0 %v10092_v32, %s10821_s23 }
 0x51a   : > { %6861 = vrot.lane.b32.xlu1 %v10104_v3, %s10821_s23 }
 0x51b   : > { %6863 = vrot.lane.b32.xlu0 %v10066_v36, %s10821_s23 }
 0x51e   : > { %6865 = vrot.lane.b32.xlu1 %v10068_v0, %s10821_s23 }
 0x51f   : > { %6612 = vrot.lane.b32.xlu0 %v10124_v24, %s10869_s24 }
 0x522   : > { %6873 = vrot.lane.b32.xlu1 %v10102_v16, %s10821_s23 }
 0x523   : > { %6867 = vrot.lane.b32.xlu0 %v10126_v49, %s10821_s23 }
 0x526   : > { %7116 = vrot.lane.b32.xlu1 %v10092_v32, %s10870_s27 }
 0x527   : > { %6871 = vrot.lane.b32.xlu0 %v10095_v19, %s10821_s23 }
 0x52a   : > { %6869 = vrot.lane.b32.xlu1 %v10124_v24, %s10821_s23  ;;  %s10661_s23 = scalar_lea.vmem %s10693_s11, %s10894_s12 }
 0x52b   : > { %6899 = vrot.lane.b32.xlu0 %v10052_v58, %s10822_s21 }
 0x52e   : > { %7120 = vrot.lane.b32.xlu1 %v10066_v36, %s10870_s27 }
 0x52f   : > { %7118 = vrot.lane.b32.xlu0 %v10104_v3, %s10870_s27 }
 0x531   : > { %v5423_v56 = vpop.permute.xlu1 %5422 }
 0x532   : > { %v5425_v15 = vpop.permute.xlu0 %5424  ;;  %7124 = vrot.lane.b32.xlu1 %v10126_v49, %s10870_s27 }
 0x533   : > { %v5438_v39 = vsel %vm507_vm0, %v5423_v56, %v5425_v15  ;;  %7122 = vrot.lane.b32.xlu0 %v10068_v0, %s10870_s27 }
 0x534   : > { %v5445_v23 = vmul.f32 %v5438_v39, %v10871_v34 }
 0x536   : > { %v5453_v21 = vpack.c.bf16 %v5445_v23, %v5445_v23  ;;  %7128 = vrot.lane.b32.xlu1 %v10095_v19, %s10870_s27 }
 0x537   : > { %7130 = vrot.lane.b32.xlu0 %v10102_v16, %s10870_s27 }
 0x538   : > { %8076 = vmatprep.subr.msk.bf16.mxu1 %vm573_vm1, %v5453_v21  ;;  %v5419_v5 = vpop.permute.xlu1 %5418 }
 0x539   : > { %v5431_v6 = vpop.permute.xlu0 %5430 }
 0x53a   : > { %7156 = vrot.lane.b32.xlu1 %v10052_v58, %s10823_s22 }
 0x53b   : > { %7373 = vrot.lane.b32.xlu0 %v10092_v32, %s10824_s25 }
 0x53c   : > { %v5433_v12 = vpop.permute.xlu1 %5432 }
 0x53d   : > { %v5421_v59 = vpop.permute.xlu0 %5420  ;;  %v5434_v4 = vsel %vm507_vm0, %v5431_v6, %v5433_v12  ;;  %v5441_v39 = vsel %vm507_vm0, %v5433_v12, %v5419_v5 }
 0x53e   : > { %v5439_v34 = vsel %vm507_vm0, %v5421_v59, %v5423_v56  ;;  %v5440_v23 = vsel %vm507_vm0, %v5419_v5, %v5421_v59  ;;  %v5442_v21 = vmul.f32 %v5441_v39, %v8751_v30  ;;  %7375 = vrot.lane.b32.xlu1 %v10104_v3, %s10824_s25  ;;  %v5449_v31 = vmul.f32 %v5434_v4, %v8783_v45 }
 0x53f   : > { %v5443_v17 = vmul.f32 %v5440_v23, %v10872_v37  ;;  %v5444_v48 = vmul.f32 %v5439_v34, %v10873_v40  ;;  %7126 = vrot.lane.b32.xlu0 %v10124_v24, %s10870_s27 }
 0x540   : > { %v5450_v12 = vpack.c.bf16 %v5442_v21, %v5442_v21  ;;  %v5381_v20 = vpop.permute.xlu1 %5380  ;;  %v5457_v5 = vpack.c.bf16 %v5449_v31, %v5449_v31  ;;  %v10874_v31 = vld [vmem:[#allocation5_spill] sm:$0xff] }
 0x541   : > { %v5451_v56 = vpack.c.bf16 %v5443_v17, %v5443_v17  ;;  %v5452_v2 = vpack.c.bf16 %v5444_v48, %v5444_v48  ;;  %v5379_v22 = vpop.permute.xlu0 %5378 }
 0x542   : > { %7379 = vrot.lane.b32.xlu1 %v10068_v0, %s10824_s25  ;;  %v5469_v30 = vsel %vm573_vm1, %v5450_v12, 0  ;;  %v5400_v40 = vsel %vm434_vm3, %v5379_v22, %v5381_v20 }
 0x543   : > { %8074 = vmatprep.subr.msk.bf16.mxu0 %vm573_vm1, %v5451_v56  ;;  %7377 = vrot.lane.b32.xlu0 %v10066_v36, %s10824_s25  ;;  %v5475_v45 = vsel %vm573_vm1, %v5452_v2, 0  ;;  %v5403_v39 = vmul.f32 %v5400_v40, %v8825_v25 }
 0x544   : > { %5493 = vmatpush1.bf16.msra.mxu0 %v5469_v30  ;;  %5536 = vmatpush1.bf16.msra.mxu1 %v5475_v45  ;;  %v5429_v37 = vpop.permute.xlu1 %5428  ;;  %v10875_v45 = vld [vmem:[#allocation6_spill] sm:$0xff] }
 0x545   : > { %8080 = vmatprep.subr.msk.bf16.mxu1 %vm573_vm1, %v5457_v5  ;;  %v5435_v48 = vsel %vm507_vm0, %v5429_v37, %v5431_v6  ;;  %v5427_v17 = vpop.permute.xlu0 %5426  ;;  %v5411_v30 = vpack.c.bf16 %v5403_v39, %v5403_v39 }
 0x546   : > { %v5448_v59 = vmul.f32 %v5435_v48, %v10874_v31  ;;  %v5436_v4 = vsel %vm507_vm0, %v5427_v17, %v5429_v37  ;;  %v5437_v2 = vsel %vm507_vm0, %v5425_v15, %v5427_v17  ;;  %7383 = vrot.lane.b32.xlu1 %v10124_v24, %s10824_s25  ;;  %v8147_v48 = vld [vmem:[%s10692_s10 + $0x8] sm:$0xff] }
 0x547   : > { %v5446_v34 = vmul.f32 %v5437_v2, %v8766_v35  ;;  %v5447_v23 = vmul.f32 %v5436_v4, %v8790_v47  ;;  %8075 = vmatmul.mubr.msk.bf16.vlgmr.msra.gmra.mrb[88].mxu0 %vm569_vm2, %v10220_v42  ;;  %8077 = vmatmul.mubr.msk.bf16.vlgmr.msra.gmra.mrb[88].mxu1 %vm569_vm2, %v10220_v42 }
 0x548   : > { %v5456_v6 = vpack.c.bf16 %v5448_v59, %v5448_v59  ;;  %7381 = vrot.lane.b32.xlu0 %v10126_v49, %s10824_s25  ;;  %v5385_v15 = vpop.permute.xlu1 %5384  ;;  %5610 = vmatprep.mubr.bf16.mxu0 %v10794_v53 }
 0x549   : > { %v5454_v21 = vpack.c.bf16 %v5446_v34, %v5446_v34  ;;  %v5455_v12 = vpack.c.bf16 %v5447_v23, %v5447_v23  ;;  %v5383_v25 = vpop.permute.xlu0 %5382  ;;  %5653 = vmatprep.mubr.bf16.mxu1 %v10794_v53 }
 0x54a   : > { %v5398_v35 = vsel %vm434_vm3, %v5383_v25, %v5385_v15  ;;  %v5399_v47 = vsel %vm434_vm3, %v5381_v20, %v5383_v25  ;;  %7387 = vrot.lane.b32.xlu1 %v10102_v16, %s10824_s25  ;;  %v5487_v56 = vsel %vm573_vm1, %v5456_v6, 0 }
 0x54b   : > { %v5404_v5 = vmul.f32 %v5399_v47, %v8829_v27  ;;  %v5405_v40 = vmul.f32 %v5398_v35, %v10875_v45  ;;  %8078 = vmatprep.subr.msk.bf16.mxu0 %vm573_vm1, %v5455_v12  ;;  %v5481_v37 = vsel %vm573_vm1, %v5454_v21, 0  ;;  %5622 = vmatpush1.bf16.msra.mxu1 %v5487_v56 }
 0x54c   : > { %7385 = vrot.lane.b32.xlu0 %v10095_v19, %s10824_s25  ;;  %5579 = vmatpush1.bf16.msra.mxu0 %v5481_v37  ;;  %v5387_v20 = vpop.permute.xlu1 %5386 }
 0x54d   : > { %v5412_v17 = vpack.c.bf16 %v5404_v5, %v5404_v5  ;;  %v5413_v31 = vpack.c.bf16 %v5405_v40, %v5405_v40  ;;  %8082 = vmatprep.subr.msk.bf16.mxu0 %vm573_vm1, %v5411_v30  ;;  %v5393_v27 = vpop.permute.xlu0 %5392  ;;  %v5397_v4 = vsel %vm434_vm3, %v5385_v15, %v5387_v20 }
 0x54e   : > { %v5401_v59 = vsel %vm434_vm3, %v5393_v27, %v5379_v22  ;;  %7660 = vperm.xlu1 %8435, %v8147_v48   ;;  %v5406_v6 = vmul.f32 %v5397_v4, %v8856_v46 }
 0x54f   : > { %v5402_v2 = vmul.f32 %v5401_v59, %v8842_v38  ;;  %8081 = vmatmul.mubr.msk.bf16.vlgmr.msra.gmra.mrb[92].mxu1 %vm569_vm2, %v10220_v42  ;;  %8079 = vmatmul.mubr.msk.bf16.vlgmr.msra.gmra.mrb[92].mxu0 %vm569_vm2, %v10220_v42  ;;  %v5674_v39 = vsel %vm573_vm1, %v5412_v17, 0 }
 0x550   : > { %8084 = vmatprep.subr.msk.bf16.mxu1 %vm573_vm1, %v5413_v31  ;;  %v5391_v34 = vpop.permute.xlu1 %5390  ;;  %7413 = vrot.lane.b32.xlu0 %v10052_v58, %s10825_s18  ;;  %v5414_v47 = vpack.c.bf16 %v5406_v6, %v5406_v6 }
 0x551   : > { %v5410_v22 = vpack.c.bf16 %v5402_v2, %v5402_v2  ;;  %5735 = vmatpush1.bf16.msra.mxu1 %v5674_v39  ;;  %v5394_v23 = vsel %vm434_vm3, %v5391_v34, %v5393_v27  ;;  %v5864_v38 = vpop.permute.xlu0 %5863  ;;  %5723 = vmatprep.mubr.bf16.mxu0 %v10794_v53 }
 0x552   : > { %v5409_v42 = vmul.f32 %v5394_v23, %v8887_v63  ;;  %5766 = vmatprep.mubr.bf16.mxu1 %v10794_v53 }
 0x553   : > { %v5668_v15 = vsel %vm573_vm1, %v5410_v22, 0 }
 0x554   : > { %v5417_v21 = vpack.c.bf16 %v5409_v42, %v5409_v42  ;;  %5692 = vmatpush1.bf16.msra.mxu0 %v5668_v15  ;;  %v5866_v12 = vpop.permute.xlu1 %5865 }
 0x555   : > { %v5885_v25 = vsel %vm969_vm4, %v5864_v38, %v5866_v12  ;;  %v5389_v35 = vpop.permute.xlu0 %5388 }
 0x556   : > { %v5395_v56 = vsel %vm434_vm3, %v5389_v35, %v5391_v34  ;;  %v5396_v46 = vsel %vm434_vm3, %v5387_v20, %v5389_v35  ;;  %8088 = vmatprep.subr.msk.bf16.mxu1 %vm573_vm1, %v5417_v21  ;;  %v5888_v63 = vmul.f32 %v5885_v25, %v8903_v33 }
 0x557   : > { %v5407_v30 = vmul.f32 %v5396_v46, %v8865_v51  ;;  %v5408_v5 = vmul.f32 %v5395_v56, %v8878_v60  ;;  %8083 = vmatmul.mubr.msk.bf16.vlgmr.msra.gmra.mrb[88].mxu0 %vm569_vm2, %v10052_v58  ;;  %8085 = vmatmul.mubr.msk.bf16.vlgmr.msra.gmra.mrb[88].mxu1 %vm569_vm2, %v10052_v58  ;;  %v5680_v60 = vsel %vm573_vm1, %v5414_v47, 0 }
 0x558   : > { %v5870_v45 = vpop.permute.xlu1 %5869  ;;  %5809 = vmatprep.mubr.bf16.mxu0 %v10794_v53  ;;  %5852 = vmatprep.mubr.bf16.mxu1 %v10794_v53  ;;  %v5896_v20 = vpack.c.bf16 %v5888_v63, %v5888_v63 }
 0x559   : > { %v5415_v40 = vpack.c.bf16 %v5407_v30, %v5407_v30  ;;  %v5416_v37 = vpack.c.bf16 %v5408_v5, %v5408_v5  ;;  %v5868_v48 = vpop.permute.xlu0 %5867 }
 0x55a   : > { %v5883_v33 = vsel %vm969_vm4, %v5868_v48, %v5870_v45  ;;  %v5884_v51 = vsel %vm969_vm4, %v5866_v12, %v5868_v48 }
 0x55b   : > { %v5889_v17 = vmul.f32 %v5884_v51, %v8913_v43  ;;  %v5890_v31 = vmul.f32 %v5883_v33, %v8930_v61  ;;  %8086 = vmatprep.subr.msk.bf16.mxu0 %vm573_vm1, %v5415_v40  ;;  %v5686_v27 = vsel %vm573_vm1, %v5416_v37, 0 }
 0x55c   : > { %5778 = vmatpush1.bf16.msra.mxu0 %v5680_v60  ;;  %5821 = vmatpush1.bf16.msra.mxu1 %v5686_v27  ;;  %v5872_v59 = vpop.permute.xlu1 %5871 }
 0x55d   : > { %v5897_v4 = vpack.c.bf16 %v5889_v17, %v5889_v17  ;;  %v5898_v2 = vpack.c.bf16 %v5890_v31, %v5890_v31  ;;  %8090 = vmatprep.subr.msk.bf16.mxu0 %vm573_vm1, %v5896_v20  ;;  %v5878_v39 = vpop.permute.xlu0 %5877  ;;  %v5882_v61 = vsel %vm969_vm4, %v5870_v45, %v5872_v59 }
 0x55e   : > { %v5886_v34 = vsel %vm969_vm4, %v5878_v39, %v5864_v38  ;;  %v5891_v42 = vmul.f32 %v5882_v61, %v8937_v57 }
 0x55f   : > { %v5887_v22 = vmul.f32 %v5886_v34, %v8923_v55  ;;  %8087 = vmatmul.mubr.msk.bf16.vlgmr.msra.gmra.mrb[92].mxu0 %vm569_vm2, %v10052_v58  ;;  %8089 = vmatmul.mubr.msk.bf16.vlgmr.msra.gmra.mrb[92].mxu1 %vm569_vm2, %v10052_v58  ;;  %v5915_v43 = vsel %vm573_vm1, %v5897_v4, 0 }
 0x560   : > { %8092 = vmatprep.subr.msk.bf16.mxu1 %vm573_vm1, %v5898_v2  ;;  %v5876_v23 = vpop.permute.xlu1 %5875  ;;  %5964 = vmatprep.mubr.bf16.mxu0 %v10794_v53  ;;  %v5899_v56 = vpack.c.bf16 %v5891_v42, %v5891_v42 }
 0x561   : > { %v5895_v6 = vpack.c.bf16 %v5887_v22, %v5887_v22  ;;  %5976 = vmatpush1.bf16.msra.mxu1 %v5915_v43  ;;  %v5879_v55 = vsel %vm969_vm4, %v5876_v23, %v5878_v39  ;;  %v5904_v38 = vpop.permute.xlu0 %5903  ;;  %6007 = vmatprep.mubr.bf16.mxu1 %v10794_v53 }
 0x562   : > { %v5894_v58 = vmul.f32 %v5879_v55, %v8959_v9  ;;  %v5921_v37 = vsel %vm573_vm1, %v5899_v56, 0 }
 0x563   : > { %v5909_v15 = vsel %vm573_vm1, %v5895_v6, 0 }
 0x564   : > { %v5902_v21 = vpack.c.bf16 %v5894_v58, %v5894_v58  ;;  %5933 = vmatpush1.bf16.msra.mxu0 %v5909_v15  ;;  %v6121_v12 = vpop.permute.xlu1 %6120 }
 0x565   : > { %v5874_v25 = vpop.permute.xlu0 %5873 }
 0x566   : > { %v5880_v35 = vsel %vm969_vm4, %v5874_v25, %v5876_v23  ;;  %v5881_v47 = vsel %vm969_vm4, %v5872_v59, %v5874_v25  ;;  %8096 = vmatprep.subr.msk.bf16.mxu1 %vm573_vm1, %v5902_v21  ;;  %v6378_v21 = vpack.c.bf16 %v10104_v3, %v10104_v3  ;;  %v6377_v3 = vpack.c.bf16 %v10092_v32, %v10092_v32 }
 0x567   : > { %v5892_v46 = vmul.f32 %v5881_v47, %v8940_v28  ;;  %v5893_v9 = vmul.f32 %v5880_v35, %v8951_v44  ;;  %8091 = vmatmul.mubr.msk.bf16.vlgmr.msra.gmra.mrb[88].mxu0 %vm569_vm2, %v5904_v38  ;;  %8093 = vmatmul.mubr.msk.bf16.vlgmr.msra.gmra.mrb[88].mxu1 %vm569_vm2, %v5904_v38  ;;  %v6380_v35 = vpack.c.bf16 %v10068_v0, %v10068_v0 }
 0x568   : > { %v6125_v57 = vpop.permute.xlu1 %6124  ;;  %6050 = vmatprep.mubr.bf16.mxu0 %v10794_v53  ;;  %6093 = vmatprep.mubr.bf16.mxu1 %v10794_v53  ;;  %v6379_v47 = vpack.c.bf16 %v10066_v36, %v10066_v36  ;;  %v6382_v0 = vpack.c.bf16 %v10124_v24, %v10124_v24  ;;  %v6384_v32 = vpack.c.bf16 %v10102_v16, %v10102_v16 }
 0x569   : > { %v5900_v63 = vpack.c.bf16 %v5892_v46, %v5892_v46  ;;  %v5901_v30 = vpack.c.bf16 %v5893_v9, %v5893_v9  ;;  %v6123_v5 = vpop.permute.xlu0 %6122  ;;  %v6391_v9 = vsel %vm573_vm1, %v6377_v3, 0  ;;  %v6383_v16 = vpack.c.bf16 %v10095_v19, %v10095_v19 }
 0x56a   : > { %v6141_v45 = vsel %vm1243_vm5, %v6123_v5, %v6125_v57  ;;  %v6142_v28 = vsel %vm1243_vm5, %v6121_v12, %v6123_v5 }
 0x56b   : > { %v6145_v44 = vmul.f32 %v6142_v28, %v8978_v29  ;;  %v6146_v40 = vmul.f32 %v6141_v45, %v8989_v54  ;;  %8094 = vmatprep.subr.msk.bf16.mxu0 %vm573_vm1, %v5900_v63  ;;  %v5927_v48 = vsel %vm573_vm1, %v5901_v30, 0  ;;  %v6381_v28 = vpack.c.bf16 %v10126_v49, %v10126_v49 }
 0x56c   : > { %6019 = vmatpush1.bf16.msra.mxu0 %v5921_v37  ;;  %6062 = vmatpush1.bf16.msra.mxu1 %v5927_v48  ;;  %v6135_v33 = vpop.permute.xlu1 %6134 }
 0x56d   : > { %v6153_v51 = vpack.c.bf16 %v6145_v44, %v6145_v44  ;;  %v6143_v60 = vsel %vm1243_vm5, %v6135_v33, %v6121_v12  ;;  %v6127_v20 = vpop.permute.xlu0 %6126  ;;  %v6154_v54 = vpack.c.bf16 %v6146_v40, %v6146_v40 }
 0x56e   : > { %v6144_v17 = vmul.f32 %v6143_v60, %v10827_v14  ;;  %v6140_v29 = vsel %vm1243_vm5, %v6125_v57, %v6127_v20  ;;  %v6397_v57 = vsel %vm573_vm1, %v6379_v47, 0  ;;  %v10876_v60 = vld [vmem:[#allocation12_spill] sm:$0xff] }
 0x56f   : > { %v6147_v31 = vmul.f32 %v6140_v29, %v10826_v50  ;;  %8095 = vmatmul.mubr.msk.bf16.vlgmr.msra.gmra.mrb[92].mxu0 %vm569_vm2, %v5904_v38  ;;  %8097 = vmatmul.mubr.msk.bf16.vlgmr.msra.gmra.mrb[92].mxu1 %vm569_vm2, %v5904_v38  ;;  %v6172_v43 = vsel %vm573_vm1, %v6154_v54, 0 }
 0x570   : > { %v6152_v27 = vpack.c.bf16 %v6144_v17, %v6144_v17  ;;  %8098 = vmatprep.subr.msk.bf16.mxu0 %vm573_vm1, %v6153_v51  ;;  %v6131_v59 = vpop.permute.xlu1 %6130  ;;  %6221 = vmatprep.mubr.bf16.mxu0 %v10794_v53  ;;  %v6409_v51 = vsel %vm573_vm1, %v6383_v16, 0 }
 0x571   : > { %v6155_v4 = vpack.c.bf16 %v6147_v31, %v6147_v31  ;;  %v6129_v2 = vpop.permute.xlu0 %6128  ;;  %6264 = vmatprep.mubr.bf16.mxu1 %v10794_v53 }
 0x572   : > { %v6138_v14 = vsel %vm1243_vm5, %v6129_v2, %v6131_v59  ;;  %v6139_v50 = vsel %vm1243_vm5, %v6127_v20, %v6129_v2  ;;  %v6166_v39 = vsel %vm573_vm1, %v6152_v27, 0 }
 0x573   : > { %v6148_v34 = vmul.f32 %v6139_v50, %v10828_v41  ;;  %v6149_v22 = vmul.f32 %v6138_v14, %v9019_v62  ;;  %8100 = vmatprep.subr.msk.bf16.mxu1 %vm573_vm1, %v6155_v4  ;;  %6190 = vmatpush1.bf16.msra.mxu0 %v6166_v39  ;;  %v10878_v4 = vld [vmem:[#allocation14_spill] sm:$0xff]  ;;  %v10879_v39 = vld [vmem:[#allocation15_spill] sm:$0xff] }
 0x574   : > { %6233 = vmatpush1.bf16.msra.mxu1 %v6172_v43  ;;  %v6161_v61 = vpop.permute.xlu1 %6160 }
 0x575   : > { %v6156_v23 = vpack.c.bf16 %v6148_v34, %v6148_v34  ;;  %v6157_v6 = vpack.c.bf16 %v6149_v22, %v6149_v22  ;;  %v6133_v55 = vpop.permute.xlu0 %6132 }
 0x576   : > { %v6136_v38 = vsel %vm1243_vm5, %v6133_v55, %v6135_v33  ;;  %v6137_v58 = vsel %vm1243_vm5, %v6131_v59, %v6133_v55 }
 0x577   : > { %v6150_v41 = vmul.f32 %v6137_v58, %v9026_v10  ;;  %v6151_v62 = vmul.f32 %v6136_v38, %v9016_v18  ;;  %8099 = vmatmul.mubr.msk.bf16.vlgmr.msra.gmra.mrb[88].mxu0 %vm569_vm2, %v6161_v61  ;;  %8101 = vmatmul.mubr.msk.bf16.vlgmr.msra.gmra.mrb[88].mxu1 %vm569_vm2, %v6161_v61  ;;  %v6178_v42 = vsel %vm573_vm1, %v6156_v23, 0 }
 0x578   : > { %8102 = vmatprep.subr.msk.bf16.mxu0 %vm573_vm1, %v6157_v6  ;;  %v6603_v15 = vpop.permute.xlu1 %6602  ;;  %6307 = vmatprep.mubr.bf16.mxu0 %v10794_v53 }
 0x579   : > { %v6158_v12 = vpack.c.bf16 %v6150_v41, %v6150_v41  ;;  %v6159_v25 = vpack.c.bf16 %v6151_v62, %v6151_v62  ;;  %6276 = vmatpush1.bf16.msra.mxu0 %v6178_v42  ;;  %v6386_v10 = vpop.permute.xlu0 %6385  ;;  %6350 = vmatprep.mubr.bf16.mxu1 %v10794_v53  ;;  %v10880_v62 = vld [vmem:[#allocation16_spill] sm:$0xff] }
 0x57a   : > { %8106 = vmatprep.subr.msk.bf16.mxu0 %vm573_vm1, %v6378_v21 }
 0x57b   : > { %8104 = vmatprep.subr.msk.bf16.mxu1 %vm573_vm1, %v6159_v25  ;;  %v6184_v18 = vsel %vm573_vm1, %v6158_v12, 0 }
 0x57c   : > { %6319 = vmatpush1.bf16.msra.mxu1 %v6184_v18  ;;  %v6607_v56 = vpop.permute.xlu1 %6606 }
 0x57d   : > { %8108 = vmatprep.subr.msk.bf16.mxu1 %vm573_vm1, %v6380_v35  ;;  %v6605_v46 = vpop.permute.xlu0 %6604 }
 0x57e   : > { %v6623_v36 = vsel %vm1726_vm6, %v6605_v46, %v6607_v56  ;;  %v6624_v44 = vsel %vm1726_vm6, %v6603_v15, %v6605_v46 }
 0x57f   : > { %8103 = vmatmul.mubr.msk.bf16.vlgmr.msra.gmra.mrb[92].mxu0 %vm569_vm2, %v6161_v61  ;;  %8105 = vmatmul.mubr.msk.bf16.vlgmr.msra.gmra.mrb[92].mxu1 %vm569_vm2, %v6161_v61  ;;  %v6627_v24 = vmul.f32 %v6623_v36, %v10830_v26  ;;  %v6626_v19 = vmul.f32 %v6624_v44, %v10876_v60  ;;  %v10877_v26 = vld [vmem:[#allocation11_spill] sm:$0xff] }
 0x580   : > { %6415 = vmatpush1.bf16.msra.mxu0 %v6391_v9  ;;  %6458 = vmatpush1.bf16.msra.mxu1 %v6397_v57  ;;  %v6611_v63 = vpop.permute.xlu1 %6610  ;;  %v10882_v57 = vld [vmem:[#allocation19_spill] sm:$0xff] }
 0x581   : > { %8110 = vmatprep.subr.msk.bf16.mxu0 %vm573_vm1, %v6382_v0  ;;  %8112 = vmatprep.subr.msk.bf16.mxu1 %vm573_vm1, %v6384_v32  ;;  %v6609_v30 = vpop.permute.xlu0 %6608  ;;  %v6635_v20 = vpack.c.bf16 %v6627_v24, %v6627_v24  ;;  %v6634_v31 = vpack.c.bf16 %v6626_v19, %v6626_v19  ;;  %v10883_v32 = vld [vmem:[#allocation18_spill] sm:$0xff]  ;;  %v10885_v60 = vld [vmem:[#allocation23_spill] sm:$0xff] }
 0x582   : > { %v6621_v5 = vsel %vm1726_vm6, %v6609_v30, %v6611_v63  ;;  %6446 = vmatprep.mubr.bf16.mxu0 %v10794_v53  ;;  %6489 = vmatprep.mubr.bf16.mxu1 %v10794_v53  ;;  %v6622_v40 = vsel %vm1726_vm6, %v6607_v56, %v6609_v30 }
 0x583   : > { %v6629_v45 = vmul.f32 %v6621_v5, %v9078_v11  ;;  %v6628_v17 = vmul.f32 %v6622_v40, %v10877_v26  ;;  %v6403_v11 = vsel %vm573_vm1, %v6381_v28, 0  ;;  %v6648_v43 = vsel %vm573_vm1, %v6634_v31, 0  ;;  %v10884_v28 = vld [vmem:[#allocation22_spill] sm:$0xff] }
 0x584   : > { %v6615_v37 = vpop.permute.xlu1 %6614 }
 0x585   : > { %v6637_v48 = vpack.c.bf16 %v6629_v45, %v6629_v45  ;;  %v6617_v33 = vpop.permute.xlu0 %6616  ;;  %v6636_v27 = vpack.c.bf16 %v6628_v17, %v6628_v17 }
 0x586   : > { %v6625_v49 = vsel %vm1726_vm6, %v6617_v33, %v6603_v15  ;;  %v6618_v59 = vsel %vm1726_vm6, %v6615_v37, %v6617_v33  ;;  %v10881_v15 = vld [vmem:[#allocation13_spill] sm:$0xff] }
 0x587   : > { %8107 = vmatmul.mubr.msk.bf16.vlgmr.msra.gmra.mrb[88].mxu0 %vm569_vm2, %v6386_v10  ;;  %8109 = vmatmul.mubr.msk.bf16.vlgmr.msra.gmra.mrb[88].mxu1 %vm569_vm2, %v6386_v10  ;;  %v6633_v2 = vmul.f32 %v6625_v49, %v10878_v4  ;;  %v6632_v34 = vmul.f32 %v6618_v59, %v10879_v39  ;;  %v6654_v61 = vsel %vm573_vm1, %v6636_v27, 0 }
 0x588   : > { %6501 = vmatpush1.bf16.msra.mxu0 %v6403_v11  ;;  %6544 = vmatpush1.bf16.msra.mxu1 %v6409_v51  ;;  %v10467_v29 = vpop.permute.xlu1 %6642  ;;  %v10887_v11 = vld [vmem:[#allocation24_spill] sm:$0xff] }
 0x589   : > { %8114 = vmatprep.subr.msk.bf16.mxu0 %vm573_vm1, %v6635_v20  ;;  %8116 = vmatprep.subr.msk.bf16.mxu1 %vm573_vm1, %v6637_v48  ;;  %v6860_v54 = vpop.permute.xlu0 %6859  ;;  %v6641_v22 = vpack.c.bf16 %v6633_v2, %v6633_v2  ;;  %v6640_v38 = vpack.c.bf16 %v6632_v34, %v6632_v34  ;;  %v10886_v20 = vld [vmem:[#allocation21_spill] sm:$0xff] }
 0x58a   : > { %6532 = vmatprep.mubr.bf16.mxu0 %v10794_v53  ;;  %6575 = vmatprep.mubr.bf16.mxu1 %v10794_v53 }
 0x58b   : > { %v6666_v46 = vsel %vm573_vm1, %v6640_v38, 0  ;;  %v10889_v38 = vld [vmem:[#allocation27_spill] sm:$0xff] }
 0x58c   : > { %v6862_v14 = vpop.permute.xlu1 %6861 }
 0x58d   : > { %v6864_v50 = vpop.permute.xlu0 %6863  ;;  %v6881_v12 = vsel %vm2000_vm7, %v6860_v54, %v6862_v14 }
 0x58e   : > { %v6880_v6 = vsel %vm2000_vm7, %v6862_v14, %v6864_v50  ;;  %v6883_v9 = vmul.f32 %v6881_v12, %v10840_v7 }
 0x58f   : > { %8111 = vmatmul.mubr.msk.bf16.vlgmr.msra.gmra.mrb[92].mxu0 %vm569_vm2, %v6386_v10  ;;  %8113 = vmatmul.mubr.msk.bf16.vlgmr.msra.gmra.mrb[92].mxu1 %vm569_vm2, %v6386_v10  ;;  %v6884_v25 = vmul.f32 %v6880_v6, %v10838_v52 }
 0x590   : > { %6672 = vmatpush1.bf16.msra.mxu0 %v6648_v43  ;;  %6715 = vmatpush1.bf16.msra.mxu1 %v6654_v61  ;;  %v6866_v23 = vpop.permute.xlu1 %6865  ;;  %v6891_v24 = vpack.c.bf16 %v6883_v9, %v6883_v9 }
 0x591   : > { %8120 = vmatprep.subr.msk.bf16.mxu1 %vm573_vm1, %v6641_v22  ;;  %v6613_v55 = vpop.permute.xlu0 %6612  ;;  %6703 = vmatprep.mubr.bf16.mxu0 %v10794_v53  ;;  %v6879_v10 = vsel %vm2000_vm7, %v6864_v50, %v6866_v23  ;;  %v10888_v50 = vld [vmem:[#allocation25_spill] sm:$0xff] }
 0x592   : > { %v6619_v58 = vsel %vm1726_vm6, %v6613_v55, %v6615_v37  ;;  %v6620_v41 = vsel %vm1726_vm6, %v6611_v63, %v6613_v55  ;;  %6746 = vmatprep.mubr.bf16.mxu1 %v10794_v53  ;;  %v6885_v0 = vmul.f32 %v6879_v10, %v10882_v57  ;;  %v6892_v63 = vpack.c.bf16 %v6884_v25, %v6884_v25 }
 0x593   : > { %v6630_v42 = vmul.f32 %v6620_v41, %v10880_v62  ;;  %v6631_v21 = vmul.f32 %v6619_v58, %v10881_v15  ;;  %v10890_v41 = vld [vmem:[#allocation26_spill] sm:$0xff] }
 0x594   : > { %v6874_v18 = vpop.permute.xlu1 %6873  ;;  %v6893_v45 = vpack.c.bf16 %v6885_v0, %v6885_v0 }
 0x595   : > { %v6638_v35 = vpack.c.bf16 %v6630_v42, %v6630_v42  ;;  %v6639_v3 = vpack.c.bf16 %v6631_v21, %v6631_v21  ;;  %v6868_v47 = vpop.permute.xlu0 %6867  ;;  %v6882_v30 = vsel %vm2000_vm7, %v6874_v18, %v6860_v54  ;;  %v6905_v54 = vsel %vm573_vm1, %v6891_v24, 0  ;;  %v10891_v42 = vld [vmem:[#allocation28_spill] sm:$0xff] }
 0x596   : > { %v6878_v56 = vsel %vm2000_vm7, %v6866_v23, %v6868_v47  ;;  %v6890_v44 = vmul.f32 %v6882_v30, %v10884_v28  ;;  %v6911_v31 = vsel %vm573_vm1, %v6893_v45, 0 }
 0x597   : > { %v6886_v36 = vmul.f32 %v6878_v56, %v10883_v32  ;;  %8115 = vmatmul.mubr.msk.bf16.vlgmr.msra.gmra.mrb[88].mxu0 %vm569_vm2, %v10467_v29  ;;  %8117 = vmatmul.mubr.msk.bf16.vlgmr.msra.gmra.mrb[88].mxu1 %vm569_vm2, %v10467_v29  ;;  %v6660_v52 = vsel %vm573_vm1, %v6638_v35, 0  ;;  %v10893_v32 = vld [vmem:[#allocation31_spill] sm:$0xff] }
 0x598   : > { %8118 = vmatprep.subr.msk.bf16.mxu0 %vm573_vm1, %v6639_v3  ;;  %6801 = vmatpush1.bf16.msra.mxu1 %v6666_v46  ;;  %v7117_v7 = vpop.permute.xlu1 %7116  ;;  %v6898_v17 = vpack.c.bf16 %v6890_v44, %v6890_v44 }
 0x599   : > { %v6894_v5 = vpack.c.bf16 %v6886_v36, %v6886_v36  ;;  %6758 = vmatpush1.bf16.msra.mxu0 %v6660_v52  ;;  %v6872_v16 = vpop.permute.xlu0 %6871  ;;  %6789 = vmatprep.mubr.bf16.mxu0 %v10794_v53 }
 0x59a   : > { %8122 = vmatprep.subr.msk.bf16.mxu0 %vm573_vm1, %v6892_v63  ;;  %6832 = vmatprep.mubr.bf16.mxu1 %v10794_v53  ;;  %v6875_v40 = vsel %vm2000_vm7, %v6872_v16, %v6874_v18 }
 0x59b   : > { %8124 = vmatprep.subr.msk.bf16.mxu1 %vm573_vm1, %v6894_v5  ;;  %v6889_v19 = vmul.f32 %v6875_v40, %v10885_v60 }
 0x59c   : > { %v6870_v37 = vpop.permute.xlu1 %6869 }
 0x59d   : > { %v6876_v48 = vsel %vm2000_vm7, %v6870_v37, %v6872_v16  ;;  %v6877_v33 = vsel %vm2000_vm7, %v6868_v47, %v6870_v37  ;;  %v6900_v51 = vpop.permute.xlu0 %6899  ;;  %v6897_v2 = vpack.c.bf16 %v6889_v19, %v6889_v19  ;;  %v10892_v47 = vld [vmem:[#allocation29_spill] sm:$0xff]  ;;  %v8447_v19 = vld [vmem:[%s10683_s1 + $0x40] ss:$0 sm:$0xff] }
 0x59e   : > { %v6888_v26 = vmul.f32 %v6876_v48, %v10886_v20  ;;  %v6887_v49 = vmul.f32 %v6877_v33, %v10887_v11  ;;  %v8449_v11 = vld [vmem:[%s10683_s1 + $0x50] ss:$0 sm:$0xff] }
 0x59f   : > { %8119 = vmatmul.mubr.msk.bf16.vlgmr.msra.gmra.mrb[92].mxu0 %vm569_vm2, %v10467_v29  ;;  %8121 = vmatmul.mubr.msk.bf16.vlgmr.msra.gmra.mrb[92].mxu1 %vm569_vm2, %v10467_v29  ;;  %v6923_v55 = vsel %vm573_vm1, %v6897_v2, 0 }
 0x5a0   : > { %v6896_v27 = vpack.c.bf16 %v6888_v26, %v6888_v26  ;;  %6929 = vmatpush1.bf16.msra.mxu0 %v6905_v54  ;;  %6972 = vmatpush1.bf16.msra.mxu1 %v6911_v31  ;;  %v7121_v59 = vpop.permute.xlu1 %7120  ;;  %v6895_v29 = vpack.c.bf16 %v6887_v49, %v6887_v49 }
 0x5a1   : > { %8128 = vmatprep.subr.msk.bf16.mxu1 %vm573_vm1, %v6898_v17  ;;  %v7119_v4 = vpop.permute.xlu0 %7118  ;;  %6960 = vmatprep.mubr.bf16.mxu0 %v10794_v53 }
 0x5a2   : > { %v7137_v14 = vsel %vm2274_vm8, %v7119_v4, %v7121_v59  ;;  %8126 = vmatprep.subr.msk.bf16.mxu0 %vm573_vm1, %v6896_v27  ;;  %7003 = vmatprep.mubr.bf16.mxu1 %v10794_v53  ;;  %v7138_v34 = vsel %vm2274_vm8, %v7117_v7, %v7119_v4  ;;  %v6917_v21 = vsel %vm573_vm1, %v6895_v29, 0  ;;  %v8450_v29 = vld [vmem:[%s10683_s1 + $0x58] ss:$0 sm:$0xff] }
 0x5a3   : > { %v7141_v39 = vmul.f32 %v7137_v14, %v10888_v50  ;;  %v7140_v58 = vmul.f32 %v7138_v34, %v10889_v38 }
 0x5a4   : > { %v7125_v22 = vpop.permute.xlu1 %7124 }
 0x5a5   : > { %v7149_v43 = vpack.c.bf16 %v7141_v39, %v7141_v39  ;;  %v7123_v61 = vpop.permute.xlu0 %7122  ;;  %v7148_v35 = vpack.c.bf16 %v7140_v58, %v7140_v58 }
 0x5a6   : > { %v7135_v23 = vsel %vm2274_vm8, %v7123_v61, %v7125_v22  ;;  %v7136_v6 = vsel %vm2274_vm8, %v7121_v59, %v7123_v61 }
 0x5a7   : > { %v7142_v62 = vmul.f32 %v7136_v6, %v10890_v41  ;;  %v7143_v15 = vmul.f32 %v7135_v23, %v10891_v42  ;;  %8123 = vmatmul.mubr.msk.bf16.vlgmr.msra.gmra.mrb[88].mxu0 %vm569_vm2, %v6900_v51  ;;  %8125 = vmatmul.mubr.msk.bf16.vlgmr.msra.gmra.mrb[88].mxu1 %vm569_vm2, %v6900_v51  ;;  %v7162_v52 = vsel %vm573_vm1, %v7148_v35, 0  ;;  %v8452_v6 = vld [vmem:[%s10683_s1 + $0x60] ss:$0 sm:$0xff]  ;;  %v8453_v42 = vld [vmem:[%s10683_s1 + $0x68] ss:$0 sm:$0xff] }
 0x5a8   : > { %7015 = vmatpush1.bf16.msra.mxu0 %v6917_v21  ;;  %7058 = vmatpush1.bf16.msra.mxu1 %v6923_v55  ;;  %v7129_v12 = vpop.permute.xlu1 %7128  ;;  %v8454_v21 = vld [vmem:[%s10683_s1 + $0x70] ss:$0 sm:$0xff] }
 0x5a9   : > { %v7151_v25 = vpack.c.bf16 %v7143_v15, %v7143_v15  ;;  %8130 = vmatprep.subr.msk.bf16.mxu0 %vm573_vm1, %v7149_v43  ;;  %v7131_v10 = vpop.permute.xlu0 %7130  ;;  %7046 = vmatprep.mubr.bf16.mxu0 %v10794_v53  ;;  %v7150_v3 = vpack.c.bf16 %v7142_v62, %v7142_v62  ;;  %v8451_v43 = vld [vmem:[%s10683_s1 + $0x78] ss:$0 sm:$0xff] }
 0x5aa   : > { %v7139_v18 = vsel %vm2274_vm8, %v7131_v10, %v7117_v7  ;;  %7089 = vmatprep.mubr.bf16.mxu1 %v10794_v53  ;;  %v7132_v46 = vsel %vm2274_vm8, %v7129_v12, %v7131_v10 }
 0x5ab   : > { %v7147_v56 = vmul.f32 %v7139_v18, %v10892_v47  ;;  %8132 = vmatprep.subr.msk.bf16.mxu1 %vm573_vm1, %v7151_v25  ;;  %v7146_v36 = vmul.f32 %v7132_v46, %v10893_v32  ;;  %v7168_v63 = vsel %vm573_vm1, %v7150_v3, 0 }
 0x5ac   : > { %v10560_v9 = vpop.permute.xlu1 %7156 }
 0x5ad   : > { %v7155_v57 = vpack.c.bf16 %v7147_v56, %v7147_v56  ;;  %v7374_v0 = vpop.permute.xlu0 %7373  ;;  %v7154_v24 = vpack.c.bf16 %v7146_v36, %v7146_v36 }
 0x5af   : > { %8127 = vmatmul.mubr.msk.bf16.vlgmr.msra.gmra.mrb[92].mxu0 %vm569_vm2, %v6900_v51  ;;  %8129 = vmatmul.mubr.msk.bf16.vlgmr.msra.gmra.mrb[92].mxu1 %vm569_vm2, %v6900_v51  ;;  %v7180_v26 = vsel %vm573_vm1, %v7154_v24, 0 }
 0x5b0   : > { %7186 = vmatpush1.bf16.msra.mxu0 %v7162_v52  ;;  %7229 = vmatpush1.bf16.msra.mxu1 %v7168_v63  ;;  %v7376_v30 = vpop.permute.xlu1 %7375 }
 0x5b1   : > { %8136 = vmatprep.subr.msk.bf16.mxu1 %vm573_vm1, %v7155_v57  ;;  %v7127_v7 = vpop.permute.xlu0 %7126  ;;  %7217 = vmatprep.mubr.bf16.mxu0 %v10794_v53  ;;  %v7395_v44 = vsel %vm2548_vm9, %v7374_v0, %v7376_v30 }
 0x5b2   : > { %v7133_v5 = vsel %vm2274_vm8, %v7127_v7, %v7129_v12  ;;  %v7134_v16 = vsel %vm2274_vm8, %v7125_v22, %v7127_v7  ;;  %7260 = vmatprep.mubr.bf16.mxu1 %v10794_v53 }
 0x5b3   : > { %v7144_v45 = vmul.f32 %v7134_v16, %v10850_v1  ;;  %v7145_v28 = vmul.f32 %v7133_v5, %v10851_v8  ;;  %v7397_v1 = vmul.f32 %v8447_v19, %v7395_v44  ;;  %v8448_v8 = vld [vmem:[%s10683_s1 + $0x48] ss:$0 sm:$0xff] }
 0x5b4   : > { %v7380_v40 = vpop.permute.xlu1 %7379 }
 0x5b5   : > { %v7152_v37 = vpack.c.bf16 %v7144_v45, %v7144_v45  ;;  %v7153_v48 = vpack.c.bf16 %v7145_v28, %v7145_v28  ;;  %v7378_v33 = vpop.permute.xlu0 %7377  ;;  %v7405_v59 = vpack.c.bf16 %v7397_v1, %v7397_v1  ;;  %v8146_v1 = vld [vmem:[%s10691_s9 + $0x4] sm:$0xf] }
 0x5b6   : > { %v7393_v51 = vsel %vm2548_vm9, %v7378_v33, %v7380_v40  ;;  %v7394_v60 = vsel %vm2548_vm9, %v7376_v30, %v7378_v33 }
 0x5b7   : > { %v7398_v20 = vmul.f32 %v8448_v8, %v7394_v60  ;;  %8131 = vmatmul.mubr.msk.bf16.vlgmr.msra.gmra.mrb[88].mxu0 %vm569_vm2, %v10560_v9  ;;  %8133 = vmatmul.mubr.msk.bf16.vlgmr.msra.gmra.mrb[88].mxu1 %vm569_vm2, %v10560_v9  ;;  %v7174_v17 = vsel %vm573_vm1, %v7152_v37, 0  ;;  %v7399_v49 = vmul.f32 %v8449_v11, %v7393_v51  ;;  %v7419_v41 = vsel %vm573_vm1, %v7405_v59, 0 }
 0x5b8   : > { %8134 = vmatprep.subr.msk.bf16.mxu0 %vm573_vm1, %v7153_v48  ;;  %7315 = vmatpush1.bf16.msra.mxu1 %v7180_v26  ;;  %v7384_v54 = vpop.permute.xlu1 %7383 }
 0x5b9   : > { %v7406_v31 = vpack.c.bf16 %v7398_v20, %v7398_v20  ;;  %7272 = vmatpush1.bf16.msra.mxu0 %v7174_v17  ;;  %7303 = vmatprep.mubr.bf16.mxu0 %v10794_v53  ;;  %v7407_v2 = vpack.c.bf16 %v7399_v49, %v7399_v49 }
 0x5ba   : > { %v7382_v27 = vpop.permute.xlu0 %7381  ;;  %7346 = vmatprep.mubr.bf16.mxu1 %v10794_v53 }
 0x5bb   : > { %v7392_v4 = vsel %vm2548_vm9, %v7380_v40, %v7382_v27  ;;  %8138 = vmatprep.subr.msk.bf16.mxu0 %vm573_vm1, %v7406_v31  ;;  %v7391_v14 = vsel %vm2548_vm9, %v7382_v27, %v7384_v54  ;;  %v7425_v12 = vsel %vm573_vm1, %v7407_v2, 0 }
 0x5bc   : > { %v7400_v50 = vmul.f32 %v8450_v29, %v7392_v4  ;;  %v7388_v39 = vpop.permute.xlu1 %7387  ;;  %v7401_v55 = vmul.f32 %v8452_v6, %v7391_v14 }
 0x5bd   : > { %v7396_v34 = vsel %vm2548_vm9, %v7388_v39, %v7374_v0 }
 0x5be   : > { %v7408_v22 = vpack.c.bf16 %v7400_v50, %v7400_v50  ;;  %v7404_v61 = vmul.f32 %v8451_v43, %v7396_v34  ;;  %v7386_v23 = vpop.permute.xlu0 %7385  ;;  %v7409_v10 = vpack.c.bf16 %v7401_v55, %v7401_v55 }
 0x5bf   : > { %v7389_v38 = vsel %vm2548_vm9, %v7386_v23, %v7388_v39  ;;  %v7390_v58 = vsel %vm2548_vm9, %v7384_v54, %v7386_v23  ;;  %8135 = vmatmul.mubr.msk.bf16.vlgmr.msra.gmra.mrb[92].mxu0 %vm569_vm2, %v10560_v9  ;;  %8137 = vmatmul.mubr.msk.bf16.vlgmr.msra.gmra.mrb[92].mxu1 %vm569_vm2, %v10560_v9 }
 0x5c0   : > { %v7412_v62 = vpack.c.bf16 %v7404_v61, %v7404_v61  ;;  %v7402_v15 = vmul.f32 %v8453_v42, %v7390_v58  ;;  %v7403_v13 = vmul.f32 %v8454_v21, %v7389_v38  ;;  %7443 = vmatpush1.bf16.msra.mxu0 %v7419_v41  ;;  %8140 = vmatprep.subr.msk.bf16.mxu1 %vm573_vm1, %v7408_v22  ;;  %v7431_v3 = vsel %vm573_vm1, %v7409_v10, 0 }
 0x5c1   : > { %7486 = vmatpush1.bf16.msra.mxu1 %v7425_v12  ;;  %7517 = vmatprep.mubr.bf16.mxu1 %v10794_v53 }
 0x5c2   : > { %v7410_v25 = vpack.c.bf16 %v7402_v15, %v7402_v15  ;;  %8144 = vmatprep.subr.msk.bf16.mxu1 %vm573_vm1, %v7412_v62  ;;  %7474 = vmatprep.mubr.bf16.mxu0 %v10794_v53  ;;  %v7411_v18 = vpack.c.bf16 %v7403_v13, %v7403_v13  ;;  %v7414_v35 = vpop.permute.xlu0 %7413  ;;  %v10895_v62 = vld [vmem:[#allocation8_spill] sm:$0xff]  ;;  %v10896_v15 = vld [vmem:[#allocation7_spill] sm:$0xff] }
 0x5c4   : > { %8142 = vmatprep.subr.msk.bf16.mxu0 %vm573_vm1, %v7410_v25  ;;  %v7437_v47 = vsel %vm573_vm1, %v7411_v18, 0  ;;  %v10897_v25 = vld [vmem:[#allocation17_spill] sm:$0xff] }
 0x5c5   : > { %v10898_v18 = vld [vmem:[#allocation9_spill] sm:$0xff] }
 0x5c7   : > { %8139 = vmatmul.mubr.msk.bf16.vlgmr.msra.gmra.mrb[88].mxu0 %vm569_vm2, %v7414_v35  ;;  %8141 = vmatmul.mubr.msk.bf16.vlgmr.msra.gmra.mrb[88].mxu1 %vm569_vm2, %v7414_v35 }
 0x5c8   : > { %7529 = vmatpush1.bf16.msra.mxu0 %v7431_v3  ;;  %7572 = vmatpush1.bf16.msra.mxu1 %v7437_v47 }
 0x5c9   : > { %7560 = vmatprep.mubr.bf16.mxu0 %v10794_v53  ;;  %7603 = vmatprep.mubr.bf16.mxu1 %v10794_v53 }
 0x5cd   : > { %v7661_v34 = vpop.permute.xlu1 %7660 }
 0x5cf   : > { %8143 = vmatmul.mubr.msk.bf16.vlgmr.msra.gmra.mrb[92].mxu0 %vm569_vm2, %v7414_v35  ;;  %8145 = vmatmul.mubr.msk.bf16.vlgmr.msra.gmra.mrb[92].mxu1 %vm569_vm2, %v7414_v35 }
 0x5d0   : > { %7698 = vmatprep.mubr.bf16.mxu0 %v10794_v53  ;;  %7739 = vmatprep.mubr.bf16.mxu1 %v10794_v53 }
 0x69a   : > { %v7476_v56 = vpop.f32.mrb[88].mxu0  ;;  %v7519_v46 = vpop.f32.mrb[88].mxu1 }
 0x69b   : > { %v7478_v9 = vpop.f32.mrb[89].mxu0  ;;  %v7521_v57 = vpop.f32.mrb[89].mxu1  ;;  %v7630_v36 = vmax.f32 %v7476_v56, 0.0  ;;  %v7632_v52 = vmax.f32 %v7519_v46, 0.0 }
 0x69c   : > { %v7480_v0 = vpop.f32.mrb[90].mxu0  ;;  %v7523_v32 = vpop.f32.mrb[90].mxu1  ;;  %v7631_v16 = vmax.f32 %v7478_v9, 0.0  ;;  %v7633_v24 = vmax.f32 %v7521_v57, 0.0 }
 0x69d   : > { %v7638_v63 = vmax.f32 %v7480_v0, 0.0  ;;  %v7640_v30 = vmax.f32 %v7523_v32, 0.0  ;;  %v7482_v7 = vpop.f32.mrb[91].mxu0  ;;  %v7525_v5 = vpop.f32.mrb[91].mxu1 }
 0x69e   : > { %v7639_v45 = vmax.f32 %v7482_v7, 0.0  ;;  %v7641_v28 = vmax.f32 %v7525_v5, 0.0  ;;  %v10900_v7 = vld [vmem:[#allocation10_spill] sm:$0xff] }
 0x69f   : > { %v7648_v44 = vpack.c.bf16 %v7638_v63, %v7630_v36  ;;  %v7650_v40 = vpack.c.bf16 %v7640_v30, %v7632_v52  ;;  %v10899_v63 = vld [vmem:[#allocation32_spill] sm:$0xff] }
 0x6a0   : > { %v7649_v37 = vpack.c.bf16 %v7639_v45, %v7631_v16  ;;  %v7651_v48 = vpack.c.bf16 %v7641_v28, %v7633_v24  ;;  %v10901_v45 = vld [vmem:[#allocation30_spill] sm:$0xff] }
 0x6a2   : > { %v7562_v33 = vpop.f32.mrb[92].mxu0  ;;  %v7605_v51 = vpop.f32.mrb[92].mxu1  ;;  %7666 = vmatprep.subr.bf16.mxu0 %v7649_v37  ;;  %7707 = vmatprep.subr.bf16.mxu1 %v7651_v48 }
 0x6a3   : > { %v7564_v60 = vpop.f32.mrb[93].mxu0  ;;  %v7607_v19 = vpop.f32.mrb[93].mxu1  ;;  %7667 = vmatpush1.bf16.msra.mxu0 %v7648_v44  ;;  %7708 = vmatpush1.bf16.msra.mxu1 %v7650_v40  ;;  %v7634_v26 = vmax.f32 %v7562_v33, 0.0  ;;  %v7636_v17 = vmax.f32 %v7605_v51, 0.0  ;;  %v10902_v44 = vld [vmem:[#allocation20_spill] sm:$0xff] }
 0x6a4   : > { %v7566_v8 = vpop.f32.mrb[94].mxu0  ;;  %v7609_v20 = vpop.f32.mrb[94].mxu1  ;;  %v7635_v27 = vmax.f32 %v7564_v60, 0.0  ;;  %v7637_v59 = vmax.f32 %v7607_v19, 0.0 }
 0x6a5   : > { %v7642_v11 = vmax.f32 %v7566_v8, 0.0  ;;  %v7644_v49 = vmax.f32 %v7609_v20, 0.0  ;;  %v7568_v54 = vpop.f32.mrb[95].mxu0  ;;  %v7611_v31 = vpop.f32.mrb[95].mxu1 }
 0x6a6   : > { %v7643_v4 = vmax.f32 %v7568_v54, 0.0  ;;  %v7645_v2 = vmax.f32 %v7611_v31, 0.0  ;;  %8148 = vmatmul.mubr.msk.bf16.vlgmr.msra.gmra.mrb[96].mxu0 %vm5169_vm10, %v8146_v1  ;;  %8149 = vmatmul.mubr.msk.bf16.vlgmr.msra.gmra.mrb[96].mxu1 %vm5169_vm10, %v8146_v1 }
 0x6a7   : > { %v7652_v14 = vpack.c.bf16 %v7642_v11, %v7634_v26  ;;  %v7654_v29 = vpack.c.bf16 %v7644_v49, %v7636_v17  ;;  %7780 = vmatprep.mubr.bf16.mxu0 %v10794_v53  ;;  %7821 = vmatprep.mubr.bf16.mxu1 %v10794_v53 }
 0x6a8   : > { %v7653_v50 = vpack.c.bf16 %v7643_v4, %v7635_v27  ;;  %v7655_v39 = vpack.c.bf16 %v7645_v2, %v7637_v59 }
 0x6aa   : > { %7748 = vmatprep.subr.bf16.mxu0 %v7653_v50  ;;  %7789 = vmatprep.subr.bf16.mxu1 %v7655_v39 }
 0x6ab   : > { %7749 = vmatpush1.bf16.msra.mxu0 %v7652_v14  ;;  %7790 = vmatpush1.bf16.msra.mxu1 %v7654_v29 }
 0x6ae   : > { %8150 = vmatmul.mubr.msk.bf16.vlgmr.msra.gmra.mrb[100].mxu0 %vm5169_vm10, %v8146_v1  ;;  %8151 = vmatmul.mubr.msk.bf16.vlgmr.msra.gmra.mrb[100].mxu1 %vm5169_vm10, %v8146_v1 }
 0x779   : > { %v7700_v22 = vpop.f32.mrb[96].mxu0  ;;  %v7741_v43 = vpop.f32.mrb[96].mxu1 }
 0x77a   : > { %v7701_v61 = vadd.f32 %v7700_v22, %v7661_v34  ;;  %v7742_v23 = vadd.f32 %v7741_v43, %v7661_v34  ;;  %v7702_v6 = vpop.f32.mrb[97].mxu0  ;;  %v7743_v55 = vpop.f32.mrb[97].mxu1 }
 0x77b   : > { %v7703_v53 = vadd.f32 %v7702_v6, %v7661_v34  ;;  %v7744_v38 = vadd.f32 %v7743_v55, %v7661_v34  ;;  %v7704_v58 = vpop.f32.mrb[98].mxu0  ;;  %v7745_v41 = vpop.f32.mrb[98].mxu1 }
 0x77c   : > { %v7830_v42 = vadd.f32 %v7701_v61, %v10895_v62  ;;  %v7832_v21 = vadd.f32 %v7742_v23, %v10896_v15  ;;  %v7705_v13 = vpop.f32.mrb[99].mxu0  ;;  %v7746_v12 = vpop.f32.mrb[99].mxu1 }
 0x77d   : > { %v7831_v10 = vadd.f32 %v7703_v53, %v10897_v25  ;;  %v7833_v35 = vadd.f32 %v7744_v38, %v10898_v18 }
 0x77e   : > { %7838 = vst [vmem:[%s10661_s23] sm:$0xff] %v7830_v42  ;;  %7840 = vst [vmem:[%s10661_s23 + $0x10] sm:$0xff] %v7832_v21 }
 0x77f   : > { %7839 = vst [vmem:[%s10661_s23 + $0x8] sm:$0xff] %v7831_v10  ;;  %7841 = vst [vmem:[%s10661_s23 + $0x18] sm:$0xff] %v7833_v35 }
 0x781   : > { %v7782_v3 = vpop.f32.mrb[100].mxu0  ;;  %v7823_v47 = vpop.f32.mrb[100].mxu1 }
 0x782   : > { %v7783_v56 = vadd.f32 %v7782_v3, %v7661_v34  ;;  %v7824_v46 = vadd.f32 %v7823_v47, %v7661_v34  ;;  %v7784_v9 = vpop.f32.mrb[101].mxu0  ;;  %v7825_v57 = vpop.f32.mrb[101].mxu1 }
 0x783   : > { %v7785_v0 = vadd.f32 %v7784_v9, %v7661_v34  ;;  %v7826_v32 = vadd.f32 %v7825_v57, %v7661_v34  ;;  %v7786_v36 = vpop.f32.mrb[102].mxu0  ;;  %v7827_v52 = vpop.f32.mrb[102].mxu1 }
 0x784   : > { %v7834_v30 = vadd.f32 %v7783_v56, %v10899_v63  ;;  %v7836_v5 = vadd.f32 %v7824_v46, %v10900_v7  ;;  %v7787_v16 = vpop.f32.mrb[103].mxu0  ;;  %v7828_v24 = vpop.f32.mrb[103].mxu1 }
 0x785   : > { %v7835_v28 = vadd.f32 %v7785_v0, %v10901_v45  ;;  %v7837_v40 = vadd.f32 %v7826_v32, %v10902_v44 }
 0x786   : > { %7842 = vst [vmem:[%s10661_s23 + $0x20] sm:$0xff] %v7834_v30  ;;  %7844 = vst [vmem:[%s10661_s23 + $0x30] sm:$0xff] %v7836_v5 }
 0x787   : > { %7843 = vst [vmem:[%s10661_s23 + $0x28] sm:$0xff] %v7835_v28  ;;  %7845 = vst [vmem:[%s10661_s23 + $0x38] sm:$0xff] %v7837_v40 }
 0x788 PF: > { %s21_s17 = sadd.s32 1, %s8461_s17  }
 0x789   : > { %p18_p4 = scmp.ge.s32.totalorder %s21_s17, 4  }
 0x78b   :  { %20 = sbr.rel (!%p18_p4) target bundleno = 1 (0x1), region = 99 }

</bundles_post_ra>
